<compile_context>
chip_gen: v7x
topology: tpu7x:2x2x1
jax: 0.10.0
libtpu: 0.0.40
codegen_flags: <defaults>
</compile_context>

<pallas_src>
import functools

import jax
import jax.numpy as jnp
import numpy as np
from jax.experimental import pallas as pl


# ----------------------------------------------------------------------------
# The single fused kernel (whole batch, whole module forward).
# ----------------------------------------------------------------------------
def _dwconv35_cat_kernel(xpf_ref, dw3_ref, dw5_ref, pw3_ref, pw5_ref,
                         fw_ref, par_ref, mask_ref, o_ref, *, eps, h, w, wp):
    # xpf_ref : (N, Cin, Lf)      zero-padded input, spatially flattened with
    #                             row stride wp (= W + 4); Lf has a small zero
    #                             tail so every tap slice stays in bounds.
    # dwK_ref : (K*K, Cin, 1)     depthwise taps (per input channel)
    # pwK_ref : (Cin, Cout, 1)    pointwise 1x1 weights
    # fw_ref  : (2*Cout, Cout, 1) fuse 1x1 weights
    # par_ref : (5, Cout, 1)      [gamma3, beta3, gamma5, beta5, fuse_bias]
    # mask_ref: (1, 1, P)         1.0 on the W valid columns of each wp-row
    # o_ref   : (N, Cout, P)      output, flattened with the same row stride
    n, cin = xpf_ref.shape[0], xpf_ref.shape[1]
    cout = o_ref.shape[1]
    p = o_ref.shape[2]                        # = h * wp
    inv_cnt = 1.0 / (n * h * w)

    # ---- depthwise 3x3 & 5x5, sharing the 25 tap loads ----------------------
    # Tap (kh, kw) of the 5x5 (pad=2) conv is the ref slice [off, off+p) with
    # off = kh*wp + kw; the 3x3 (pad=1) conv uses the 9 taps with kh,kw in 1..3.
    acc3 = None
    acc5 = None
    for kh in range(5):
        for kw in range(5):
            off = kh * wp + kw
            tap = xpf_ref[:, :, off:off + p]                      # (n,cin,p)
            w5 = dw5_ref[kh * 5 + kw]                             # (cin,1)
            acc5 = tap * w5 if acc5 is None else acc5 + tap * w5
            if 1 <= kh <= 3 and 1 <= kw <= 3:
                w3 = dw3_ref[(kh - 1) * 3 + (kw - 1)]
                acc3 = tap * w3 if acc3 is None else acc3 + tap * w3
    # Zero the (wp - w) garbage columns once so the BN batch sums stay exact
    # (everything downstream of the garbage columns is dropped in the wrapper).
    m = mask_ref[...]
    acc3 = acc3 * m
    acc5 = acc5 * m

    def pw_bn_relu(acc, pw_ref, gamma, beta):
        # pointwise 1x1: cin broadcast-FMAs on the VPU (MXU would be <1% used).
        y = acc[:, 0:1, :] * pw_ref[0]                            # (n,cout,p)
        for ci in range(1, cin):
            y = y + acc[:, ci:ci + 1, :] * pw_ref[ci]
        # BatchNorm2d, training-mode batch stats (biased variance) + ReLU.
        s = jnp.sum(jnp.sum(y, axis=2, keepdims=True), axis=0, keepdims=True)
        ss = jnp.sum(jnp.sum(y * y, axis=2, keepdims=True),
                     axis=0, keepdims=True)
        mean = s * inv_cnt
        var = ss * inv_cnt - mean * mean                          # biased
        scale = gamma * jax.lax.rsqrt(var + eps)                  # EUP
        shift = beta - mean * scale
        return jnp.maximum(y * scale + shift, 0.0)

    # Branch 3, folded into the fuse output immediately so y3 is dead before
    # y5 is materialised (halves the peak live vreg set).
    y3 = pw_bn_relu(acc3, pw3_ref, par_ref[0], par_ref[1])
    out = y3[:, 0:1, :] * fw_ref[0]
    for co in range(1, cout):
        out = out + y3[:, co:co + 1, :] * fw_ref[co]

    # Branch 5 + its fuse contribution, then the fuse bias.
    y5 = pw_bn_relu(acc5, pw5_ref, par_ref[2], par_ref[3])
    for co in range(cout):
        out = out + y5[:, co:co + 1, :] * fw_ref[cout + co]

    o_ref[...] = out + par_ref[4]


# ----------------------------------------------------------------------------
# Wrapper (PyTorch-compatible NCHW / OIHW interface).
# ----------------------------------------------------------------------------
def dwconv3_5_cat(x, dw3_w, pw3_w, gamma3, beta3,
                  dw5_w, pw5_w, gamma5, beta5,
                  fuse_w, fuse_b, *, eps=1e-5):
    # x      : (N, Cin, H, W)
    # dwK_w  : (Cin, 1, K, K)       depthwise weights (groups=Cin, bias=False)
    # pwK_w  : (Cout, Cin, 1, 1)    pointwise weights (bias=False)
    # gammaK, betaK : (Cout,)       BatchNorm2d affine parameters
    # fuse_w : (Cout, 2*Cout, 1, 1) fuse 1x1 conv weight
    # fuse_b : (Cout,)              fuse 1x1 conv bias
    n, cin, h, w = x.shape
    cout = pw3_w.shape[0]
    f32 = jnp.float32
    pad = 2                                   # max(3, 5) // 2
    wp = w + 2 * pad
    p = h * wp

    # One pad + reshape: 2 halo rows top, 2+1 bottom (the extra zero row keeps
    # the largest tap slice, offset 4*wp+4 of length p, in bounds), 2 halo
    # columns each side; then flatten the spatial dims with row stride wp.
    xpf = jnp.pad(x.astype(f32), ((0, 0), (0, 0), (pad, pad + 1), (pad, pad)))
    xpf = xpf.reshape(n, cin, (h + 2 * pad + 1) * wp)

    def dw_pack(dw):                          # (Cin,1,K,K) -> (K*K, Cin, 1)
        k = dw.shape[-1]
        return jnp.transpose(dw.reshape(cin, k * k), (1, 0))[:, :, None].astype(f32)

    def mix_pack(wm):                         # (Cout, Cany,1,1) -> (Cany, Cout, 1)
        return jnp.transpose(wm[:, :, 0, 0], (1, 0))[:, :, None].astype(f32)

    params = jnp.stack([gamma3, beta3, gamma5, beta5,
                        fuse_b]).astype(f32)[:, :, None]          # (5, Cout, 1)
    mask = (jnp.arange(p, dtype=jnp.int32) % wp < w).astype(f32).reshape(1, 1, p)

    kernel = functools.partial(_dwconv35_cat_kernel, eps=eps, h=h, w=w, wp=wp)
    out_flat = pl.pallas_call(
        kernel,
        out_shape=jax.ShapeDtypeStruct((n, cout, p), f32),
    )(xpf, dw_pack(dw3_w), dw_pack(dw5_w),
      mix_pack(pw3_w), mix_pack(pw5_w), mix_pack(fuse_w), params, mask)

    # Free row-major reshape, then drop the 4 halo columns per row.
    return out_flat.reshape(n, cout, h, wp)[:, :, :, :w]


# ----------------------------------------------------------------------------
# Pure-JAX reference (matches PyTorch semantics, training-mode BatchNorm).
# ----------------------------------------------------------------------------
def _dwsep_ref(x, dw_w, pw_w, gamma, beta, eps):
    cin = x.shape[1]
    k = dw_w.shape[-1]
    pad = k // 2
    hp = jax.lax.Precision.HIGHEST
    d = jax.lax.conv_general_dilated(
        x, dw_w, (1, 1), [(pad, pad), (pad, pad)],
        dimension_numbers=("NCHW", "OIHW", "NCHW"),
        feature_group_count=cin, precision=hp)
    pt = jax.lax.conv_general_dilated(
        d, pw_w, (1, 1), "VALID",
        dimension_numbers=("NCHW", "OIHW", "NCHW"), precision=hp)
    mean = pt.mean(axis=(0, 2, 3), keepdims=True)
    var = pt.var(axis=(0, 2, 3), keepdims=True)   # biased (ddof=0)
    g = gamma[None, :, None, None]
    b = beta[None, :, None, None]
    return jnp.maximum((pt - mean) / jnp.sqrt(var + eps) * g + b, 0.0)


def _reference(x, dw3_w, pw3_w, g3, b3, dw5_w, pw5_w, g5, b5,
               fuse_w, fuse_b, *, eps=1e-5):
    y3 = _dwsep_ref(x, dw3_w, pw3_w, g3, b3, eps)
    y5 = _dwsep_ref(x, dw5_w, pw5_w, g5, b5, eps)
    cat = jnp.concatenate([y3, y5], axis=1)
    out = jax.lax.conv_general_dilated(
        cat, fuse_w, (1, 1), "VALID",
        dimension_numbers=("NCHW", "OIHW", "NCHW"),
        precision=jax.lax.Precision.HIGHEST)
    return out + fuse_b[None, :, None, None]


if __name__ == "__main__":
    # Small shapes consistent with the module: N=2, Cin=4, Cout=8, H=W=16.
    N, Cin, Cout, H, W = 2, 4, 8, 16, 16

    key = jax.random.PRNGKey(0)
    ks = jax.random.split(key, 11)
    x = jax.random.normal(ks[0], (N, Cin, H, W), dtype=jnp.float32)
    dw3_w = 0.3 * jax.random.normal(ks[1], (Cin, 1, 3, 3), dtype=jnp.float32)
    dw5_w = 0.2 * jax.random.normal(ks[2], (Cin, 1, 5, 5), dtype=jnp.float32)
    pw3_w = 0.3 * jax.random.normal(ks[3], (Cout, Cin, 1, 1), dtype=jnp.float32)
    pw5_w = 0.3 * jax.random.normal(ks[4], (Cout, Cin, 1, 1), dtype=jnp.float32)
    gamma3 = 1.0 + 0.1 * jax.random.normal(ks[5], (Cout,), dtype=jnp.float32)
    beta3 = 0.1 * jax.random.normal(ks[6], (Cout,), dtype=jnp.float32)
    gamma5 = 1.0 + 0.1 * jax.random.normal(ks[7], (Cout,), dtype=jnp.float32)
    beta5 = 0.1 * jax.random.normal(ks[8], (Cout,), dtype=jnp.float32)
    fuse_w = 0.2 * jax.random.normal(ks[9], (Cout, 2 * Cout, 1, 1),
                                     dtype=jnp.float32)
    fuse_b = 0.1 * jax.random.normal(ks[10], (Cout,), dtype=jnp.float32)

    out = dwconv3_5_cat(x, dw3_w, pw3_w, gamma3, beta3,
                        dw5_w, pw5_w, gamma5, beta5, fuse_w, fuse_b)
    out = jax.block_until_ready(out)

    ref = _reference(x, dw3_w, pw3_w, gamma3, beta3,
                     dw5_w, pw5_w, gamma5, beta5, fuse_w, fuse_b)
    np.testing.assert_allclose(np.asarray(out), np.asarray(ref),
                               rtol=1e-4, atol=1e-4)
    print("KERNEL_OK")
</pallas_src>

<mosaic_0001>
module attributes {stable_mosaic.version = 11 : i64} {
  func.func @_dwconv35_cat_kernel(%arg0: memref<2x4x420xf32, #tpu.memory_space<vmem>>, %arg1: memref<9x4x1xf32, #tpu.memory_space<vmem>>, %arg2: memref<25x4x1xf32, #tpu.memory_space<vmem>>, %arg3: memref<4x8x1xf32, #tpu.memory_space<vmem>>, %arg4: memref<4x8x1xf32, #tpu.memory_space<vmem>>, %arg5: memref<16x8x1xf32, #tpu.memory_space<vmem>>, %arg6: memref<5x8x1xf32, #tpu.memory_space<vmem>>, %arg7: memref<1x1x320xf32, #tpu.memory_space<vmem>>, %arg8: memref<2x8x320xf32, #tpu.memory_space<vmem>>) attributes {dimension_semantics = [], scalar_prefetch = 0 : i64, scratch_operands = 0 : i64, tpu.core_type = #tpu.core_type<tc>} {
    %c0 = arith.constant 0 : index
    %c0_0 = arith.constant 0 : index
    %c0_1 = arith.constant 0 : index
    %0 = vector.load %arg0[%c0, %c0_0, %c0_1] : memref<2x4x420xf32, #tpu.memory_space<vmem>>, vector<2x4x320xf32>
    %c0_2 = arith.constant 0 : index
    %c0_3 = arith.constant 0 : index
    %c0_4 = arith.constant 0 : index
    %1 = vector.load %arg2[%c0_2, %c0_3, %c0_4] : memref<25x4x1xf32, #tpu.memory_space<vmem>>, vector<1x4x1xf32>
    %2 = vector.shape_cast %1 : vector<1x4x1xf32> to vector<4x1xf32>
    %3 = vector.shape_cast %2 : vector<4x1xf32> to vector<1x4x1xf32>
    %4 = vector.broadcast %3 : vector<1x4x1xf32> to vector<2x4x320xf32>
    %5 = arith.mulf %0, %4 : vector<2x4x320xf32>
    %c0_5 = arith.constant 0 : index
    %c0_6 = arith.constant 0 : index
    %c1 = arith.constant 1 : index
    %6 = vector.load %arg0[%c0_5, %c0_6, %c1] : memref<2x4x420xf32, #tpu.memory_space<vmem>>, vector<2x4x320xf32>
    %c1_7 = arith.constant 1 : index
    %c0_8 = arith.constant 0 : index
    %c0_9 = arith.constant 0 : index
    %7 = vector.load %arg2[%c1_7, %c0_8, %c0_9] : memref<25x4x1xf32, #tpu.memory_space<vmem>>, vector<1x4x1xf32>
    %8 = vector.shape_cast %7 : vector<1x4x1xf32> to vector<4x1xf32>
    %9 = vector.shape_cast %8 : vector<4x1xf32> to vector<1x4x1xf32>
    %10 = vector.broadcast %9 : vector<1x4x1xf32> to vector<2x4x320xf32>
    %11 = arith.mulf %6, %10 : vector<2x4x320xf32>
    %12 = arith.addf %5, %11 : vector<2x4x320xf32>
    %c0_10 = arith.constant 0 : index
    %c0_11 = arith.constant 0 : index
    %c2 = arith.constant 2 : index
    %13 = vector.load %arg0[%c0_10, %c0_11, %c2] : memref<2x4x420xf32, #tpu.memory_space<vmem>>, vector<2x4x320xf32>
    %c2_12 = arith.constant 2 : index
    %c0_13 = arith.constant 0 : index
    %c0_14 = arith.constant 0 : index
    %14 = vector.load %arg2[%c2_12, %c0_13, %c0_14] : memref<25x4x1xf32, #tpu.memory_space<vmem>>, vector<1x4x1xf32>
    %15 = vector.shape_cast %14 : vector<1x4x1xf32> to vector<4x1xf32>
    %16 = vector.shape_cast %15 : vector<4x1xf32> to vector<1x4x1xf32>
    %17 = vector.broadcast %16 : vector<1x4x1xf32> to vector<2x4x320xf32>
    %18 = arith.mulf %13, %17 : vector<2x4x320xf32>
    %19 = arith.addf %12, %18 : vector<2x4x320xf32>
    %c0_15 = arith.constant 0 : index
    %c0_16 = arith.constant 0 : index
    %c3 = arith.constant 3 : index
    %20 = vector.load %arg0[%c0_15, %c0_16, %c3] : memref<2x4x420xf32, #tpu.memory_space<vmem>>, vector<2x4x320xf32>
    %c3_17 = arith.constant 3 : index
    %c0_18 = arith.constant 0 : index
    %c0_19 = arith.constant 0 : index
    %21 = vector.load %arg2[%c3_17, %c0_18, %c0_19] : memref<25x4x1xf32, #tpu.memory_space<vmem>>, vector<1x4x1xf32>
    %22 = vector.shape_cast %21 : vector<1x4x1xf32> to vector<4x1xf32>
    %23 = vector.shape_cast %22 : vector<4x1xf32> to vector<1x4x1xf32>
    %24 = vector.broadcast %23 : vector<1x4x1xf32> to vector<2x4x320xf32>
    %25 = arith.mulf %20, %24 : vector<2x4x320xf32>
    %26 = arith.addf %19, %25 : vector<2x4x320xf32>
    %c0_20 = arith.constant 0 : index
    %c0_21 = arith.constant 0 : index
    %c4 = arith.constant 4 : index
    %27 = vector.load %arg0[%c0_20, %c0_21, %c4] : memref<2x4x420xf32, #tpu.memory_space<vmem>>, vector<2x4x320xf32>
    %c4_22 = arith.constant 4 : index
    %c0_23 = arith.constant 0 : index
    %c0_24 = arith.constant 0 : index
    %28 = vector.load %arg2[%c4_22, %c0_23, %c0_24] : memref<25x4x1xf32, #tpu.memory_space<vmem>>, vector<1x4x1xf32>
    %29 = vector.shape_cast %28 : vector<1x4x1xf32> to vector<4x1xf32>
    %30 = vector.shape_cast %29 : vector<4x1xf32> to vector<1x4x1xf32>
    %31 = vector.broadcast %30 : vector<1x4x1xf32> to vector<2x4x320xf32>
    %32 = arith.mulf %27, %31 : vector<2x4x320xf32>
    %33 = arith.addf %26, %32 : vector<2x4x320xf32>
    %c0_25 = arith.constant 0 : index
    %c0_26 = arith.constant 0 : index
    %c20 = arith.constant 20 : index
    %34 = vector.load %arg0[%c0_25, %c0_26, %c20] : memref<2x4x420xf32, #tpu.memory_space<vmem>>, vector<2x4x320xf32>
    %c5 = arith.constant 5 : index
    %c0_27 = arith.constant 0 : index
    %c0_28 = arith.constant 0 : index
    %35 = vector.load %arg2[%c5, %c0_27, %c0_28] : memref<25x4x1xf32, #tpu.memory_space<vmem>>, vector<1x4x1xf32>
    %36 = vector.shape_cast %35 : vector<1x4x1xf32> to vector<4x1xf32>
    %37 = vector.shape_cast %36 : vector<4x1xf32> to vector<1x4x1xf32>
    %38 = vector.broadcast %37 : vector<1x4x1xf32> to vector<2x4x320xf32>
    %39 = arith.mulf %34, %38 : vector<2x4x320xf32>
    %40 = arith.addf %33, %39 : vector<2x4x320xf32>
    %c0_29 = arith.constant 0 : index
    %c0_30 = arith.constant 0 : index
    %c21 = arith.constant 21 : index
    %41 = vector.load %arg0[%c0_29, %c0_30, %c21] : memref<2x4x420xf32, #tpu.memory_space<vmem>>, vector<2x4x320xf32>
    %c6 = arith.constant 6 : index
    %c0_31 = arith.constant 0 : index
    %c0_32 = arith.constant 0 : index
    %42 = vector.load %arg2[%c6, %c0_31, %c0_32] : memref<25x4x1xf32, #tpu.memory_space<vmem>>, vector<1x4x1xf32>
    %43 = vector.shape_cast %42 : vector<1x4x1xf32> to vector<4x1xf32>
    %44 = vector.shape_cast %43 : vector<4x1xf32> to vector<1x4x1xf32>
    %45 = vector.broadcast %44 : vector<1x4x1xf32> to vector<2x4x320xf32>
    %46 = arith.mulf %41, %45 : vector<2x4x320xf32>
    %47 = arith.addf %40, %46 : vector<2x4x320xf32>
    %c0_33 = arith.constant 0 : index
    %c0_34 = arith.constant 0 : index
    %c0_35 = arith.constant 0 : index
    %48 = vector.load %arg1[%c0_33, %c0_34, %c0_35] : memref<9x4x1xf32, #tpu.memory_space<vmem>>, vector<1x4x1xf32>
    %49 = vector.shape_cast %48 : vector<1x4x1xf32> to vector<4x1xf32>
    %50 = vector.shape_cast %49 : vector<4x1xf32> to vector<1x4x1xf32>
    %51 = vector.broadcast %50 : vector<1x4x1xf32> to vector<2x4x320xf32>
    %52 = arith.mulf %41, %51 : vector<2x4x320xf32>
    %c0_36 = arith.constant 0 : index
    %c0_37 = arith.constant 0 : index
    %c22 = arith.constant 22 : index
    %53 = vector.load %arg0[%c0_36, %c0_37, %c22] : memref<2x4x420xf32, #tpu.memory_space<vmem>>, vector<2x4x320xf32>
    %c7 = arith.constant 7 : index
    %c0_38 = arith.constant 0 : index
    %c0_39 = arith.constant 0 : index
    %54 = vector.load %arg2[%c7, %c0_38, %c0_39] : memref<25x4x1xf32, #tpu.memory_space<vmem>>, vector<1x4x1xf32>
    %55 = vector.shape_cast %54 : vector<1x4x1xf32> to vector<4x1xf32>
    %56 = vector.shape_cast %55 : vector<4x1xf32> to vector<1x4x1xf32>
    %57 = vector.broadcast %56 : vector<1x4x1xf32> to vector<2x4x320xf32>
    %58 = arith.mulf %53, %57 : vector<2x4x320xf32>
    %59 = arith.addf %47, %58 : vector<2x4x320xf32>
    %c1_40 = arith.constant 1 : index
    %c0_41 = arith.constant 0 : index
    %c0_42 = arith.constant 0 : index
    %60 = vector.load %arg1[%c1_40, %c0_41, %c0_42] : memref<9x4x1xf32, #tpu.memory_space<vmem>>, vector<1x4x1xf32>
    %61 = vector.shape_cast %60 : vector<1x4x1xf32> to vector<4x1xf32>
    %62 = vector.shape_cast %61 : vector<4x1xf32> to vector<1x4x1xf32>
    %63 = vector.broadcast %62 : vector<1x4x1xf32> to vector<2x4x320xf32>
    %64 = arith.mulf %53, %63 : vector<2x4x320xf32>
    %65 = arith.addf %52, %64 : vector<2x4x320xf32>
    %c0_43 = arith.constant 0 : index
    %c0_44 = arith.constant 0 : index
    %c23 = arith.constant 23 : index
    %66 = vector.load %arg0[%c0_43, %c0_44, %c23] : memref<2x4x420xf32, #tpu.memory_space<vmem>>, vector<2x4x320xf32>
    %c8 = arith.constant 8 : index
    %c0_45 = arith.constant 0 : index
    %c0_46 = arith.constant 0 : index
    %67 = vector.load %arg2[%c8, %c0_45, %c0_46] : memref<25x4x1xf32, #tpu.memory_space<vmem>>, vector<1x4x1xf32>
    %68 = vector.shape_cast %67 : vector<1x4x1xf32> to vector<4x1xf32>
    %69 = vector.shape_cast %68 : vector<4x1xf32> to vector<1x4x1xf32>
    %70 = vector.broadcast %69 : vector<1x4x1xf32> to vector<2x4x320xf32>
    %71 = arith.mulf %66, %70 : vector<2x4x320xf32>
    %72 = arith.addf %59, %71 : vector<2x4x320xf32>
    %c2_47 = arith.constant 2 : index
    %c0_48 = arith.constant 0 : index
    %c0_49 = arith.constant 0 : index
    %73 = vector.load %arg1[%c2_47, %c0_48, %c0_49] : memref<9x4x1xf32, #tpu.memory_space<vmem>>, vector<1x4x1xf32>
    %74 = vector.shape_cast %73 : vector<1x4x1xf32> to vector<4x1xf32>
    %75 = vector.shape_cast %74 : vector<4x1xf32> to vector<1x4x1xf32>
    %76 = vector.broadcast %75 : vector<1x4x1xf32> to vector<2x4x320xf32>
    %77 = arith.mulf %66, %76 : vector<2x4x320xf32>
    %78 = arith.addf %65, %77 : vector<2x4x320xf32>
    %c0_50 = arith.constant 0 : index
    %c0_51 = arith.constant 0 : index
    %c24 = arith.constant 24 : index
    %79 = vector.load %arg0[%c0_50, %c0_51, %c24] : memref<2x4x420xf32, #tpu.memory_space<vmem>>, vector<2x4x320xf32>
    %c9 = arith.constant 9 : index
    %c0_52 = arith.constant 0 : index
    %c0_53 = arith.constant 0 : index
    %80 = vector.load %arg2[%c9, %c0_52, %c0_53] : memref<25x4x1xf32, #tpu.memory_space<vmem>>, vector<1x4x1xf32>
    %81 = vector.shape_cast %80 : vector<1x4x1xf32> to vector<4x1xf32>
    %82 = vector.shape_cast %81 : vector<4x1xf32> to vector<1x4x1xf32>
    %83 = vector.broadcast %82 : vector<1x4x1xf32> to vector<2x4x320xf32>
    %84 = arith.mulf %79, %83 : vector<2x4x320xf32>
    %85 = arith.addf %72, %84 : vector<2x4x320xf32>
    %c0_54 = arith.constant 0 : index
    %c0_55 = arith.constant 0 : index
    %c40 = arith.constant 40 : index
    %86 = vector.load %arg0[%c0_54, %c0_55, %c40] : memref<2x4x420xf32, #tpu.memory_space<vmem>>, vector<2x4x320xf32>
    %c10 = arith.constant 10 : index
    %c0_56 = arith.constant 0 : index
    %c0_57 = arith.constant 0 : index
    %87 = vector.load %arg2[%c10, %c0_56, %c0_57] : memref<25x4x1xf32, #tpu.memory_space<vmem>>, vector<1x4x1xf32>
    %88 = vector.shape_cast %87 : vector<1x4x1xf32> to vector<4x1xf32>
    %89 = vector.shape_cast %88 : vector<4x1xf32> to vector<1x4x1xf32>
    %90 = vector.broadcast %89 : vector<1x4x1xf32> to vector<2x4x320xf32>
    %91 = arith.mulf %86, %90 : vector<2x4x320xf32>
    %92 = arith.addf %85, %91 : vector<2x4x320xf32>
    %c0_58 = arith.constant 0 : index
    %c0_59 = arith.constant 0 : index
    %c41 = arith.constant 41 : index
    %93 = vector.load %arg0[%c0_58, %c0_59, %c41] : memref<2x4x420xf32, #tpu.memory_space<vmem>>, vector<2x4x320xf32>
    %c11 = arith.constant 11 : index
    %c0_60 = arith.constant 0 : index
    %c0_61 = arith.constant 0 : index
    %94 = vector.load %arg2[%c11, %c0_60, %c0_61] : memref<25x4x1xf32, #tpu.memory_space<vmem>>, vector<1x4x1xf32>
    %95 = vector.shape_cast %94 : vector<1x4x1xf32> to vector<4x1xf32>
    %96 = vector.shape_cast %95 : vector<4x1xf32> to vector<1x4x1xf32>
    %97 = vector.broadcast %96 : vector<1x4x1xf32> to vector<2x4x320xf32>
    %98 = arith.mulf %93, %97 : vector<2x4x320xf32>
    %99 = arith.addf %92, %98 : vector<2x4x320xf32>
    %c3_62 = arith.constant 3 : index
    %c0_63 = arith.constant 0 : index
    %c0_64 = arith.constant 0 : index
    %100 = vector.load %arg1[%c3_62, %c0_63, %c0_64] : memref<9x4x1xf32, #tpu.memory_space<vmem>>, vector<1x4x1xf32>
    %101 = vector.shape_cast %100 : vector<1x4x1xf32> to vector<4x1xf32>
    %102 = vector.shape_cast %101 : vector<4x1xf32> to vector<1x4x1xf32>
    %103 = vector.broadcast %102 : vector<1x4x1xf32> to vector<2x4x320xf32>
    %104 = arith.mulf %93, %103 : vector<2x4x320xf32>
    %105 = arith.addf %78, %104 : vector<2x4x320xf32>
    %c0_65 = arith.constant 0 : index
    %c0_66 = arith.constant 0 : index
    %c42 = arith.constant 42 : index
    %106 = vector.load %arg0[%c0_65, %c0_66, %c42] : memref<2x4x420xf32, #tpu.memory_space<vmem>>, vector<2x4x320xf32>
    %c12 = arith.constant 12 : index
    %c0_67 = arith.constant 0 : index
    %c0_68 = arith.constant 0 : index
    %107 = vector.load %arg2[%c12, %c0_67, %c0_68] : memref<25x4x1xf32, #tpu.memory_space<vmem>>, vector<1x4x1xf32>
    %108 = vector.shape_cast %107 : vector<1x4x1xf32> to vector<4x1xf32>
    %109 = vector.shape_cast %108 : vector<4x1xf32> to vector<1x4x1xf32>
    %110 = vector.broadcast %109 : vector<1x4x1xf32> to vector<2x4x320xf32>
    %111 = arith.mulf %106, %110 : vector<2x4x320xf32>
    %112 = arith.addf %99, %111 : vector<2x4x320xf32>
    %c4_69 = arith.constant 4 : index
    %c0_70 = arith.constant 0 : index
    %c0_71 = arith.constant 0 : index
    %113 = vector.load %arg1[%c4_69, %c0_70, %c0_71] : memref<9x4x1xf32, #tpu.memory_space<vmem>>, vector<1x4x1xf32>
    %114 = vector.shape_cast %113 : vector<1x4x1xf32> to vector<4x1xf32>
    %115 = vector.shape_cast %114 : vector<4x1xf32> to vector<1x4x1xf32>
    %116 = vector.broadcast %115 : vector<1x4x1xf32> to vector<2x4x320xf32>
    %117 = arith.mulf %106, %116 : vector<2x4x320xf32>
    %118 = arith.addf %105, %117 : vector<2x4x320xf32>
    %c0_72 = arith.constant 0 : index
    %c0_73 = arith.constant 0 : index
    %c43 = arith.constant 43 : index
    %119 = vector.load %arg0[%c0_72, %c0_73, %c43] : memref<2x4x420xf32, #tpu.memory_space<vmem>>, vector<2x4x320xf32>
    %c13 = arith.constant 13 : index
    %c0_74 = arith.constant 0 : index
    %c0_75 = arith.constant 0 : index
    %120 = vector.load %arg2[%c13, %c0_74, %c0_75] : memref<25x4x1xf32, #tpu.memory_space<vmem>>, vector<1x4x1xf32>
    %121 = vector.shape_cast %120 : vector<1x4x1xf32> to vector<4x1xf32>
    %122 = vector.shape_cast %121 : vector<4x1xf32> to vector<1x4x1xf32>
    %123 = vector.broadcast %122 : vector<1x4x1xf32> to vector<2x4x320xf32>
    %124 = arith.mulf %119, %123 : vector<2x4x320xf32>
    %125 = arith.addf %112, %124 : vector<2x4x320xf32>
    %c5_76 = arith.constant 5 : index
    %c0_77 = arith.constant 0 : index
    %c0_78 = arith.constant 0 : index
    %126 = vector.load %arg1[%c5_76, %c0_77, %c0_78] : memref<9x4x1xf32, #tpu.memory_space<vmem>>, vector<1x4x1xf32>
    %127 = vector.shape_cast %126 : vector<1x4x1xf32> to vector<4x1xf32>
    %128 = vector.shape_cast %127 : vector<4x1xf32> to vector<1x4x1xf32>
    %129 = vector.broadcast %128 : vector<1x4x1xf32> to vector<2x4x320xf32>
    %130 = arith.mulf %119, %129 : vector<2x4x320xf32>
    %131 = arith.addf %118, %130 : vector<2x4x320xf32>
    %c0_79 = arith.constant 0 : index
    %c0_80 = arith.constant 0 : index
    %c44 = arith.constant 44 : index
    %132 = vector.load %arg0[%c0_79, %c0_80, %c44] : memref<2x4x420xf32, #tpu.memory_space<vmem>>, vector<2x4x320xf32>
    %c14 = arith.constant 14 : index
    %c0_81 = arith.constant 0 : index
    %c0_82 = arith.constant 0 : index
    %133 = vector.load %arg2[%c14, %c0_81, %c0_82] : memref<25x4x1xf32, #tpu.memory_space<vmem>>, vector<1x4x1xf32>
    %134 = vector.shape_cast %133 : vector<1x4x1xf32> to vector<4x1xf32>
    %135 = vector.shape_cast %134 : vector<4x1xf32> to vector<1x4x1xf32>
    %136 = vector.broadcast %135 : vector<1x4x1xf32> to vector<2x4x320xf32>
    %137 = arith.mulf %132, %136 : vector<2x4x320xf32>
    %138 = arith.addf %125, %137 : vector<2x4x320xf32>
    %c0_83 = arith.constant 0 : index
    %c0_84 = arith.constant 0 : index
    %c60 = arith.constant 60 : index
    %139 = vector.load %arg0[%c0_83, %c0_84, %c60] : memref<2x4x420xf32, #tpu.memory_space<vmem>>, vector<2x4x320xf32>
    %c15 = arith.constant 15 : index
    %c0_85 = arith.constant 0 : index
    %c0_86 = arith.constant 0 : index
    %140 = vector.load %arg2[%c15, %c0_85, %c0_86] : memref<25x4x1xf32, #tpu.memory_space<vmem>>, vector<1x4x1xf32>
    %141 = vector.shape_cast %140 : vector<1x4x1xf32> to vector<4x1xf32>
    %142 = vector.shape_cast %141 : vector<4x1xf32> to vector<1x4x1xf32>
    %143 = vector.broadcast %142 : vector<1x4x1xf32> to vector<2x4x320xf32>
    %144 = arith.mulf %139, %143 : vector<2x4x320xf32>
    %145 = arith.addf %138, %144 : vector<2x4x320xf32>
    %c0_87 = arith.constant 0 : index
    %c0_88 = arith.constant 0 : index
    %c61 = arith.constant 61 : index
    %146 = vector.load %arg0[%c0_87, %c0_88, %c61] : memref<2x4x420xf32, #tpu.memory_space<vmem>>, vector<2x4x320xf32>
    %c16 = arith.constant 16 : index
    %c0_89 = arith.constant 0 : index
    %c0_90 = arith.constant 0 : index
    %147 = vector.load %arg2[%c16, %c0_89, %c0_90] : memref<25x4x1xf32, #tpu.memory_space<vmem>>, vector<1x4x1xf32>
    %148 = vector.shape_cast %147 : vector<1x4x1xf32> to vector<4x1xf32>
    %149 = vector.shape_cast %148 : vector<4x1xf32> to vector<1x4x1xf32>
    %150 = vector.broadcast %149 : vector<1x4x1xf32> to vector<2x4x320xf32>
    %151 = arith.mulf %146, %150 : vector<2x4x320xf32>
    %152 = arith.addf %145, %151 : vector<2x4x320xf32>
    %c6_91 = arith.constant 6 : index
    %c0_92 = arith.constant 0 : index
    %c0_93 = arith.constant 0 : index
    %153 = vector.load %arg1[%c6_91, %c0_92, %c0_93] : memref<9x4x1xf32, #tpu.memory_space<vmem>>, vector<1x4x1xf32>
    %154 = vector.shape_cast %153 : vector<1x4x1xf32> to vector<4x1xf32>
    %155 = vector.shape_cast %154 : vector<4x1xf32> to vector<1x4x1xf32>
    %156 = vector.broadcast %155 : vector<1x4x1xf32> to vector<2x4x320xf32>
    %157 = arith.mulf %146, %156 : vector<2x4x320xf32>
    %158 = arith.addf %131, %157 : vector<2x4x320xf32>
    %c0_94 = arith.constant 0 : index
    %c0_95 = arith.constant 0 : index
    %c62 = arith.constant 62 : index
    %159 = vector.load %arg0[%c0_94, %c0_95, %c62] : memref<2x4x420xf32, #tpu.memory_space<vmem>>, vector<2x4x320xf32>
    %c17 = arith.constant 17 : index
    %c0_96 = arith.constant 0 : index
    %c0_97 = arith.constant 0 : index
    %160 = vector.load %arg2[%c17, %c0_96, %c0_97] : memref<25x4x1xf32, #tpu.memory_space<vmem>>, vector<1x4x1xf32>
    %161 = vector.shape_cast %160 : vector<1x4x1xf32> to vector<4x1xf32>
    %162 = vector.shape_cast %161 : vector<4x1xf32> to vector<1x4x1xf32>
    %163 = vector.broadcast %162 : vector<1x4x1xf32> to vector<2x4x320xf32>
    %164 = arith.mulf %159, %163 : vector<2x4x320xf32>
    %165 = arith.addf %152, %164 : vector<2x4x320xf32>
    %c7_98 = arith.constant 7 : index
    %c0_99 = arith.constant 0 : index
    %c0_100 = arith.constant 0 : index
    %166 = vector.load %arg1[%c7_98, %c0_99, %c0_100] : memref<9x4x1xf32, #tpu.memory_space<vmem>>, vector<1x4x1xf32>
    %167 = vector.shape_cast %166 : vector<1x4x1xf32> to vector<4x1xf32>
    %168 = vector.shape_cast %167 : vector<4x1xf32> to vector<1x4x1xf32>
    %169 = vector.broadcast %168 : vector<1x4x1xf32> to vector<2x4x320xf32>
    %170 = arith.mulf %159, %169 : vector<2x4x320xf32>
    %171 = arith.addf %158, %170 : vector<2x4x320xf32>
    %c0_101 = arith.constant 0 : index
    %c0_102 = arith.constant 0 : index
    %c63 = arith.constant 63 : index
    %172 = vector.load %arg0[%c0_101, %c0_102, %c63] : memref<2x4x420xf32, #tpu.memory_space<vmem>>, vector<2x4x320xf32>
    %c18 = arith.constant 18 : index
    %c0_103 = arith.constant 0 : index
    %c0_104 = arith.constant 0 : index
    %173 = vector.load %arg2[%c18, %c0_103, %c0_104] : memref<25x4x1xf32, #tpu.memory_space<vmem>>, vector<1x4x1xf32>
    %174 = vector.shape_cast %173 : vector<1x4x1xf32> to vector<4x1xf32>
    %175 = vector.shape_cast %174 : vector<4x1xf32> to vector<1x4x1xf32>
    %176 = vector.broadcast %175 : vector<1x4x1xf32> to vector<2x4x320xf32>
    %177 = arith.mulf %172, %176 : vector<2x4x320xf32>
    %178 = arith.addf %165, %177 : vector<2x4x320xf32>
    %c8_105 = arith.constant 8 : index
    %c0_106 = arith.constant 0 : index
    %c0_107 = arith.constant 0 : index
    %179 = vector.load %arg1[%c8_105, %c0_106, %c0_107] : memref<9x4x1xf32, #tpu.memory_space<vmem>>, vector<1x4x1xf32>
    %180 = vector.shape_cast %179 : vector<1x4x1xf32> to vector<4x1xf32>
    %181 = vector.shape_cast %180 : vector<4x1xf32> to vector<1x4x1xf32>
    %182 = vector.broadcast %181 : vector<1x4x1xf32> to vector<2x4x320xf32>
    %183 = arith.mulf %172, %182 : vector<2x4x320xf32>
    %184 = arith.addf %171, %183 : vector<2x4x320xf32>
    %c0_108 = arith.constant 0 : index
    %c0_109 = arith.constant 0 : index
    %c64 = arith.constant 64 : index
    %185 = vector.load %arg0[%c0_108, %c0_109, %c64] : memref<2x4x420xf32, #tpu.memory_space<vmem>>, vector<2x4x320xf32>
    %c19 = arith.constant 19 : index
    %c0_110 = arith.constant 0 : index
    %c0_111 = arith.constant 0 : index
    %186 = vector.load %arg2[%c19, %c0_110, %c0_111] : memref<25x4x1xf32, #tpu.memory_space<vmem>>, vector<1x4x1xf32>
    %187 = vector.shape_cast %186 : vector<1x4x1xf32> to vector<4x1xf32>
    %188 = vector.shape_cast %187 : vector<4x1xf32> to vector<1x4x1xf32>
    %189 = vector.broadcast %188 : vector<1x4x1xf32> to vector<2x4x320xf32>
    %190 = arith.mulf %185, %189 : vector<2x4x320xf32>
    %191 = arith.addf %178, %190 : vector<2x4x320xf32>
    %c0_112 = arith.constant 0 : index
    %c0_113 = arith.constant 0 : index
    %c80 = arith.constant 80 : index
    %192 = vector.load %arg0[%c0_112, %c0_113, %c80] : memref<2x4x420xf32, #tpu.memory_space<vmem>>, vector<2x4x320xf32>
    %c20_114 = arith.constant 20 : index
    %c0_115 = arith.constant 0 : index
    %c0_116 = arith.constant 0 : index
    %193 = vector.load %arg2[%c20_114, %c0_115, %c0_116] : memref<25x4x1xf32, #tpu.memory_space<vmem>>, vector<1x4x1xf32>
    %194 = vector.shape_cast %193 : vector<1x4x1xf32> to vector<4x1xf32>
    %195 = vector.shape_cast %194 : vector<4x1xf32> to vector<1x4x1xf32>
    %196 = vector.broadcast %195 : vector<1x4x1xf32> to vector<2x4x320xf32>
    %197 = arith.mulf %192, %196 : vector<2x4x320xf32>
    %198 = arith.addf %191, %197 : vector<2x4x320xf32>
    %c0_117 = arith.constant 0 : index
    %c0_118 = arith.constant 0 : index
    %c81 = arith.constant 81 : index
    %199 = vector.load %arg0[%c0_117, %c0_118, %c81] : memref<2x4x420xf32, #tpu.memory_space<vmem>>, vector<2x4x320xf32>
    %c21_119 = arith.constant 21 : index
    %c0_120 = arith.constant 0 : index
    %c0_121 = arith.constant 0 : index
    %200 = vector.load %arg2[%c21_119, %c0_120, %c0_121] : memref<25x4x1xf32, #tpu.memory_space<vmem>>, vector<1x4x1xf32>
    %201 = vector.shape_cast %200 : vector<1x4x1xf32> to vector<4x1xf32>
    %202 = vector.shape_cast %201 : vector<4x1xf32> to vector<1x4x1xf32>
    %203 = vector.broadcast %202 : vector<1x4x1xf32> to vector<2x4x320xf32>
    %204 = arith.mulf %199, %203 : vector<2x4x320xf32>
    %205 = arith.addf %198, %204 : vector<2x4x320xf32>
    %c0_122 = arith.constant 0 : index
    %c0_123 = arith.constant 0 : index
    %c82 = arith.constant 82 : index
    %206 = vector.load %arg0[%c0_122, %c0_123, %c82] : memref<2x4x420xf32, #tpu.memory_space<vmem>>, vector<2x4x320xf32>
    %c22_124 = arith.constant 22 : index
    %c0_125 = arith.constant 0 : index
    %c0_126 = arith.constant 0 : index
    %207 = vector.load %arg2[%c22_124, %c0_125, %c0_126] : memref<25x4x1xf32, #tpu.memory_space<vmem>>, vector<1x4x1xf32>
    %208 = vector.shape_cast %207 : vector<1x4x1xf32> to vector<4x1xf32>
    %209 = vector.shape_cast %208 : vector<4x1xf32> to vector<1x4x1xf32>
    %210 = vector.broadcast %209 : vector<1x4x1xf32> to vector<2x4x320xf32>
    %211 = arith.mulf %206, %210 : vector<2x4x320xf32>
    %212 = arith.addf %205, %211 : vector<2x4x320xf32>
    %c0_127 = arith.constant 0 : index
    %c0_128 = arith.constant 0 : index
    %c83 = arith.constant 83 : index
    %213 = vector.load %arg0[%c0_127, %c0_128, %c83] : memref<2x4x420xf32, #tpu.memory_space<vmem>>, vector<2x4x320xf32>
    %c23_129 = arith.constant 23 : index
    %c0_130 = arith.constant 0 : index
    %c0_131 = arith.constant 0 : index
    %214 = vector.load %arg2[%c23_129, %c0_130, %c0_131] : memref<25x4x1xf32, #tpu.memory_space<vmem>>, vector<1x4x1xf32>
    %215 = vector.shape_cast %214 : vector<1x4x1xf32> to vector<4x1xf32>
    %216 = vector.shape_cast %215 : vector<4x1xf32> to vector<1x4x1xf32>
    %217 = vector.broadcast %216 : vector<1x4x1xf32> to vector<2x4x320xf32>
    %218 = arith.mulf %213, %217 : vector<2x4x320xf32>
    %219 = arith.addf %212, %218 : vector<2x4x320xf32>
    %c0_132 = arith.constant 0 : index
    %c0_133 = arith.constant 0 : index
    %c84 = arith.constant 84 : index
    %220 = vector.load %arg0[%c0_132, %c0_133, %c84] : memref<2x4x420xf32, #tpu.memory_space<vmem>>, vector<2x4x320xf32>
    %c24_134 = arith.constant 24 : index
    %c0_135 = arith.constant 0 : index
    %c0_136 = arith.constant 0 : index
    %221 = vector.load %arg2[%c24_134, %c0_135, %c0_136] : memref<25x4x1xf32, #tpu.memory_space<vmem>>, vector<1x4x1xf32>
    %222 = vector.shape_cast %221 : vector<1x4x1xf32> to vector<4x1xf32>
    %223 = vector.shape_cast %222 : vector<4x1xf32> to vector<1x4x1xf32>
    %224 = vector.broadcast %223 : vector<1x4x1xf32> to vector<2x4x320xf32>
    %225 = arith.mulf %220, %224 : vector<2x4x320xf32>
    %226 = arith.addf %219, %225 : vector<2x4x320xf32>
    %c0_137 = arith.constant 0 : index
    %c0_138 = arith.constant 0 : index
    %c0_139 = arith.constant 0 : index
    %227 = vector.load %arg7[%c0_137, %c0_138, %c0_139] : memref<1x1x320xf32, #tpu.memory_space<vmem>>, vector<1x1x320xf32>
    %228 = vector.broadcast %227 : vector<1x1x320xf32> to vector<2x4x320xf32>
    %229 = arith.mulf %184, %228 : vector<2x4x320xf32>
    %230 = vector.broadcast %227 : vector<1x1x320xf32> to vector<2x4x320xf32>
    %231 = arith.mulf %226, %230 : vector<2x4x320xf32>
    %c0_140 = arith.constant 0 : index
    %c0_141 = arith.constant 0 : index
    %c0_142 = arith.constant 0 : index
    %232 = vector.load %arg6[%c0_140, %c0_141, %c0_142] : memref<5x8x1xf32, #tpu.memory_space<vmem>>, vector<1x8x1xf32>
    %233 = vector.shape_cast %232 : vector<1x8x1xf32> to vector<8x1xf32>
    %c1_143 = arith.constant 1 : index
    %c0_144 = arith.constant 0 : index
    %c0_145 = arith.constant 0 : index
    %234 = vector.load %arg6[%c1_143, %c0_144, %c0_145] : memref<5x8x1xf32, #tpu.memory_space<vmem>>, vector<1x8x1xf32>
    %235 = vector.shape_cast %234 : vector<1x8x1xf32> to vector<8x1xf32>
    %236 = vector.extract_strided_slice %229 {offsets = [0, 0, 0], sizes = [2, 1, 320], strides = [1, 1, 1]} : vector<2x4x320xf32> to vector<2x1x320xf32>
    %c0_146 = arith.constant 0 : index
    %c0_147 = arith.constant 0 : index
    %c0_148 = arith.constant 0 : index
    %237 = vector.load %arg3[%c0_146, %c0_147, %c0_148] : memref<4x8x1xf32, #tpu.memory_space<vmem>>, vector<1x8x1xf32>
    %238 = vector.shape_cast %237 : vector<1x8x1xf32> to vector<8x1xf32>
    %239 = vector.shape_cast %238 : vector<8x1xf32> to vector<1x8x1xf32>
    %240 = vector.broadcast %236 : vector<2x1x320xf32> to vector<2x8x320xf32>
    %241 = vector.broadcast %239 : vector<1x8x1xf32> to vector<2x8x320xf32>
    %242 = arith.mulf %240, %241 : vector<2x8x320xf32>
    %243 = vector.extract_strided_slice %229 {offsets = [0, 1, 0], sizes = [2, 1, 320], strides = [1, 1, 1]} : vector<2x4x320xf32> to vector<2x1x320xf32>
    %c1_149 = arith.constant 1 : index
    %c0_150 = arith.constant 0 : index
    %c0_151 = arith.constant 0 : index
    %244 = vector.load %arg3[%c1_149, %c0_150, %c0_151] : memref<4x8x1xf32, #tpu.memory_space<vmem>>, vector<1x8x1xf32>
    %245 = vector.shape_cast %244 : vector<1x8x1xf32> to vector<8x1xf32>
    %246 = vector.shape_cast %245 : vector<8x1xf32> to vector<1x8x1xf32>
    %247 = vector.broadcast %243 : vector<2x1x320xf32> to vector<2x8x320xf32>
    %248 = vector.broadcast %246 : vector<1x8x1xf32> to vector<2x8x320xf32>
    %249 = arith.mulf %247, %248 : vector<2x8x320xf32>
    %250 = arith.addf %242, %249 : vector<2x8x320xf32>
    %251 = vector.extract_strided_slice %229 {offsets = [0, 2, 0], sizes = [2, 1, 320], strides = [1, 1, 1]} : vector<2x4x320xf32> to vector<2x1x320xf32>
    %c2_152 = arith.constant 2 : index
    %c0_153 = arith.constant 0 : index
    %c0_154 = arith.constant 0 : index
    %252 = vector.load %arg3[%c2_152, %c0_153, %c0_154] : memref<4x8x1xf32, #tpu.memory_space<vmem>>, vector<1x8x1xf32>
    %253 = vector.shape_cast %252 : vector<1x8x1xf32> to vector<8x1xf32>
    %254 = vector.shape_cast %253 : vector<8x1xf32> to vector<1x8x1xf32>
    %255 = vector.broadcast %251 : vector<2x1x320xf32> to vector<2x8x320xf32>
    %256 = vector.broadcast %254 : vector<1x8x1xf32> to vector<2x8x320xf32>
    %257 = arith.mulf %255, %256 : vector<2x8x320xf32>
    %258 = arith.addf %250, %257 : vector<2x8x320xf32>
    %259 = vector.extract_strided_slice %229 {offsets = [0, 3, 0], sizes = [2, 1, 320], strides = [1, 1, 1]} : vector<2x4x320xf32> to vector<2x1x320xf32>
    %c3_155 = arith.constant 3 : index
    %c0_156 = arith.constant 0 : index
    %c0_157 = arith.constant 0 : index
    %260 = vector.load %arg3[%c3_155, %c0_156, %c0_157] : memref<4x8x1xf32, #tpu.memory_space<vmem>>, vector<1x8x1xf32>
    %261 = vector.shape_cast %260 : vector<1x8x1xf32> to vector<8x1xf32>
    %262 = vector.shape_cast %261 : vector<8x1xf32> to vector<1x8x1xf32>
    %263 = vector.broadcast %259 : vector<2x1x320xf32> to vector<2x8x320xf32>
    %264 = vector.broadcast %262 : vector<1x8x1xf32> to vector<2x8x320xf32>
    %265 = arith.mulf %263, %264 : vector<2x8x320xf32>
    %266 = arith.addf %258, %265 : vector<2x8x320xf32>
    %cst = arith.constant dense<0.000000e+00> : vector<2x8xf32>
    %267 = vector.multi_reduction <add>, %266, %cst [2] : vector<2x8x320xf32> to vector<2x8xf32>
    %268 = vector.shape_cast %267 : vector<2x8xf32> to vector<2x8x1xf32>
    %cst_158 = arith.constant dense<0.000000e+00> : vector<8x1xf32>
    %269 = vector.multi_reduction <add>, %268, %cst_158 [0] : vector<2x8x1xf32> to vector<8x1xf32>
    %270 = vector.shape_cast %269 : vector<8x1xf32> to vector<1x8x1xf32>
    %271 = arith.mulf %266, %266 : vector<2x8x320xf32>
    %cst_159 = arith.constant dense<0.000000e+00> : vector<2x8xf32>
    %272 = vector.multi_reduction <add>, %271, %cst_159 [2] : vector<2x8x320xf32> to vector<2x8xf32>
    %273 = vector.shape_cast %272 : vector<2x8xf32> to vector<2x8x1xf32>
    %cst_160 = arith.constant dense<0.000000e+00> : vector<8x1xf32>
    %274 = vector.multi_reduction <add>, %273, %cst_160 [0] : vector<2x8x1xf32> to vector<8x1xf32>
    %275 = vector.shape_cast %274 : vector<8x1xf32> to vector<1x8x1xf32>
    %cst_161 = arith.constant 0.001953125 : f32
    %276 = vector.broadcast %cst_161 : f32 to vector<1x8x1xf32>
    %277 = arith.mulf %270, %276 : vector<1x8x1xf32>
    %cst_162 = arith.constant 0.001953125 : f32
    %278 = vector.broadcast %cst_162 : f32 to vector<1x8x1xf32>
    %279 = arith.mulf %275, %278 : vector<1x8x1xf32>
    %280 = arith.mulf %277, %277 : vector<1x8x1xf32>
    %281 = arith.subf %279, %280 : vector<1x8x1xf32>
    %cst_163 = arith.constant 9.99999974E-6 : f32
    %282 = vector.broadcast %cst_163 : f32 to vector<1x8x1xf32>
    %283 = arith.addf %281, %282 : vector<1x8x1xf32>
    %284 = math.rsqrt %283 : vector<1x8x1xf32>
    %285 = vector.shape_cast %233 : vector<8x1xf32> to vector<1x8x1xf32>
    %286 = arith.mulf %285, %284 : vector<1x8x1xf32>
    %287 = arith.mulf %277, %286 : vector<1x8x1xf32>
    %288 = vector.shape_cast %235 : vector<8x1xf32> to vector<1x8x1xf32>
    %289 = arith.subf %288, %287 : vector<1x8x1xf32>
    %290 = vector.broadcast %286 : vector<1x8x1xf32> to vector<2x8x320xf32>
    %291 = arith.mulf %266, %290 : vector<2x8x320xf32>
    %292 = vector.broadcast %289 : vector<1x8x1xf32> to vector<2x8x320xf32>
    %293 = arith.addf %291, %292 : vector<2x8x320xf32>
    %cst_164 = arith.constant 0.000000e+00 : f32
    %294 = vector.broadcast %cst_164 : f32 to vector<2x8x320xf32>
    %295 = arith.maximumf %293, %294 : vector<2x8x320xf32>
    %296 = vector.extract_strided_slice %295 {offsets = [0, 0, 0], sizes = [2, 1, 320], strides = [1, 1, 1]} : vector<2x8x320xf32> to vector<2x1x320xf32>
    %c0_165 = arith.constant 0 : index
    %c0_166 = arith.constant 0 : index
    %c0_167 = arith.constant 0 : index
    %297 = vector.load %arg5[%c0_165, %c0_166, %c0_167] : memref<16x8x1xf32, #tpu.memory_space<vmem>>, vector<1x8x1xf32>
    %298 = vector.shape_cast %297 : vector<1x8x1xf32> to vector<8x1xf32>
    %299 = vector.shape_cast %298 : vector<8x1xf32> to vector<1x8x1xf32>
    %300 = vector.broadcast %296 : vector<2x1x320xf32> to vector<2x8x320xf32>
    %301 = vector.broadcast %299 : vector<1x8x1xf32> to vector<2x8x320xf32>
    %302 = arith.mulf %300, %301 : vector<2x8x320xf32>
    %303 = vector.extract_strided_slice %295 {offsets = [0, 1, 0], sizes = [2, 1, 320], strides = [1, 1, 1]} : vector<2x8x320xf32> to vector<2x1x320xf32>
    %c1_168 = arith.constant 1 : index
    %c0_169 = arith.constant 0 : index
    %c0_170 = arith.constant 0 : index
    %304 = vector.load %arg5[%c1_168, %c0_169, %c0_170] : memref<16x8x1xf32, #tpu.memory_space<vmem>>, vector<1x8x1xf32>
    %305 = vector.shape_cast %304 : vector<1x8x1xf32> to vector<8x1xf32>
    %306 = vector.shape_cast %305 : vector<8x1xf32> to vector<1x8x1xf32>
    %307 = vector.broadcast %303 : vector<2x1x320xf32> to vector<2x8x320xf32>
    %308 = vector.broadcast %306 : vector<1x8x1xf32> to vector<2x8x320xf32>
    %309 = arith.mulf %307, %308 : vector<2x8x320xf32>
    %310 = arith.addf %302, %309 : vector<2x8x320xf32>
    %311 = vector.extract_strided_slice %295 {offsets = [0, 2, 0], sizes = [2, 1, 320], strides = [1, 1, 1]} : vector<2x8x320xf32> to vector<2x1x320xf32>
    %c2_171 = arith.constant 2 : index
    %c0_172 = arith.constant 0 : index
    %c0_173 = arith.constant 0 : index
    %312 = vector.load %arg5[%c2_171, %c0_172, %c0_173] : memref<16x8x1xf32, #tpu.memory_space<vmem>>, vector<1x8x1xf32>
    %313 = vector.shape_cast %312 : vector<1x8x1xf32> to vector<8x1xf32>
    %314 = vector.shape_cast %313 : vector<8x1xf32> to vector<1x8x1xf32>
    %315 = vector.broadcast %311 : vector<2x1x320xf32> to vector<2x8x320xf32>
    %316 = vector.broadcast %314 : vector<1x8x1xf32> to vector<2x8x320xf32>
    %317 = arith.mulf %315, %316 : vector<2x8x320xf32>
    %318 = arith.addf %310, %317 : vector<2x8x320xf32>
    %319 = vector.extract_strided_slice %295 {offsets = [0, 3, 0], sizes = [2, 1, 320], strides = [1, 1, 1]} : vector<2x8x320xf32> to vector<2x1x320xf32>
    %c3_174 = arith.constant 3 : index
    %c0_175 = arith.constant 0 : index
    %c0_176 = arith.constant 0 : index
    %320 = vector.load %arg5[%c3_174, %c0_175, %c0_176] : memref<16x8x1xf32, #tpu.memory_space<vmem>>, vector<1x8x1xf32>
    %321 = vector.shape_cast %320 : vector<1x8x1xf32> to vector<8x1xf32>
    %322 = vector.shape_cast %321 : vector<8x1xf32> to vector<1x8x1xf32>
    %323 = vector.broadcast %319 : vector<2x1x320xf32> to vector<2x8x320xf32>
    %324 = vector.broadcast %322 : vector<1x8x1xf32> to vector<2x8x320xf32>
    %325 = arith.mulf %323, %324 : vector<2x8x320xf32>
    %326 = arith.addf %318, %325 : vector<2x8x320xf32>
    %327 = vector.extract_strided_slice %295 {offsets = [0, 4, 0], sizes = [2, 1, 320], strides = [1, 1, 1]} : vector<2x8x320xf32> to vector<2x1x320xf32>
    %c4_177 = arith.constant 4 : index
    %c0_178 = arith.constant 0 : index
    %c0_179 = arith.constant 0 : index
    %328 = vector.load %arg5[%c4_177, %c0_178, %c0_179] : memref<16x8x1xf32, #tpu.memory_space<vmem>>, vector<1x8x1xf32>
    %329 = vector.shape_cast %328 : vector<1x8x1xf32> to vector<8x1xf32>
    %330 = vector.shape_cast %329 : vector<8x1xf32> to vector<1x8x1xf32>
    %331 = vector.broadcast %327 : vector<2x1x320xf32> to vector<2x8x320xf32>
    %332 = vector.broadcast %330 : vector<1x8x1xf32> to vector<2x8x320xf32>
    %333 = arith.mulf %331, %332 : vector<2x8x320xf32>
    %334 = arith.addf %326, %333 : vector<2x8x320xf32>
    %335 = vector.extract_strided_slice %295 {offsets = [0, 5, 0], sizes = [2, 1, 320], strides = [1, 1, 1]} : vector<2x8x320xf32> to vector<2x1x320xf32>
    %c5_180 = arith.constant 5 : index
    %c0_181 = arith.constant 0 : index
    %c0_182 = arith.constant 0 : index
    %336 = vector.load %arg5[%c5_180, %c0_181, %c0_182] : memref<16x8x1xf32, #tpu.memory_space<vmem>>, vector<1x8x1xf32>
    %337 = vector.shape_cast %336 : vector<1x8x1xf32> to vector<8x1xf32>
    %338 = vector.shape_cast %337 : vector<8x1xf32> to vector<1x8x1xf32>
    %339 = vector.broadcast %335 : vector<2x1x320xf32> to vector<2x8x320xf32>
    %340 = vector.broadcast %338 : vector<1x8x1xf32> to vector<2x8x320xf32>
    %341 = arith.mulf %339, %340 : vector<2x8x320xf32>
    %342 = arith.addf %334, %341 : vector<2x8x320xf32>
    %343 = vector.extract_strided_slice %295 {offsets = [0, 6, 0], sizes = [2, 1, 320], strides = [1, 1, 1]} : vector<2x8x320xf32> to vector<2x1x320xf32>
    %c6_183 = arith.constant 6 : index
    %c0_184 = arith.constant 0 : index
    %c0_185 = arith.constant 0 : index
    %344 = vector.load %arg5[%c6_183, %c0_184, %c0_185] : memref<16x8x1xf32, #tpu.memory_space<vmem>>, vector<1x8x1xf32>
    %345 = vector.shape_cast %344 : vector<1x8x1xf32> to vector<8x1xf32>
    %346 = vector.shape_cast %345 : vector<8x1xf32> to vector<1x8x1xf32>
    %347 = vector.broadcast %343 : vector<2x1x320xf32> to vector<2x8x320xf32>
    %348 = vector.broadcast %346 : vector<1x8x1xf32> to vector<2x8x320xf32>
    %349 = arith.mulf %347, %348 : vector<2x8x320xf32>
    %350 = arith.addf %342, %349 : vector<2x8x320xf32>
    %351 = vector.extract_strided_slice %295 {offsets = [0, 7, 0], sizes = [2, 1, 320], strides = [1, 1, 1]} : vector<2x8x320xf32> to vector<2x1x320xf32>
    %c7_186 = arith.constant 7 : index
    %c0_187 = arith.constant 0 : index
    %c0_188 = arith.constant 0 : index
    %352 = vector.load %arg5[%c7_186, %c0_187, %c0_188] : memref<16x8x1xf32, #tpu.memory_space<vmem>>, vector<1x8x1xf32>
    %353 = vector.shape_cast %352 : vector<1x8x1xf32> to vector<8x1xf32>
    %354 = vector.shape_cast %353 : vector<8x1xf32> to vector<1x8x1xf32>
    %355 = vector.broadcast %351 : vector<2x1x320xf32> to vector<2x8x320xf32>
    %356 = vector.broadcast %354 : vector<1x8x1xf32> to vector<2x8x320xf32>
    %357 = arith.mulf %355, %356 : vector<2x8x320xf32>
    %358 = arith.addf %350, %357 : vector<2x8x320xf32>
    %c2_189 = arith.constant 2 : index
    %c0_190 = arith.constant 0 : index
    %c0_191 = arith.constant 0 : index
    %359 = vector.load %arg6[%c2_189, %c0_190, %c0_191] : memref<5x8x1xf32, #tpu.memory_space<vmem>>, vector<1x8x1xf32>
    %360 = vector.shape_cast %359 : vector<1x8x1xf32> to vector<8x1xf32>
    %c3_192 = arith.constant 3 : index
    %c0_193 = arith.constant 0 : index
    %c0_194 = arith.constant 0 : index
    %361 = vector.load %arg6[%c3_192, %c0_193, %c0_194] : memref<5x8x1xf32, #tpu.memory_space<vmem>>, vector<1x8x1xf32>
    %362 = vector.shape_cast %361 : vector<1x8x1xf32> to vector<8x1xf32>
    %363 = vector.extract_strided_slice %231 {offsets = [0, 0, 0], sizes = [2, 1, 320], strides = [1, 1, 1]} : vector<2x4x320xf32> to vector<2x1x320xf32>
    %c0_195 = arith.constant 0 : index
    %c0_196 = arith.constant 0 : index
    %c0_197 = arith.constant 0 : index
    %364 = vector.load %arg4[%c0_195, %c0_196, %c0_197] : memref<4x8x1xf32, #tpu.memory_space<vmem>>, vector<1x8x1xf32>
    %365 = vector.shape_cast %364 : vector<1x8x1xf32> to vector<8x1xf32>
    %366 = vector.shape_cast %365 : vector<8x1xf32> to vector<1x8x1xf32>
    %367 = vector.broadcast %363 : vector<2x1x320xf32> to vector<2x8x320xf32>
    %368 = vector.broadcast %366 : vector<1x8x1xf32> to vector<2x8x320xf32>
    %369 = arith.mulf %367, %368 : vector<2x8x320xf32>
    %370 = vector.extract_strided_slice %231 {offsets = [0, 1, 0], sizes = [2, 1, 320], strides = [1, 1, 1]} : vector<2x4x320xf32> to vector<2x1x320xf32>
    %c1_198 = arith.constant 1 : index
    %c0_199 = arith.constant 0 : index
    %c0_200 = arith.constant 0 : index
    %371 = vector.load %arg4[%c1_198, %c0_199, %c0_200] : memref<4x8x1xf32, #tpu.memory_space<vmem>>, vector<1x8x1xf32>
    %372 = vector.shape_cast %371 : vector<1x8x1xf32> to vector<8x1xf32>
    %373 = vector.shape_cast %372 : vector<8x1xf32> to vector<1x8x1xf32>
    %374 = vector.broadcast %370 : vector<2x1x320xf32> to vector<2x8x320xf32>
    %375 = vector.broadcast %373 : vector<1x8x1xf32> to vector<2x8x320xf32>
    %376 = arith.mulf %374, %375 : vector<2x8x320xf32>
    %377 = arith.addf %369, %376 : vector<2x8x320xf32>
    %378 = vector.extract_strided_slice %231 {offsets = [0, 2, 0], sizes = [2, 1, 320], strides = [1, 1, 1]} : vector<2x4x320xf32> to vector<2x1x320xf32>
    %c2_201 = arith.constant 2 : index
    %c0_202 = arith.constant 0 : index
    %c0_203 = arith.constant 0 : index
    %379 = vector.load %arg4[%c2_201, %c0_202, %c0_203] : memref<4x8x1xf32, #tpu.memory_space<vmem>>, vector<1x8x1xf32>
    %380 = vector.shape_cast %379 : vector<1x8x1xf32> to vector<8x1xf32>
    %381 = vector.shape_cast %380 : vector<8x1xf32> to vector<1x8x1xf32>
    %382 = vector.broadcast %378 : vector<2x1x320xf32> to vector<2x8x320xf32>
    %383 = vector.broadcast %381 : vector<1x8x1xf32> to vector<2x8x320xf32>
    %384 = arith.mulf %382, %383 : vector<2x8x320xf32>
    %385 = arith.addf %377, %384 : vector<2x8x320xf32>
    %386 = vector.extract_strided_slice %231 {offsets = [0, 3, 0], sizes = [2, 1, 320], strides = [1, 1, 1]} : vector<2x4x320xf32> to vector<2x1x320xf32>
    %c3_204 = arith.constant 3 : index
    %c0_205 = arith.constant 0 : index
    %c0_206 = arith.constant 0 : index
    %387 = vector.load %arg4[%c3_204, %c0_205, %c0_206] : memref<4x8x1xf32, #tpu.memory_space<vmem>>, vector<1x8x1xf32>
    %388 = vector.shape_cast %387 : vector<1x8x1xf32> to vector<8x1xf32>
    %389 = vector.shape_cast %388 : vector<8x1xf32> to vector<1x8x1xf32>
    %390 = vector.broadcast %386 : vector<2x1x320xf32> to vector<2x8x320xf32>
    %391 = vector.broadcast %389 : vector<1x8x1xf32> to vector<2x8x320xf32>
    %392 = arith.mulf %390, %391 : vector<2x8x320xf32>
    %393 = arith.addf %385, %392 : vector<2x8x320xf32>
    %cst_207 = arith.constant dense<0.000000e+00> : vector<2x8xf32>
    %394 = vector.multi_reduction <add>, %393, %cst_207 [2] : vector<2x8x320xf32> to vector<2x8xf32>
    %395 = vector.shape_cast %394 : vector<2x8xf32> to vector<2x8x1xf32>
    %cst_208 = arith.constant dense<0.000000e+00> : vector<8x1xf32>
    %396 = vector.multi_reduction <add>, %395, %cst_208 [0] : vector<2x8x1xf32> to vector<8x1xf32>
    %397 = vector.shape_cast %396 : vector<8x1xf32> to vector<1x8x1xf32>
    %398 = arith.mulf %393, %393 : vector<2x8x320xf32>
    %cst_209 = arith.constant dense<0.000000e+00> : vector<2x8xf32>
    %399 = vector.multi_reduction <add>, %398, %cst_209 [2] : vector<2x8x320xf32> to vector<2x8xf32>
    %400 = vector.shape_cast %399 : vector<2x8xf32> to vector<2x8x1xf32>
    %cst_210 = arith.constant dense<0.000000e+00> : vector<8x1xf32>
    %401 = vector.multi_reduction <add>, %400, %cst_210 [0] : vector<2x8x1xf32> to vector<8x1xf32>
    %402 = vector.shape_cast %401 : vector<8x1xf32> to vector<1x8x1xf32>
    %cst_211 = arith.constant 0.001953125 : f32
    %403 = vector.broadcast %cst_211 : f32 to vector<1x8x1xf32>
    %404 = arith.mulf %397, %403 : vector<1x8x1xf32>
    %cst_212 = arith.constant 0.001953125 : f32
    %405 = vector.broadcast %cst_212 : f32 to vector<1x8x1xf32>
    %406 = arith.mulf %402, %405 : vector<1x8x1xf32>
    %407 = arith.mulf %404, %404 : vector<1x8x1xf32>
    %408 = arith.subf %406, %407 : vector<1x8x1xf32>
    %cst_213 = arith.constant 9.99999974E-6 : f32
    %409 = vector.broadcast %cst_213 : f32 to vector<1x8x1xf32>
    %410 = arith.addf %408, %409 : vector<1x8x1xf32>
    %411 = math.rsqrt %410 : vector<1x8x1xf32>
    %412 = vector.shape_cast %360 : vector<8x1xf32> to vector<1x8x1xf32>
    %413 = arith.mulf %412, %411 : vector<1x8x1xf32>
    %414 = arith.mulf %404, %413 : vector<1x8x1xf32>
    %415 = vector.shape_cast %362 : vector<8x1xf32> to vector<1x8x1xf32>
    %416 = arith.subf %415, %414 : vector<1x8x1xf32>
    %417 = vector.broadcast %413 : vector<1x8x1xf32> to vector<2x8x320xf32>
    %418 = arith.mulf %393, %417 : vector<2x8x320xf32>
    %419 = vector.broadcast %416 : vector<1x8x1xf32> to vector<2x8x320xf32>
    %420 = arith.addf %418, %419 : vector<2x8x320xf32>
    %cst_214 = arith.constant 0.000000e+00 : f32
    %421 = vector.broadcast %cst_214 : f32 to vector<2x8x320xf32>
    %422 = arith.maximumf %420, %421 : vector<2x8x320xf32>
    %423 = vector.extract_strided_slice %422 {offsets = [0, 0, 0], sizes = [2, 1, 320], strides = [1, 1, 1]} : vector<2x8x320xf32> to vector<2x1x320xf32>
    %c8_215 = arith.constant 8 : index
    %c0_216 = arith.constant 0 : index
    %c0_217 = arith.constant 0 : index
    %424 = vector.load %arg5[%c8_215, %c0_216, %c0_217] : memref<16x8x1xf32, #tpu.memory_space<vmem>>, vector<1x8x1xf32>
    %425 = vector.shape_cast %424 : vector<1x8x1xf32> to vector<8x1xf32>
    %426 = vector.shape_cast %425 : vector<8x1xf32> to vector<1x8x1xf32>
    %427 = vector.broadcast %423 : vector<2x1x320xf32> to vector<2x8x320xf32>
    %428 = vector.broadcast %426 : vector<1x8x1xf32> to vector<2x8x320xf32>
    %429 = arith.mulf %427, %428 : vector<2x8x320xf32>
    %430 = arith.addf %358, %429 : vector<2x8x320xf32>
    %431 = vector.extract_strided_slice %422 {offsets = [0, 1, 0], sizes = [2, 1, 320], strides = [1, 1, 1]} : vector<2x8x320xf32> to vector<2x1x320xf32>
    %c9_218 = arith.constant 9 : index
    %c0_219 = arith.constant 0 : index
    %c0_220 = arith.constant 0 : index
    %432 = vector.load %arg5[%c9_218, %c0_219, %c0_220] : memref<16x8x1xf32, #tpu.memory_space<vmem>>, vector<1x8x1xf32>
    %433 = vector.shape_cast %432 : vector<1x8x1xf32> to vector<8x1xf32>
    %434 = vector.shape_cast %433 : vector<8x1xf32> to vector<1x8x1xf32>
    %435 = vector.broadcast %431 : vector<2x1x320xf32> to vector<2x8x320xf32>
    %436 = vector.broadcast %434 : vector<1x8x1xf32> to vector<2x8x320xf32>
    %437 = arith.mulf %435, %436 : vector<2x8x320xf32>
    %438 = arith.addf %430, %437 : vector<2x8x320xf32>
    %439 = vector.extract_strided_slice %422 {offsets = [0, 2, 0], sizes = [2, 1, 320], strides = [1, 1, 1]} : vector<2x8x320xf32> to vector<2x1x320xf32>
    %c10_221 = arith.constant 10 : index
    %c0_222 = arith.constant 0 : index
    %c0_223 = arith.constant 0 : index
    %440 = vector.load %arg5[%c10_221, %c0_222, %c0_223] : memref<16x8x1xf32, #tpu.memory_space<vmem>>, vector<1x8x1xf32>
    %441 = vector.shape_cast %440 : vector<1x8x1xf32> to vector<8x1xf32>
    %442 = vector.shape_cast %441 : vector<8x1xf32> to vector<1x8x1xf32>
    %443 = vector.broadcast %439 : vector<2x1x320xf32> to vector<2x8x320xf32>
    %444 = vector.broadcast %442 : vector<1x8x1xf32> to vector<2x8x320xf32>
    %445 = arith.mulf %443, %444 : vector<2x8x320xf32>
    %446 = arith.addf %438, %445 : vector<2x8x320xf32>
    %447 = vector.extract_strided_slice %422 {offsets = [0, 3, 0], sizes = [2, 1, 320], strides = [1, 1, 1]} : vector<2x8x320xf32> to vector<2x1x320xf32>
    %c11_224 = arith.constant 11 : index
    %c0_225 = arith.constant 0 : index
    %c0_226 = arith.constant 0 : index
    %448 = vector.load %arg5[%c11_224, %c0_225, %c0_226] : memref<16x8x1xf32, #tpu.memory_space<vmem>>, vector<1x8x1xf32>
    %449 = vector.shape_cast %448 : vector<1x8x1xf32> to vector<8x1xf32>
    %450 = vector.shape_cast %449 : vector<8x1xf32> to vector<1x8x1xf32>
    %451 = vector.broadcast %447 : vector<2x1x320xf32> to vector<2x8x320xf32>
    %452 = vector.broadcast %450 : vector<1x8x1xf32> to vector<2x8x320xf32>
    %453 = arith.mulf %451, %452 : vector<2x8x320xf32>
    %454 = arith.addf %446, %453 : vector<2x8x320xf32>
    %455 = vector.extract_strided_slice %422 {offsets = [0, 4, 0], sizes = [2, 1, 320], strides = [1, 1, 1]} : vector<2x8x320xf32> to vector<2x1x320xf32>
    %c12_227 = arith.constant 12 : index
    %c0_228 = arith.constant 0 : index
    %c0_229 = arith.constant 0 : index
    %456 = vector.load %arg5[%c12_227, %c0_228, %c0_229] : memref<16x8x1xf32, #tpu.memory_space<vmem>>, vector<1x8x1xf32>
    %457 = vector.shape_cast %456 : vector<1x8x1xf32> to vector<8x1xf32>
    %458 = vector.shape_cast %457 : vector<8x1xf32> to vector<1x8x1xf32>
    %459 = vector.broadcast %455 : vector<2x1x320xf32> to vector<2x8x320xf32>
    %460 = vector.broadcast %458 : vector<1x8x1xf32> to vector<2x8x320xf32>
    %461 = arith.mulf %459, %460 : vector<2x8x320xf32>
    %462 = arith.addf %454, %461 : vector<2x8x320xf32>
    %463 = vector.extract_strided_slice %422 {offsets = [0, 5, 0], sizes = [2, 1, 320], strides = [1, 1, 1]} : vector<2x8x320xf32> to vector<2x1x320xf32>
    %c13_230 = arith.constant 13 : index
    %c0_231 = arith.constant 0 : index
    %c0_232 = arith.constant 0 : index
    %464 = vector.load %arg5[%c13_230, %c0_231, %c0_232] : memref<16x8x1xf32, #tpu.memory_space<vmem>>, vector<1x8x1xf32>
    %465 = vector.shape_cast %464 : vector<1x8x1xf32> to vector<8x1xf32>
    %466 = vector.shape_cast %465 : vector<8x1xf32> to vector<1x8x1xf32>
    %467 = vector.broadcast %463 : vector<2x1x320xf32> to vector<2x8x320xf32>
    %468 = vector.broadcast %466 : vector<1x8x1xf32> to vector<2x8x320xf32>
    %469 = arith.mulf %467, %468 : vector<2x8x320xf32>
    %470 = arith.addf %462, %469 : vector<2x8x320xf32>
    %471 = vector.extract_strided_slice %422 {offsets = [0, 6, 0], sizes = [2, 1, 320], strides = [1, 1, 1]} : vector<2x8x320xf32> to vector<2x1x320xf32>
    %c14_233 = arith.constant 14 : index
    %c0_234 = arith.constant 0 : index
    %c0_235 = arith.constant 0 : index
    %472 = vector.load %arg5[%c14_233, %c0_234, %c0_235] : memref<16x8x1xf32, #tpu.memory_space<vmem>>, vector<1x8x1xf32>
    %473 = vector.shape_cast %472 : vector<1x8x1xf32> to vector<8x1xf32>
    %474 = vector.shape_cast %473 : vector<8x1xf32> to vector<1x8x1xf32>
    %475 = vector.broadcast %471 : vector<2x1x320xf32> to vector<2x8x320xf32>
    %476 = vector.broadcast %474 : vector<1x8x1xf32> to vector<2x8x320xf32>
    %477 = arith.mulf %475, %476 : vector<2x8x320xf32>
    %478 = arith.addf %470, %477 : vector<2x8x320xf32>
    %479 = vector.extract_strided_slice %422 {offsets = [0, 7, 0], sizes = [2, 1, 320], strides = [1, 1, 1]} : vector<2x8x320xf32> to vector<2x1x320xf32>
    %c15_236 = arith.constant 15 : index
    %c0_237 = arith.constant 0 : index
    %c0_238 = arith.constant 0 : index
    %480 = vector.load %arg5[%c15_236, %c0_237, %c0_238] : memref<16x8x1xf32, #tpu.memory_space<vmem>>, vector<1x8x1xf32>
    %481 = vector.shape_cast %480 : vector<1x8x1xf32> to vector<8x1xf32>
    %482 = vector.shape_cast %481 : vector<8x1xf32> to vector<1x8x1xf32>
    %483 = vector.broadcast %479 : vector<2x1x320xf32> to vector<2x8x320xf32>
    %484 = vector.broadcast %482 : vector<1x8x1xf32> to vector<2x8x320xf32>
    %485 = arith.mulf %483, %484 : vector<2x8x320xf32>
    %486 = arith.addf %478, %485 : vector<2x8x320xf32>
    %c4_239 = arith.constant 4 : index
    %c0_240 = arith.constant 0 : index
    %c0_241 = arith.constant 0 : index
    %487 = vector.load %arg6[%c4_239, %c0_240, %c0_241] : memref<5x8x1xf32, #tpu.memory_space<vmem>>, vector<1x8x1xf32>
    %488 = vector.shape_cast %487 : vector<1x8x1xf32> to vector<8x1xf32>
    %489 = vector.shape_cast %488 : vector<8x1xf32> to vector<1x8x1xf32>
    %490 = vector.broadcast %489 : vector<1x8x1xf32> to vector<2x8x320xf32>
    %491 = arith.addf %486, %490 : vector<2x8x320xf32>
    %c0_242 = arith.constant 0 : index
    %c0_243 = arith.constant 0 : index
    %c0_244 = arith.constant 0 : index
    %492 = vector.load %arg8[%c0_242, %c0_243, %c0_244] : memref<2x8x320xf32, #tpu.memory_space<vmem>>, vector<2x8x320xf32>
    tpu.vector_store %arg8[%c0_242, %c0_243, %c0_244], %491 {strides = array<i32>} : memref<2x8x320xf32, #tpu.memory_space<vmem>>, vector<2x8x320xf32>,
    return
  }
}

</mosaic_0001>

<bundles_post_ra>
// kernel: tpu_custom_call.1
= control target key start
LH: loop header
LB: loop body
LE: loop exit
PB: predicated region body
PF: predicated region fallthrough
CT: control target
= control target key end

     0   :  { %v3470_v2 = vmov 0   ;;  %s5503_s0 = inlined_call_operand.vmem [shape: f32[2,4,420], index: 0, kind: input, shape index: {}]   ;;  %s5504_s1 = inlined_call_operand.vmem [shape: f32[9,4,1], index: 1, kind: input, shape index: {}]   ;;  %s5505_s2 = inlined_call_operand.vmem [shape: f32[25,4,1], index: 2, kind: input, shape index: {}]   ;;  %s5506_s3 = inlined_call_operand.vmem [shape: f32[4,8,1], index: 3, kind: input, shape index: {}]   ;;  %s5507_s4 = inlined_call_operand.vmem [shape: f32[4,8,1], index: 4, kind: input, shape index: {}]   ;;  %s5508_s5 = inlined_call_operand.vmem [shape: f32[16,8,1], index: 5, kind: input, shape index: {}]   ;;  %s5509_s6 = inlined_call_operand.vmem [shape: f32[5,8,1], index: 6, kind: input, shape index: {}]   ;;  %s5510_s7 = inlined_call_operand.vmem [shape: f32[1,1,320], index: 7, kind: input, shape index: {}]   ;;  %s5511_s8 = inlined_call_operand.hbm [shape: f32[2,8,320], index: 8, kind: output, shape index: {}]  }
   0x1   :  { %v3355_v0 = vld [vmem:[%s5505_s2 + $0xc] sm:$0xf]  ;;  %v34_v1 = vld [vmem:[%s5505_s2] sm:$0xf]  ;;  %3441 = vset.pattern.permute.xlu1 %v3470_v2  ;;  %3440 = vset.pattern.permute.xlu0 %v3470_v2  ;;  %v3357_v3 = vld [vmem:[%s5505_s2 + $0x14] sm:$0xf] }
   0x2   :  { %150 = vperm.xlu1 %3441, %v3355_v0   ;;  %37 = vperm.xlu0 %3440, %v34_v1   ;;  %v3353_v4 = vld [vmem:[%s5505_s2 + $0x4] sm:$0xf]  ;;  %v334_v5 = vld [vmem:[%s5504_s1] sm:$0xf]  ;;  %v3354_v6 = vld [vmem:[%s5505_s2 + $0x8] sm:$0xf] }
   0x6   :  { %244 = vperm.xlu1 %3441, %v3357_v3   ;;  %55 = vperm.xlu0 %3440, %v3353_v4  }
   0x7   :  { %13 = vsyncpa [#allocation3], 0  ;;  %v3360_v7 = vld [vmem:[%s5504_s1 + $0x4] sm:$0xf]  ;;  %v3356_v8 = vld [vmem:[%s5505_s2 + $0x10] sm:$0xf]  ;;  %v42_v19 = vlaneseq }
   0x8   :  { %v3362_v9 = vld [vmem:[%s5504_s1 + $0x8] sm:$0xf]  ;;  %v3358_v10 = vld [vmem:[%s5505_s2 + $0x18] sm:$0xf]  ;;  %v3359_v12 = vld [vmem:[%s5505_s2 + $0x1c] sm:$0xf] }
   0x9   :  { %v3364_v11 = vld [vmem:[%s5505_s2 + $0x28] sm:$0xf]  ;;  %v3366_v13 = vld [vmem:[%s5504_s1 + $0xc] sm:$0xf]  ;;  %v3361_v14 = vld [vmem:[%s5505_s2 + $0x20] sm:$0xf] }
   0xa   :  { %337 = vperm.xlu1 %3441, %v334_v5   ;;  %103 = vperm.xlu0 %3440, %v3354_v6   ;;  %v3363_v15 = vld [vmem:[%s5505_s2 + $0x24] sm:$0xf]  ;;  %v3365_v16 = vld [vmem:[%s5505_s2 + $0x2c] sm:$0xf]  ;;  %v3471_v17 = vmov 839922192  }
   0xb   :  { %v40_v18 = vunpack.c.l.s4 %v3471_v17  ;;  %v3593_v21 = vshrl.u32 %v42_v19, 7  ;;  %v3604_v26 = vld [vmem:[%s5503_s0] sm:$0xff]  ;;  %v3609_v27 = vld [vmem:[%s5503_s0 + $0x10] sm:$0xff]  ;;  %s3472_s19 = smov 127   ;;  %v3619_v32 = vld [vmem:[%s5503_s0 + $0x8] sm:$0xf] }
   0xc   :  { %s3473_s22 = smov 126   ;;  %v3629_v37 = vld [vmem:[%s5503_s0 + $0x18] sm:$0xf]  ;;  %s3474_s25 = smov 125   ;;  %vm85_vm0 = vcmask 1043456   ;;  %vm87_vm1 = vcmask 1039360  }
   0xd   :  { %v41_v20 = vunpack.c.0.s8 %v40_v18  ;;  %5573 = vst [vmem:[#allocation5_spill] sm:$0xff] %v3593_v21  ;;  %s3475_s26 = smov 124   ;;  %s3476_s27 = smov 108   ;;  %vm134_vm2 = vcmask 1031168   ;;  %vm181_vm3 = vcmask 1022976   ;;  %vm228_vm4 = vcmask 1014784  }
   0xe   :  { %402 = vperm.xlu1 %3441, %v3360_v7   ;;  %197 = vperm.xlu0 %3440, %v3356_v8   ;;  %s3477_s28 = smov 107   ;;  %s3478_s29 = smov 106   ;;  %vm275_vm5 = vcmask 883712   ;;  %vm322_vm6 = vcmask 875520   ;;  %vm386_vm7 = vcmask 867328   ;;  %vm479_vm8 = vcmask 859136  }
   0xf   :  { %v3598_v23 = vsub.s32 %v41_v20, %v3593_v21  ;;  %s3479_s30 = smov 105   ;;  %s3480_s9 = smov 104   ;;  %vm572_vm9 = vcmask 850944   ;;  %vm619_vm10 = vcmask 719872   ;;  %vm666_vm11 = vcmask 711680  }
  0x10   :  { %s3481_s10 = smov 88   ;;  %s3482_s11 = smov 87   ;;  %vm759_vm12 = vcmask 703488   ;;  %vm852_vm13 = vcmask 695296   ;;  %vm945_vm14 = vcmask 687104   ;;  %vm992_vm15 = vcmask 556032  }
  0x11   :  { %s3483_s14 = smov 86   ;;  %s3485_s24 = smov 84  }
  0x12   :  { %495 = vperm.xlu1 %3441, %v3362_v9   ;;  %291 = vperm.xlu0 %3440, %v3358_v10   ;;  %s3489_s15 = smov 65   ;;  %s3491_s17 = smov 64  }
  0x13   :  { %s3494_s13 = smov 46  }
  0x16   :  { %588 = vperm.xlu1 %3441, %v3364_v11   ;;  %355 = vperm.xlu0 %3440, %v3359_v12  }
  0x1a   :  { %682 = vperm.xlu1 %3441, %v3366_v13   ;;  %448 = vperm.xlu0 %3440, %v3361_v14  }
  0x1e   :  { %541 = vperm.xlu0 %3440, %v3363_v15  }
  0x22   :  { %635 = vperm.xlu0 %3440, %v3365_v16  }
  0x81   :  { %v3595_v22 = vpop.permute.xlu0 %37  ;;  %v151_v35 = vpop.permute.xlu1 %150 }
  0x82   :  { %v158_v36 = vrot.slane %v151_v35, %v3598_v23 }
  0x84   :  { %v160_v40 = vmul.f32 %v158_v36, %v3604_v26  ;;  %v162_v44 = vmul.f32 %v158_v36, %v3609_v27  ;;  %v161_v47 = vmul.f32 %v158_v36, %v3619_v32  ;;  %v163_v51 = vmul.f32 %v158_v36, %v3629_v37 }
  0x85   :  { %v56_v24 = vpop.permute.xlu0 %55  ;;  %v245_v48 = vpop.permute.xlu1 %244 }
  0x86   :  { %v63_v25 = vrot.slane %v56_v24, %v3598_v23  ;;  %v252_v49 = vrot.slane %v245_v48, %v3598_v23 }
  0x88   :  { %v67_v28 = vmul.f32 %v63_v25, %v3609_v27  ;;  %v65_v29 = vmul.f32 %v63_v25, %v3604_v26  ;;  %v66_v34 = vmul.f32 %v63_v25, %v3619_v32  ;;  %v68_v39 = vmul.f32 %v63_v25, %v3629_v37 }
  0x89   :  { %v104_v30 = vpop.permute.xlu0 %103  ;;  %v254_v52 = vmul.f32 %v252_v49, %v3604_v26  ;;  %v256_v56 = vmul.f32 %v252_v49, %v3609_v27  ;;  %v255_v59 = vmul.f32 %v252_v49, %v3619_v32  ;;  %v257_v63 = vmul.f32 %v252_v49, %v3629_v37  ;;  %v3661_v0 = vpop.permute.xlu1 %337 }
  0x8a   :  { %v111_v31 = vrot.slane %v104_v30, %v3598_v23  ;;  %77 = vrot.lane.b32.xlu0 %v67_v28, %s3472_s19  ;;  %73 = vrot.lane.b32.xlu1 %v65_v29, %s3472_s19 }
  0x8c   :  { %v114_v33 = vmul.f32 %v111_v31, %v3619_v32  ;;  %v116_v38 = vmul.f32 %v111_v31, %v3629_v37  ;;  %v113_v41 = vmul.f32 %v111_v31, %v3604_v26  ;;  %v115_v45 = vmul.f32 %v111_v31, %v3609_v27 }
  0x8d   :  { %v198_v42 = vpop.permute.xlu0 %197  ;;  %v403_v3 = vpop.permute.xlu1 %402 }
  0x8e   :  { %123 = vrot.lane.b32.xlu0 %v114_v33, %s3473_s22  ;;  %75 = vrot.lane.b32.xlu1 %v66_v34, %s3472_s19  ;;  %v205_v43 = vrot.slane %v198_v42, %v3598_v23  ;;  %v410_v4 = vrot.slane %v403_v3, %v3598_v23 }
  0x90   :  { %v208_v46 = vmul.f32 %v205_v43, %v3619_v32  ;;  %v210_v50 = vmul.f32 %v205_v43, %v3629_v37  ;;  %v207_v53 = vmul.f32 %v205_v43, %v3604_v26  ;;  %v209_v57 = vmul.f32 %v205_v43, %v3609_v27 }
  0x91   :  { %v292_v54 = vpop.permute.xlu0 %291  ;;  %v412_v7 = vmul.f32 %v410_v4, %v3604_v26  ;;  %v414_v11 = vmul.f32 %v410_v4, %v3609_v27  ;;  %v413_v14 = vmul.f32 %v410_v4, %v3619_v32  ;;  %v496_v15 = vpop.permute.xlu1 %495  ;;  %v415_v18 = vmul.f32 %v410_v4, %v3629_v37 }
  0x92   :  { %127 = vrot.lane.b32.xlu0 %v116_v38, %s3473_s22  ;;  %79 = vrot.lane.b32.xlu1 %v68_v39, %s3472_s19  ;;  %v299_v55 = vrot.slane %v292_v54, %v3598_v23  ;;  %v503_v16 = vrot.slane %v496_v15, %v3598_v23  ;;  %v3367_v54 = vld [vmem:[%s5505_s2 + $0x30] sm:$0xf] }
  0x94   :  { %v302_v58 = vmul.f32 %v299_v55, %v3619_v32  ;;  %v304_v62 = vmul.f32 %v299_v55, %v3629_v37  ;;  %v301_v2 = vmul.f32 %v299_v55, %v3604_v26  ;;  %v303_v6 = vmul.f32 %v299_v55, %v3609_v27 }
  0x95   :  { %v356_v60 = vpop.permute.xlu0 %355  ;;  %v505_v19 = vmul.f32 %v503_v16, %v3604_v26  ;;  %v507_v28 = vmul.f32 %v503_v16, %v3609_v27  ;;  %v506_v31 = vmul.f32 %v503_v16, %v3619_v32  ;;  %v589_v33 = vpop.permute.xlu1 %588  ;;  %v508_v36 = vmul.f32 %v503_v16, %v3629_v37 }
  0x96   :  { %168 = vrot.lane.b32.xlu0 %v160_v40, %s3474_s25  ;;  %121 = vrot.lane.b32.xlu1 %v113_v41, %s3473_s22  ;;  %v363_v61 = vrot.slane %v356_v60, %v3598_v23  ;;  %v596_v34 = vrot.slane %v589_v33, %v3598_v23 }
  0x98   :  { %v366_v1 = vmul.f32 %v363_v61, %v3619_v32  ;;  %v368_v5 = vmul.f32 %v363_v61, %v3629_v37  ;;  %v365_v8 = vmul.f32 %v363_v61, %v3604_v26  ;;  %v367_v12 = vmul.f32 %v363_v61, %v3609_v27 }
  0x99   :  { %v449_v9 = vpop.permute.xlu0 %448  ;;  %v598_v38 = vmul.f32 %v596_v34, %v3604_v26  ;;  %v600_v42 = vmul.f32 %v596_v34, %v3609_v27  ;;  %v601_v49 = vmul.f32 %v596_v34, %v3629_v37 }
  0x9a   :  { %172 = vrot.lane.b32.xlu0 %v162_v44, %s3474_s25  ;;  %125 = vrot.lane.b32.xlu1 %v115_v45, %s3473_s22  ;;  %v456_v10 = vrot.slane %v449_v9, %v3598_v23  ;;  %v599_v45 = vmul.f32 %v596_v34, %v3619_v32 }
  0x9c   :  { %v459_v13 = vmul.f32 %v456_v10, %v3619_v32  ;;  %v461_v17 = vmul.f32 %v456_v10, %v3629_v37  ;;  %v458_v20 = vmul.f32 %v456_v10, %v3604_v26  ;;  %v460_v29 = vmul.f32 %v456_v10, %v3609_v27 }
  0x9d   :  { %v542_v24 = vpop.permute.xlu0 %541 }
  0x9e   :  { %217 = vrot.lane.b32.xlu0 %v208_v46, %s3475_s26  ;;  %170 = vrot.lane.b32.xlu1 %v161_v47, %s3474_s25  ;;  %v549_v25 = vrot.slane %v542_v24, %v3598_v23  ;;  %v683_v46 = vpop.permute.xlu1 %682 }
  0x9f   :  { %v690_v47 = vrot.slane %v683_v46, %v3598_v23 }
  0xa0   :  { %v552_v30 = vmul.f32 %v549_v25, %v3619_v32  ;;  %v554_v35 = vmul.f32 %v549_v25, %v3629_v37  ;;  %v551_v39 = vmul.f32 %v549_v25, %v3604_v26  ;;  %v553_v43 = vmul.f32 %v549_v25, %v3609_v27 }
  0xa1   :  { %v636_v40 = vpop.permute.xlu0 %635  ;;  %v693_v55 = vmul.f32 %v690_v47, %v3619_v32 }
  0xa2   :  { %221 = vrot.lane.b32.xlu0 %v210_v50, %s3475_s26  ;;  %174 = vrot.lane.b32.xlu1 %v163_v51, %s3474_s25  ;;  %v643_v41 = vrot.slane %v636_v40, %v3598_v23  ;;  %v692_v50 = vmul.f32 %v690_v47, %v3604_v26 }
  0xa4   :  { %v646_v44 = vmul.f32 %v643_v41, %v3619_v32  ;;  %v648_v48 = vmul.f32 %v643_v41, %v3629_v37  ;;  %v645_v51 = vmul.f32 %v643_v41, %v3604_v26 }
  0xa6   :  { %262 = vrot.lane.b32.xlu0 %v254_v52, %s3476_s27  ;;  %215 = vrot.lane.b32.xlu1 %v207_v53, %s3475_s26  ;;  %v694_v52 = vmul.f32 %v690_v47, %v3609_v27  ;;  %v647_v53 = vmul.f32 %v643_v41, %v3609_v27 }
  0xaa   :  { %266 = vrot.lane.b32.xlu0 %v256_v56, %s3476_s27  ;;  %219 = vrot.lane.b32.xlu1 %v209_v57, %s3475_s26  ;;  %v695_v56 = vmul.f32 %v690_v47, %v3629_v37 }
  0xae   :  { %311 = vrot.lane.b32.xlu0 %v302_v58, %s3477_s28  ;;  %264 = vrot.lane.b32.xlu1 %v255_v59, %s3476_s27 }
  0xb2   :  { %315 = vrot.lane.b32.xlu0 %v304_v62, %s3477_s28  ;;  %268 = vrot.lane.b32.xlu1 %v257_v63, %s3476_s27 }
  0xb6   :  { %375 = vrot.lane.b32.xlu0 %v366_v1, %s3478_s29  ;;  %309 = vrot.lane.b32.xlu1 %v301_v2, %s3477_s28 }
  0xba   :  { %379 = vrot.lane.b32.xlu0 %v368_v5, %s3478_s29  ;;  %313 = vrot.lane.b32.xlu1 %v303_v6, %s3477_s28 }
  0xbe   :  { %420 = vrot.lane.b32.xlu0 %v412_v7, %s3472_s19  ;;  %373 = vrot.lane.b32.xlu1 %v365_v8, %s3478_s29 }
  0xc2   :  { %424 = vrot.lane.b32.xlu0 %v414_v11, %s3472_s19  ;;  %377 = vrot.lane.b32.xlu1 %v367_v12, %s3478_s29 }
  0xc6   :  { %468 = vrot.lane.b32.xlu0 %v459_v13, %s3479_s30  ;;  %422 = vrot.lane.b32.xlu1 %v413_v14, %s3472_s19 }
  0xca   :  { %472 = vrot.lane.b32.xlu0 %v461_v17, %s3479_s30  ;;  %426 = vrot.lane.b32.xlu1 %v415_v18, %s3472_s19  ;;  %s3484_s19 = smov 85  }
  0xce   :  { %513 = vrot.lane.b32.xlu0 %v505_v19, %s3473_s22  ;;  %466 = vrot.lane.b32.xlu1 %v458_v20, %s3479_s30 }
  0xd2   :  { %517 = vrot.lane.b32.xlu0 %v507_v28, %s3473_s22  ;;  %470 = vrot.lane.b32.xlu1 %v460_v29, %s3479_s30 }
  0xd6   :  { %561 = vrot.lane.b32.xlu0 %v552_v30, %s3480_s9  ;;  %515 = vrot.lane.b32.xlu1 %v506_v31, %s3473_s22 }
  0xda   :  { %565 = vrot.lane.b32.xlu0 %v554_v35, %s3480_s9  ;;  %519 = vrot.lane.b32.xlu1 %v508_v36, %s3473_s22 }
  0xde   :  { %606 = vrot.lane.b32.xlu0 %v598_v38, %s3481_s10  ;;  %559 = vrot.lane.b32.xlu1 %v551_v39, %s3480_s9 }
  0xe2   :  { %610 = vrot.lane.b32.xlu0 %v600_v42, %s3481_s10  ;;  %563 = vrot.lane.b32.xlu1 %v553_v43, %s3480_s9  ;;  %v3368_v43 = vld [vmem:[%s5504_s1 + $0x10] sm:$0xf]  ;;  %s3487_s9 = smov 67  }
  0xe6   :  { %655 = vrot.lane.b32.xlu0 %v646_v44, %s3482_s11  ;;  %608 = vrot.lane.b32.xlu1 %v599_v45, %s3481_s10 }
  0xea   :  { %659 = vrot.lane.b32.xlu0 %v648_v48, %s3482_s11  ;;  %612 = vrot.lane.b32.xlu1 %v601_v49, %s3481_s10 }
  0xee   :  { %700 = vrot.lane.b32.xlu0 %v692_v50, %s3476_s27  ;;  %653 = vrot.lane.b32.xlu1 %v645_v51, %s3482_s11 }
  0xf2   :  { %704 = vrot.lane.b32.xlu0 %v694_v52, %s3476_s27  ;;  %657 = vrot.lane.b32.xlu1 %v647_v53, %s3482_s11 }
  0xf6   :  { %728 = vperm.xlu0 %3440, %v3367_v54   ;;  %702 = vrot.lane.b32.xlu1 %v693_v55, %s3476_s27 }
  0xfa   :  { %706 = vrot.lane.b32.xlu1 %v695_v56, %s3476_s27  ;;  %s3486_s27 = smov 68  }
  0xfc   :  { %v3735_v57 = vpop.permute.xlu0 %77  ;;  %v3775_v14 = vpop.permute.xlu1 %73 }
 0x100   :  { %v3737_v58 = vpop.permute.xlu0 %123  ;;  %v3779_v16 = vpop.permute.xlu1 %75 }
 0x104   :  { %v3739_v59 = vpop.permute.xlu0 %127  ;;  %v3783_v18 = vpop.permute.xlu1 %79 }
 0x108   :  { %v3741_v60 = vpop.permute.xlu0 %168  ;;  %v3787_v20 = vpop.permute.xlu1 %121 }
 0x10c   :  { %v3743_v61 = vpop.permute.xlu0 %172  ;;  %v3791_v25 = vpop.permute.xlu1 %125 }
 0x110   :  { %v3745_v62 = vpop.permute.xlu0 %217  ;;  %v3795_v29 = vpop.permute.xlu1 %170 }
 0x114   :  { %v3747_v63 = vpop.permute.xlu0 %221  ;;  %v3799_v31 = vpop.permute.xlu1 %174 }
 0x118   :  { %v3749_v1 = vpop.permute.xlu0 %262  ;;  %v3803_v34 = vpop.permute.xlu1 %215 }
 0x11c   :  { %v3751_v2 = vpop.permute.xlu0 %266  ;;  %v3810_v40 = vpop.permute.xlu1 %219 }
 0x120   :  { %v3753_v3 = vpop.permute.xlu0 %311  ;;  %v3819_v44 = vpop.permute.xlu1 %264 }
 0x124   :  { %v3755_v4 = vpop.permute.xlu0 %315  ;;  %v3821_v45 = vpop.permute.xlu1 %268 }
 0x128   :  { %v3757_v5 = vpop.permute.xlu0 %375  ;;  %v3823_v46 = vpop.permute.xlu1 %309 }
 0x12c   :  { %v3759_v6 = vpop.permute.xlu0 %379  ;;  %v3825_v47 = vpop.permute.xlu1 %313 }
 0x130   :  { %v3761_v7 = vpop.permute.xlu0 %420  ;;  %v3827_v48 = vpop.permute.xlu1 %373 }
 0x134   :  { %v3763_v8 = vpop.permute.xlu0 %424  ;;  %v3829_v49 = vpop.permute.xlu1 %377 }
 0x138   :  { %v3765_v9 = vpop.permute.xlu0 %468  ;;  %v3831_v50 = vpop.permute.xlu1 %422 }
 0x13c   :  { %v3767_v10 = vpop.permute.xlu0 %472  ;;  %v3833_v51 = vpop.permute.xlu1 %426 }
 0x140   :  { %v3769_v11 = vpop.permute.xlu0 %513  ;;  %v3835_v52 = vpop.permute.xlu1 %466 }
 0x141   :  { %5574 = vst [vmem:[#allocation6_spill] sm:$0xff] %v3769_v11 }
 0x144   :  { %v3771_v12 = vpop.permute.xlu0 %517  ;;  %v3837_v53 = vpop.permute.xlu1 %470 }
 0x145   :  { %5575 = vst [vmem:[#allocation7_spill] sm:$0xff] %v3771_v12 }
 0x148   :  { %v3773_v13 = vpop.permute.xlu0 %561  ;;  %v3839_v54 = vpop.permute.xlu1 %515 }
 0x149   :  { %5576 = vst [vmem:[#allocation8_spill] sm:$0xff] %v3773_v13 }
 0x14c   :  { %v3777_v15 = vpop.permute.xlu0 %565  ;;  %v3841_v55 = vpop.permute.xlu1 %519 }
 0x14d   :  { %5577 = vst [vmem:[#allocation9_spill] sm:$0xff] %v3777_v15 }
 0x150   :  { %v3781_v17 = vpop.permute.xlu0 %606  ;;  %v3843_v56 = vpop.permute.xlu1 %559 }
 0x151   :  { %5578 = vst [vmem:[#allocation10_spill] sm:$0xff] %v3781_v17 }
 0x154   :  { %v3785_v19 = vpop.permute.xlu0 %610 }
 0x155   :  { %5579 = vst [vmem:[#allocation11_spill] sm:$0xff] %v3785_v19 }
 0x158   :  { %v3789_v24 = vpop.permute.xlu0 %655 }
 0x159   :  { %5580 = vst [vmem:[#allocation12_spill] sm:$0xff] %v3789_v24 }
 0x15c   :  { %v3793_v28 = vpop.permute.xlu0 %659 }
 0x15d   :  { %5581 = vst [vmem:[#allocation13_spill] sm:$0xff] %v3793_v28 }
 0x160   :  { %v3797_v30 = vpop.permute.xlu0 %700 }
 0x161   :  { %5582 = vst [vmem:[#allocation14_spill] sm:$0xff] %v3797_v30 }
 0x164   :  { %v3801_v33 = vpop.permute.xlu0 %704 }
 0x165   :  { %5583 = vst [vmem:[#allocation15_spill] sm:$0xff] %v3801_v33 }
 0x175   :  { %v729_v35 = vpop.permute.xlu0 %728 }
 0x176   :  { %v736_v36 = vrot.slane %v729_v35, %v3598_v23  ;;  %v3845_v35 = vpop.permute.xlu1 %563 }
 0x177   :  { %5584 = vst [vmem:[#allocation16_spill] sm:$0xff] %v3845_v35 }
 0x178   :  { %v739_v38 = vmul.f32 %v736_v36, %v3619_v32  ;;  %v738_v39 = vmul.f32 %v736_v36, %v3604_v26  ;;  %v741_v41 = vmul.f32 %v736_v36, %v3629_v37  ;;  %v740_v42 = vmul.f32 %v736_v36, %v3609_v27 }
 0x17a   :  { %748 = vrot.lane.b32.xlu0 %v739_v38, %s3483_s14  ;;  %746 = vrot.lane.b32.xlu1 %v738_v39, %s3483_s14  ;;  %v3847_v36 = vpop.permute.xlu1 %608 }
 0x17b   :  { %5585 = vst [vmem:[#allocation17_spill] sm:$0xff] %v3847_v36 }
 0x17e   :  { %752 = vrot.lane.b32.xlu0 %v741_v41, %s3483_s14  ;;  %750 = vrot.lane.b32.xlu1 %v740_v42, %s3483_s14  ;;  %v3849_v38 = vpop.permute.xlu1 %612 }
 0x17f   :  { %5586 = vst [vmem:[#allocation18_spill] sm:$0xff] %v3849_v38 }
 0x182   :  { %775 = vperm.xlu1 %3441, %v3368_v43   ;;  %v3851_v39 = vpop.permute.xlu1 %653 }
 0x183   :  { %5587 = vst [vmem:[#allocation19_spill] sm:$0xff] %v3851_v39 }
 0x186   :  { %v3853_v41 = vpop.permute.xlu1 %657 }
 0x187   :  { %5588 = vst [vmem:[#allocation20_spill] sm:$0xff] %v3853_v41 }
 0x18a   :  { %v3855_v42 = vpop.permute.xlu1 %702 }
 0x18b   :  { %5589 = vst [vmem:[#allocation21_spill] sm:$0xff] %v3855_v42 }
 0x18e   :  { %v3857_v43 = vpop.permute.xlu1 %706 }
 0x18f   :  { %5590 = vst [vmem:[#allocation22_spill] sm:$0xff] %v3857_v43 }
 0x1ec   :  { %v3859_v33 = vpop.permute.xlu1 %746 }
 0x1ed   :  { %5591 = vst [vmem:[#allocation23_spill] sm:$0xff] %v3859_v33 }
 0x1f0   :  { %v3861_v30 = vpop.permute.xlu1 %750 }
 0x1f1   :  { %5592 = vst [vmem:[#allocation24_spill] sm:$0xff] %v3861_v30  ;;  %v3875_v30 = vpop.permute.xlu0 %748 }
 0x1f2   :  { %5593 = vst [vmem:[#allocation25_spill] sm:$0xff] %v3875_v30 }
 0x1f5   :  { %v3877_v33 = vpop.permute.xlu0 %752 }
 0x1f6   :  { %5594 = vst [vmem:[#allocation26_spill] sm:$0xff] %v3877_v33 }
 0x201   :  { %v776_v28 = vpop.permute.xlu1 %775 }
 0x202   :  { %v783_v24 = vrot.slane %v776_v28, %v3598_v23  ;;  %v3369_v28 = vld [vmem:[%s5505_s2 + $0x34] sm:$0xf] }
 0x204   :  { %v786_v19 = vmul.f32 %v783_v24, %v3619_v32  ;;  %v785_v17 = vmul.f32 %v783_v24, %v3604_v26  ;;  %v788_v41 = vmul.f32 %v783_v24, %v3629_v37  ;;  %v787_v42 = vmul.f32 %v783_v24, %v3609_v27 }
 0x206   :  { %795 = vrot.lane.b32.xlu1 %v786_v19, %s3477_s28  ;;  %793 = vrot.lane.b32.xlu0 %v785_v17, %s3477_s28 }
 0x20a   :  { %799 = vrot.lane.b32.xlu1 %v788_v41, %s3477_s28  ;;  %797 = vrot.lane.b32.xlu0 %v787_v42, %s3477_s28 }
 0x20e   :  { %821 = vperm.xlu0 %3440, %v3369_v28  }
 0x278   :  { %v3879_v19 = vpop.permute.xlu0 %793 }
 0x279   :  { %5595 = vst [vmem:[#allocation27_spill] sm:$0xff] %v3879_v19  ;;  %v3891_v19 = vpop.permute.xlu1 %795 }
 0x27a   :  { %5597 = vst [vmem:[#allocation29_spill] sm:$0xff] %v3891_v19 }
 0x27c   :  { %v3881_v17 = vpop.permute.xlu0 %797 }
 0x27d   :  { %5596 = vst [vmem:[#allocation28_spill] sm:$0xff] %v3881_v17  ;;  %v3370_v17 = vld [vmem:[%s5504_s1 + $0x14] sm:$0xf] }
 0x28d   :  { %v822_v43 = vpop.permute.xlu0 %821 }
 0x28e   :  { %v829_v24 = vrot.slane %v822_v43, %v3598_v23  ;;  %v3893_v43 = vpop.permute.xlu1 %799 }
 0x28f   :  { %5598 = vst [vmem:[#allocation30_spill] sm:$0xff] %v3893_v43 }
 0x290   :  { %v832_v41 = vmul.f32 %v829_v24, %v3619_v32  ;;  %v831_v42 = vmul.f32 %v829_v24, %v3604_v26  ;;  %v834_v28 = vmul.f32 %v829_v24, %v3629_v37  ;;  %v833_v30 = vmul.f32 %v829_v24, %v3609_v27 }
 0x292   :  { %841 = vrot.lane.b32.xlu0 %v832_v41, %s3484_s19  ;;  %839 = vrot.lane.b32.xlu1 %v831_v42, %s3484_s19 }
 0x296   :  { %845 = vrot.lane.b32.xlu0 %v834_v28, %s3484_s19  ;;  %843 = vrot.lane.b32.xlu1 %v833_v30, %s3484_s19 }
 0x29a   :  { %868 = vperm.xlu1 %3441, %v3370_v17  }
 0x304   :  { %v3895_v33 = vpop.permute.xlu1 %839 }
 0x305   :  { %5599 = vst [vmem:[#allocation31_spill] sm:$0xff] %v3895_v33 }
 0x308   :  { %v3897_v39 = vpop.permute.xlu1 %843 }
 0x309   :  { %5600 = vst [vmem:[#allocation32_spill] sm:$0xff] %v3897_v39  ;;  %v3911_v39 = vpop.permute.xlu0 %841 }
 0x30a   :  { %5601 = vst [vmem:[#allocation33_spill] sm:$0xff] %v3911_v39 }
 0x30d   :  { %v3913_v33 = vpop.permute.xlu0 %845 }
 0x30e   :  { %5602 = vst [vmem:[#allocation34_spill] sm:$0xff] %v3913_v33 }
 0x319   :  { %v869_v41 = vpop.permute.xlu1 %868 }
 0x31a   :  { %v876_v42 = vrot.slane %v869_v41, %v3598_v23  ;;  %v3371_v41 = vld [vmem:[%s5505_s2 + $0x38] sm:$0xf] }
 0x31c   :  { %v879_v24 = vmul.f32 %v876_v42, %v3619_v32  ;;  %v878_v30 = vmul.f32 %v876_v42, %v3604_v26  ;;  %v881_v17 = vmul.f32 %v876_v42, %v3629_v37  ;;  %v880_v28 = vmul.f32 %v876_v42, %v3609_v27 }
 0x31e   :  { %888 = vrot.lane.b32.xlu1 %v879_v24, %s3478_s29  ;;  %886 = vrot.lane.b32.xlu0 %v878_v30, %s3478_s29 }
 0x322   :  { %892 = vrot.lane.b32.xlu1 %v881_v17, %s3478_s29  ;;  %890 = vrot.lane.b32.xlu0 %v880_v28, %s3478_s29  ;;  %s3492_s29 = smov 48  }
 0x326   :  { %914 = vperm.xlu0 %3440, %v3371_v41  }
 0x390   :  { %v3915_v24 = vpop.permute.xlu0 %886 }
 0x391   :  { %5603 = vst [vmem:[#allocation35_spill] sm:$0xff] %v3915_v24  ;;  %v3927_v24 = vpop.permute.xlu1 %888 }
 0x392   :  { %5605 = vst [vmem:[#allocation37_spill] sm:$0xff] %v3927_v24 }
 0x394   :  { %v3917_v30 = vpop.permute.xlu0 %890 }
 0x395   :  { %5604 = vst [vmem:[#allocation36_spill] sm:$0xff] %v3917_v30  ;;  %v3372_v30 = vld [vmem:[%s5505_s2 + $0x3c] sm:$0xf] }
 0x3a5   :  { %v915_v43 = vpop.permute.xlu0 %914 }
 0x3a6   :  { %v922_v42 = vrot.slane %v915_v43, %v3598_v23  ;;  %v3929_v43 = vpop.permute.xlu1 %892 }
 0x3a7   :  { %5606 = vst [vmem:[#allocation38_spill] sm:$0xff] %v3929_v43 }
 0x3a8   :  { %v925_v17 = vmul.f32 %v922_v42, %v3619_v32  ;;  %v924_v28 = vmul.f32 %v922_v42, %v3604_v26  ;;  %v927_v41 = vmul.f32 %v922_v42, %v3629_v37  ;;  %v926_v39 = vmul.f32 %v922_v42, %v3609_v27 }
 0x3aa   :  { %934 = vrot.lane.b32.xlu0 %v925_v17, %s3485_s24  ;;  %932 = vrot.lane.b32.xlu1 %v924_v28, %s3485_s24 }
 0x3ae   :  { %938 = vrot.lane.b32.xlu0 %v927_v41, %s3485_s24  ;;  %936 = vrot.lane.b32.xlu1 %v926_v39, %s3485_s24 }
 0x3b2   :  { %961 = vperm.xlu1 %3441, %v3372_v30  }
 0x41c   :  { %v3931_v33 = vpop.permute.xlu1 %932 }
 0x41d   :  { %5607 = vst [vmem:[#allocation39_spill] sm:$0xff] %v3931_v33  ;;  %v3943_v33 = vpop.permute.xlu0 %934 }
 0x41e   :  { %5609 = vst [vmem:[#allocation41_spill] sm:$0xff] %v3943_v33 }
 0x420   :  { %v3933_v19 = vpop.permute.xlu1 %936 }
 0x421   :  { %5608 = vst [vmem:[#allocation40_spill] sm:$0xff] %v3933_v19  ;;  %v3373_v19 = vld [vmem:[%s5505_s2 + $0x40] sm:$0xf] }
 0x431   :  { %v962_v17 = vpop.permute.xlu1 %961 }
 0x432   :  { %v969_v28 = vrot.slane %v962_v17, %v3598_v23  ;;  %v3945_v17 = vpop.permute.xlu0 %938 }
 0x433   :  { %5610 = vst [vmem:[#allocation42_spill] sm:$0xff] %v3945_v17 }
 0x434   :  { %v972_v42 = vmul.f32 %v969_v28, %v3619_v32  ;;  %v971_v39 = vmul.f32 %v969_v28, %v3604_v26  ;;  %v974_v30 = vmul.f32 %v969_v28, %v3629_v37  ;;  %v973_v41 = vmul.f32 %v969_v28, %v3609_v27 }
 0x436   :  { %981 = vrot.lane.b32.xlu1 %v972_v42, %s3486_s27  ;;  %979 = vrot.lane.b32.xlu0 %v971_v39, %s3486_s27 }
 0x43a   :  { %985 = vrot.lane.b32.xlu1 %v974_v30, %s3486_s27  ;;  %983 = vrot.lane.b32.xlu0 %v973_v41, %s3486_s27 }
 0x43e   :  { %1008 = vperm.xlu0 %3440, %v3373_v19  }
 0x4a8   :  { %v3947_v43 = vpop.permute.xlu0 %979 }
 0x4a9   :  { %5611 = vst [vmem:[#allocation43_spill] sm:$0xff] %v3947_v43  ;;  %v3959_v43 = vpop.permute.xlu1 %981 }
 0x4aa   :  { %5613 = vst [vmem:[#allocation45_spill] sm:$0xff] %v3959_v43 }
 0x4ac   :  { %v3949_v24 = vpop.permute.xlu0 %983 }
 0x4ad   :  { %5612 = vst [vmem:[#allocation44_spill] sm:$0xff] %v3949_v24  ;;  %v3374_v24 = vld [vmem:[%s5504_s1 + $0x18] sm:$0xf] }
 0x4bd   :  { %v1009_v42 = vpop.permute.xlu0 %1008 }
 0x4be   :  { %v1016_v39 = vrot.slane %v1009_v42, %v3598_v23  ;;  %v3961_v42 = vpop.permute.xlu1 %985 }
 0x4bf   :  { %5614 = vst [vmem:[#allocation46_spill] sm:$0xff] %v3961_v42 }
 0x4c0   :  { %v1019_v28 = vmul.f32 %v1016_v39, %v3619_v32  ;;  %v1018_v30 = vmul.f32 %v1016_v39, %v3604_v26  ;;  %v1021_v19 = vmul.f32 %v1016_v39, %v3629_v37  ;;  %v1020_v41 = vmul.f32 %v1016_v39, %v3609_v27 }
 0x4c2   :  { %1028 = vrot.lane.b32.xlu0 %v1019_v28, %s3487_s9  ;;  %1026 = vrot.lane.b32.xlu1 %v1018_v30, %s3487_s9 }
 0x4c6   :  { %1032 = vrot.lane.b32.xlu0 %v1021_v19, %s3487_s9  ;;  %1030 = vrot.lane.b32.xlu1 %v1020_v41, %s3487_s9  ;;  %s3493_s9 = smov 47  }
 0x4ca   :  { %1055 = vperm.xlu1 %3441, %v3374_v24  }
 0x534   :  { %v3963_v17 = vpop.permute.xlu1 %1026 }
 0x535   :  { %5615 = vst [vmem:[#allocation47_spill] sm:$0xff] %v3963_v17 }
 0x538   :  { %v3965_v33 = vpop.permute.xlu1 %1030 }
 0x539   :  { %5616 = vst [vmem:[#allocation48_spill] sm:$0xff] %v3965_v33  ;;  %v3376_v33 = vld [vmem:[%s5504_s1 + $0x1c] sm:$0xf] }
 0x549   :  { %v1056_v28 = vpop.permute.xlu1 %1055 }
 0x54a   :  { %v1063_v30 = vrot.slane %v1056_v28, %v3598_v23  ;;  %v3375_v28 = vld [vmem:[%s5505_s2 + $0x44] sm:$0xf] }
 0x54c   :  { %v1066_v39 = vmul.f32 %v1063_v30, %v3619_v32  ;;  %v1065_v19 = vmul.f32 %v1063_v30, %v3604_v26  ;;  %v1068_v24 = vmul.f32 %v1063_v30, %v3629_v37  ;;  %v1067_v41 = vmul.f32 %v1063_v30, %v3609_v27  ;;  %v3378_v30 = vld [vmem:[%s5504_s1 + $0x20] sm:$0xf] }
 0x54e   :  { %1075 = vrot.lane.b32.xlu1 %v1066_v39, %s3481_s10  ;;  %1073 = vrot.lane.b32.xlu0 %v1065_v19, %s3481_s10  ;;  %v3377_v39 = vld [vmem:[%s5505_s2 + $0x48] sm:$0xf]  ;;  %v3380_v19 = vld [vmem:[%s5505_s2 + $0x50] sm:$0xf] }
 0x552   :  { %1079 = vrot.lane.b32.xlu1 %v1068_v24, %s3481_s10  ;;  %1077 = vrot.lane.b32.xlu0 %v1067_v41, %s3481_s10  ;;  %v3379_v24 = vld [vmem:[%s5505_s2 + $0x4c] sm:$0xf]  ;;  %v3381_v41 = vld [vmem:[%s5505_s2 + $0x54] sm:$0xf] }
 0x556   :  { %1101 = vperm.xlu1 %3441, %v3375_v28   ;;  %1148 = vperm.xlu0 %3440, %v3376_v33   ;;  %v3382_v33 = vld [vmem:[%s5505_s2 + $0x58] sm:$0xf]  ;;  %v3384_v28 = vld [vmem:[%s5505_s2 + $0x60] sm:$0xf] }
 0x55a   :  { %1194 = vperm.xlu1 %3441, %v3377_v39   ;;  %1241 = vperm.xlu0 %3440, %v3378_v30   ;;  %v3383_v39 = vld [vmem:[%s5505_s2 + $0x5c] sm:$0xf]  ;;  %v4006_v30 = vpop.permute.xlu0 %1028  ;;  %s3488_s2 = smov 66  }
 0x55b   :  { %5617 = vst [vmem:[#allocation49_spill] sm:$0xff] %v4006_v30 }
 0x55e   :  { %1338 = vperm.xlu1 %3441, %v3380_v19   ;;  %1287 = vperm.xlu0 %3440, %v3379_v24   ;;  %v4008_v19 = vpop.permute.xlu0 %1032 }
 0x55f   :  { %5618 = vst [vmem:[#allocation50_spill] sm:$0xff] %v4008_v19 }
 0x562   :  { %1436 = vperm.xlu1 %3441, %v3382_v33   ;;  %1387 = vperm.xlu0 %3440, %v3381_v41  }
 0x566   :  { %1534 = vperm.xlu1 %3441, %v3384_v28   ;;  %1485 = vperm.xlu0 %3440, %v3383_v39  }
 0x5c0   :  { %v4010_v24 = vpop.permute.xlu1 %1075  ;;  %v4012_v17 = vpop.permute.xlu0 %1073 }
 0x5c1   :  { %5619 = vst [vmem:[#allocation51_spill] sm:$0xff] %v4010_v24  ;;  %5620 = vst [vmem:[#allocation52_spill] sm:$0xff] %v4012_v17 }
 0x5c4   :  { %v4014_v33 = vpop.permute.xlu1 %1079  ;;  %v4016_v41 = vpop.permute.xlu0 %1077 }
 0x5c5   :  { %5621 = vst [vmem:[#allocation53_spill] sm:$0xff] %v4014_v33  ;;  %5622 = vst [vmem:[#allocation54_spill] sm:$0xff] %v4016_v41 }
 0x5d5   :  { %v1102_v42 = vpop.permute.xlu1 %1101  ;;  %v1149_v39 = vpop.permute.xlu0 %1148 }
 0x5d6   :  { %v1109_v43 = vrot.slane %v1102_v42, %v3598_v23  ;;  %v1156_v19 = vrot.slane %v1149_v39, %v3598_v23 }
 0x5d8   :  { %v1112_v38 = vmul.f32 %v1109_v43, %v3619_v32  ;;  %v1111_v28 = vmul.f32 %v1109_v43, %v3604_v26  ;;  %v1114_v24 = vmul.f32 %v1109_v43, %v3629_v37  ;;  %v1113_v17 = vmul.f32 %v1109_v43, %v3609_v27 }
 0x5d9   :  { %v1159_v41 = vmul.f32 %v1156_v19, %v3619_v32  ;;  %v1158_v42 = vmul.f32 %v1156_v19, %v3604_v26  ;;  %v1195_v33 = vpop.permute.xlu1 %1194  ;;  %v1160_v39 = vmul.f32 %v1156_v19, %v3609_v27 }
 0x5da   :  { %1121 = vrot.lane.b32.xlu1 %v1112_v38, %s3488_s2  ;;  %1119 = vrot.lane.b32.xlu0 %v1111_v28, %s3488_s2  ;;  %v1202_v38 = vrot.slane %v1195_v33, %v3598_v23  ;;  %v1161_v28 = vmul.f32 %v1156_v19, %v3629_v37  ;;  %v4039_v19 = vsub.s32 0, %v3593_v21 }
 0x5dc   :  { %v1205_v43 = vmul.f32 %v1202_v38, %v3619_v32  ;;  %v1207_v33 = vmul.f32 %v1202_v38, %v3629_v37  ;;  %5623 = vst [vmem:[#allocation55_spill] sm:$0xff] %v4039_v19 }
 0x5de   :  { %1125 = vrot.lane.b32.xlu1 %v1114_v24, %s3488_s2  ;;  %1123 = vrot.lane.b32.xlu0 %v1113_v17, %s3488_s2  ;;  %v1204_v17 = vmul.f32 %v1202_v38, %v3604_v26  ;;  %v1242_v24 = vpop.permute.xlu0 %1241  ;;  %s3496_s2 = smov 44  }
 0x5e2   :  { %1168 = vrot.lane.b32.xlu1 %v1159_v41, %s3482_s11  ;;  %1166 = vrot.lane.b32.xlu0 %v1158_v42, %s3482_s11  ;;  %v1249_v41 = vrot.slane %v1242_v24, %v3598_v23  ;;  %v1206_v42 = vmul.f32 %v1202_v38, %v3609_v27  ;;  %v1288_v24 = vpop.permute.xlu0 %1287 }
 0x5e4   :  { %v1254_v30 = vmul.f32 %v1249_v41, %v3629_v37  ;;  %v1253_v36 = vmul.f32 %v1249_v41, %v3609_v27 }
 0x5e6   :  { %1172 = vrot.lane.b32.xlu1 %v1161_v28, %s3482_s11  ;;  %1170 = vrot.lane.b32.xlu0 %v1160_v39, %s3482_s11  ;;  %v4042_v28 = vsub.s32 1, %v3593_v21  ;;  %v1579_v39 = vld [vmem:[%s5510_s7] sm:$0x7]  ;;  %s3490_s7 = smov 21  }
 0x5e7   :  { %v1584_v38 = vrot.slane %v1579_v39, %v4039_v19 }
 0x5e8   :  { %5624 = vst [vmem:[#allocation56_spill] sm:$0xff] %v4042_v28 }
 0x5ea   :  { %1214 = vrot.lane.b32.xlu1 %v1205_v43, %s3489_s15  ;;  %1212 = vrot.lane.b32.xlu0 %v1204_v17, %s3489_s15  ;;  %v1252_v43 = vmul.f32 %v1249_v41, %v3619_v32  ;;  %v1251_v17 = vmul.f32 %v1249_v41, %v3604_v26 }
 0x5ee   :  { %1218 = vrot.lane.b32.xlu1 %v1207_v33, %s3489_s15  ;;  %1216 = vrot.lane.b32.xlu0 %v1206_v42, %s3489_s15  ;;  %v1588_v33 = vrot.slane %v1579_v39, %v4042_v28  ;;  %v1295_v42 = vrot.slane %v1288_v24, %v3598_v23 }
 0x5f0   :  { %v4058_v15 = vcombine.low %v1584_v38, %v1588_v33  ;;  %v1299_v24 = vmul.f32 %v1295_v42, %v3609_v27  ;;  %v1298_v41 = vmul.f32 %v1295_v42, %v3619_v32  ;;  %v1339_v38 = vpop.permute.xlu1 %1338  ;;  %v3386_v33 = vld [vmem:[%s5506_s3 + $0x8] sm:$0xff] }
 0x5f2   :  { %1261 = vrot.lane.b32.xlu1 %v1252_v43, %s3483_s14  ;;  %1259 = vrot.lane.b32.xlu0 %v1251_v17, %s3483_s14  ;;  %5625 = vst [vmem:[#allocation57_spill] sm:$0xff] %v4058_v15  ;;  %v1297_v43 = vmul.f32 %v1295_v42, %v3604_v26  ;;  %v4064_v17 = vsub.s32 2, %v3593_v21 }
 0x5f4   :  { %5626 = vst [vmem:[#allocation58_spill] sm:$0xff] %v4064_v17  ;;  %v1437_v13 = vpop.permute.xlu1 %1436 }
 0x5f6   :  { %1265 = vrot.lane.b32.xlu1 %v1254_v30, %s3483_s14  ;;  %1263 = vrot.lane.b32.xlu0 %v1253_v36, %s3483_s14  ;;  %v4069_v36 = vrot.slane %v1579_v39, %v4064_v17  ;;  %v1300_v30 = vmul.f32 %v1295_v42, %v3629_v37  ;;  %v1331_v39 = vld [vmem:[%s5503_s0 + $0x8] sm:$0xff]  ;;  %v1330_v42 = vld [vmem:[%s5503_s0] sm:$0xff] }
 0x5f8   :  { %5627 = vst [vmem:[#allocation59_spill] sm:$0xff] %v4069_v36  ;;  %v1535_v11 = vpop.permute.xlu1 %1534 }
 0x5fa   :  { %1595 = vrot.lane.b32.xlu1 %v4058_v15, %s3490_s7  ;;  %1305 = vrot.lane.b32.xlu0 %v1297_v43, %s3491_s17  ;;  %v1617_v43 = vld [vmem:[%s5506_s3] sm:$0xff]  ;;  %v1388_v15 = vpop.permute.xlu0 %1387 }
 0x5fb   :  { %v1395_v17 = vrot.slane %v1388_v15, %v3598_v23  ;;  %v3388_v15 = vld [vmem:[%s5506_s3 + $0x18] sm:$0xff] }
 0x5fd   :  { %v1398_v21 = vmul.f32 %v1395_v17, %v1331_v39 }
 0x5fe   :  { %1309 = vrot.lane.b32.xlu1 %v1299_v24, %s3491_s17  ;;  %1307 = vrot.lane.b32.xlu0 %v1298_v41, %s3491_s17  ;;  %v1346_v24 = vrot.slane %v1339_v38, %v3598_v23  ;;  %v1332_v38 = vld [vmem:[%s5503_s0 + $0x10] sm:$0xff] }
 0x5ff   :  { %v1399_v35 = vmul.f32 %v1395_v17, %v1332_v38 }
 0x600   :  { %v1349_v41 = vmul.f32 %v1346_v24, %v1331_v39  ;;  %v1350_v19 = vmul.f32 %v1346_v24, %v1332_v38 }
 0x602   :  { %1597 = vrot.lane.b32.xlu1 %v4069_v36, %s3490_s7  ;;  %1311 = vrot.lane.b32.xlu0 %v1300_v30, %s3491_s17  ;;  %v1348_v30 = vmul.f32 %v1346_v24, %v1330_v42  ;;  %v1333_v36 = vld [vmem:[%s5503_s0 + $0x18] sm:$0xff] }
 0x603   :  { %v1351_v28 = vmul.f32 %v1346_v24, %v1333_v36 }
 0x606   :  { %1745 = vperm.xlu1 %3441, %v3386_v33   ;;  %1678 = vperm.xlu0 %3440, %v1617_v43   ;;  %v3387_v33 = vld [vmem:[%s5506_s3 + $0x10] sm:$0xff]  ;;  %v1397_v43 = vmul.f32 %v1395_v17, %v1330_v42  ;;  %s3495_s3 = smov 45  }
 0x60a   :  { %1358 = vrot.lane.b32.xlu1 %v1349_v41, %s3492_s29  ;;  %1356 = vrot.lane.b32.xlu0 %v1348_v30, %s3492_s29  ;;  %v1486_v30 = vpop.permute.xlu0 %1485 }
 0x60e   :  { %1362 = vrot.lane.b32.xlu1 %v1351_v28, %s3492_s29  ;;  %1360 = vrot.lane.b32.xlu0 %v1350_v19, %s3492_s29  ;;  %v1444_v28 = vrot.slane %v1437_v13, %v3598_v23  ;;  %v1400_v19 = vmul.f32 %v1395_v17, %v1333_v36  ;;  %v1542_v13 = vrot.slane %v1535_v11, %v3598_v23  ;;  %v81_v11 = vrot.slane %v3775_v14, 4 }
 0x610   :  { %v1446_v24 = vmul.f32 %v1444_v28, %v1330_v42  ;;  %v1447_v41 = vmul.f32 %v1444_v28, %v1331_v39 }
 0x612   :  { %1818 = vperm.xlu0 %3440, %v3387_v33   ;;  %1405 = vrot.lane.b32.xlu1 %v1397_v43, %s3493_s9  ;;  %v1493_v33 = vrot.slane %v1486_v30, %v3598_v23  ;;  %v1448_v43 = vmul.f32 %v1444_v28, %v1332_v38  ;;  %v345_v30 = vrot.slane %v3661_v0, %v3598_v23 }
 0x614   :  { %v1495_v12 = vmul.f32 %v1493_v33, %v1330_v42  ;;  %v1498_v17 = vmul.f32 %v1493_v33, %v1333_v36  ;;  %v4119_v0 = vmul.f32 %v345_v30, %v3609_v27 }
 0x616   :  { %1407 = vrot.lane.b32.xlu0 %v1398_v21, %s3493_s9  ;;  %1409 = vrot.lane.b32.xlu1 %v1399_v35, %s3493_s9  ;;  %v1449_v21 = vmul.f32 %v1444_v28, %v1333_v36  ;;  %v1496_v35 = vmul.f32 %v1493_v33, %v1331_v39  ;;  %v82_v28 = vrot.slane %v3779_v16, 4 }
 0x61a   :  { %1411 = vrot.lane.b32.xlu0 %v1400_v19, %s3493_s9  ;;  %1891 = vperm.xlu1 %3441, %v3388_v15   ;;  %v1497_v15 = vmul.f32 %v1493_v33, %v1332_v38  ;;  %v1545_v19 = vmul.f32 %v1542_v13, %v1331_v39  ;;  %v1546_v33 = vmul.f32 %v1542_v13, %v1332_v38 }
 0x61b   :  { %v4123_v38 = vmul.f32 %v345_v30, %v3619_v32 }
 0x61e   :  { %1454 = vrot.lane.b32.xlu0 %v1446_v24, %s3494_s13  ;;  %1456 = vrot.lane.b32.xlu1 %v1447_v41, %s3494_s13  ;;  %v1544_v24 = vmul.f32 %v1542_v13, %v1330_v42  ;;  %v45_v41 = vrot.slane %v3595_v22, %v3598_v23  ;;  %v86_v42 = vsel %vm85_vm0, %v81_v11, %v82_v28  ;;  %v177_v28 = vrot.slane %v3795_v29, 4 }
 0x61f   :  { %v4116_v23 = vmul.f32 %v345_v30, %v3604_v26  ;;  %v132_v11 = vrot.slane %v3739_v59, 4 }
 0x620   :  { %v50_v39 = vmul.f32 %v45_v41, %v3629_v37  ;;  %v47_v22 = vmul.f32 %v45_v41, %v3604_v26 }
 0x622   :  { %1458 = vrot.lane.b32.xlu0 %v1448_v43, %s3494_s13  ;;  %1460 = vrot.lane.b32.xlu1 %v1449_v21, %s3494_s13  ;;  %v48_v43 = vmul.f32 %v45_v41, %v3619_v32  ;;  %v84_v21 = vrot.slane %v3783_v18, 4  ;;  %v130_v32 = vrot.slane %v3737_v58, 4 }
 0x624   :  { %v96_v26 = vadd.f32 %v3779_v16, %v48_v43  ;;  %v179_v16 = vrot.slane %v3799_v31, 4  ;;  %v178_v43 = vrot.slane %v3743_v61, 4 }
 0x626   :  { %1505 = vrot.lane.b32.xlu1 %v1496_v35, %s3495_s3  ;;  %1503 = vrot.lane.b32.xlu0 %v1495_v12, %s3495_s3  ;;  %v1547_v12 = vmul.f32 %v1542_v13, %v1333_v36  ;;  %v49_v35 = vmul.f32 %v45_v41, %v3609_v27  ;;  %v129_v36 = vrot.slane %v3787_v20, 4  ;;  %v3398_v13 = vld [vmem:[%s5507_s4 + $0x8] sm:$0xff]  ;;  %v131_v27 = vrot.slane %v3791_v25, 4 }
 0x627   :  { %v88_v41 = vsel %vm87_vm1, %v3775_v14, %v86_v42  ;;  %v3400_v14 = vld [vmem:[%s5507_s4 + $0x18] sm:$0xff]  ;;  %v143_v42 = vadd.f32 %v3737_v58, %v96_v26  ;;  %v224_v58 = vrot.slane %v3745_v62, 4 }
 0x62a   :  { %1509 = vrot.lane.b32.xlu1 %v1498_v17, %s3495_s3  ;;  %1507 = vrot.lane.b32.xlu0 %v1497_v15, %s3495_s3  ;;  %v2368_v17 = vld [vmem:[%s5507_s4] sm:$0xff]  ;;  %v83_v15 = vrot.slane %v3735_v57, 4 }
 0x62e   :  { %1554 = vrot.lane.b32.xlu1 %v1545_v19, %s3496_s2  ;;  %1552 = vrot.lane.b32.xlu0 %v1544_v24, %s3496_s2  ;;  %v4135_v19 = vmul.f32 %v345_v30, %v3629_v37  ;;  %v98_v24 = vadd.f32 %v3783_v18, %v50_v39  ;;  %v176_v37 = vrot.slane %v3741_v60, 4  ;;  %v133_v30 = vsel %vm85_vm0, %v129_v36, %v130_v32  ;;  %v3399_v18 = vld [vmem:[%s5507_s4 + $0x10] sm:$0xff] }
 0x62f   :  { %v136_v39 = vsel %vm85_vm0, %v131_v27, %v132_v11  ;;  %v225_v32 = vrot.slane %v3810_v40, 4  ;;  %v271_v27 = vrot.slane %v3819_v44, 4 }
 0x630   :  { %v180_v36 = vsel %vm85_vm0, %v176_v37, %v177_v28 }
 0x631   :  { %v182_v28 = vsel %vm181_vm3, %v3741_v60, %v180_v36  ;;  %v317_v60 = vrot.slane %v3823_v46, 4 }
 0x632   :  { %1558 = vrot.lane.b32.xlu1 %v1547_v12, %s3496_s2  ;;  %1556 = vrot.lane.b32.xlu0 %v1546_v33, %s3496_s2  ;;  %v89_v12 = vsel %vm85_vm0, %v83_v15, %v84_v21  ;;  %v95_v33 = vadd.f32 %v88_v41, %v47_v22  ;;  %v135_v15 = vsel %vm134_vm2, %v3787_v20, %v133_v30  ;;  %v226_v20 = vrot.slane %v3747_v63, 4 }
 0x633   :  { %v90_v21 = vsel %vm87_vm1, %v3735_v57, %v89_v12  ;;  %v183_v22 = vsel %vm85_vm0, %v178_v43, %v179_v16  ;;  %v137_v57 = vsel %vm134_vm2, %v3791_v25, %v136_v39  ;;  %v270_v41 = vrot.slane %v3749_v1, 4 }
 0x634   :  { %v142_v11 = vadd.f32 %v135_v15, %v95_v33  ;;  %v184_v25 = vsel %vm181_vm3, %v3743_v61, %v183_v22  ;;  %v272_v61 = vrot.slane %v3751_v2, 4  ;;  %v319_v43 = vrot.slane %v3825_v47, 4 }
 0x635   :  { %vm1225_vm3 = vcmask 531456  }
 0x636   :  { %2496 = vperm.xlu1 %3441, %v3398_v13   ;;  %2429 = vperm.xlu0 %3440, %v2368_v17   ;;  %v145_v13 = vadd.f32 %v3739_v59, %v98_v24  ;;  %v223_v17 = vrot.slane %v3803_v34, 4  ;;  %v190_v59 = vadd.f32 %v3795_v29, %v143_v42  ;;  %v97_v24 = vadd.f32 %v90_v21, %v49_v35 }
 0x637   :  { %v230_v29 = vsel %vm85_vm0, %v225_v32, %v226_v20  ;;  %v273_v35 = vrot.slane %v3821_v45, 4  ;;  %v189_v37 = vadd.f32 %v182_v28, %v142_v11  ;;  %v318_v42 = vrot.slane %v3753_v3, 4 }
 0x638   :  { %v192_v26 = vadd.f32 %v3799_v31, %v145_v13  ;;  %v227_v12 = vsel %vm85_vm0, %v223_v17, %v224_v58  ;;  %v144_v16 = vadd.f32 %v137_v57, %v97_v24  ;;  %v274_v31 = vsel %vm85_vm0, %v270_v41, %v271_v27 }
 0x639   :  { %v237_v30 = vadd.f32 %v3745_v62, %v190_v59  ;;  %v231_v39 = vsel %vm228_vm4, %v3810_v40, %v230_v29  ;;  %v276_v62 = vsel %vm275_vm5, %v3749_v1, %v274_v31  ;;  %v277_v36 = vsel %vm85_vm0, %v272_v61, %v273_v35 }
 0x63a   :  { %2642 = vperm.xlu1 %3441, %v3400_v14   ;;  %2569 = vperm.xlu0 %3440, %v3399_v18   ;;  %v239_v14 = vadd.f32 %v3747_v63, %v192_v26  ;;  %v229_v18 = vsel %vm228_vm4, %v3803_v34, %v227_v12  ;;  %v191_v33 = vadd.f32 %v184_v25, %v144_v16  ;;  %v320_v63 = vrot.slane %v3755_v4, 4 }
 0x63b   :  { %v284_v21 = vadd.f32 %v3819_v44, %v237_v30  ;;  %v381_v13 = vrot.slane %v3827_v48, 4  ;;  %v236_v17 = vadd.f32 %v229_v18, %v189_v37  ;;  %v321_v15 = vsel %vm85_vm0, %v317_v60, %v318_v42 }
 0x63c   :  { %v286_v34 = vadd.f32 %v3821_v45, %v239_v14  ;;  %v383_v40 = vrot.slane %v3829_v49, 4  ;;  %v238_v22 = vadd.f32 %v231_v39, %v191_v33  ;;  %v382_v44 = vrot.slane %v3757_v5, 4 }
 0x63d   :  { %v324_v32 = vsel %vm85_vm0, %v319_v43, %v320_v63  ;;  %v331_v1 = vadd.f32 %v3753_v3, %v284_v21  ;;  %v283_v27 = vadd.f32 %v276_v62, %v236_v17  ;;  %v384_v57 = vrot.slane %v3759_v6, 4  ;;  %v5628_v21 = vld [vmem:[#allocation6_spill] sm:$0xff]  ;;  %v5629_v63 = vld [vmem:[#allocation7_spill] sm:$0xff]  ;;  %v5630_v17 = vld [vmem:[#allocation8_spill] sm:$0xff] }
 0x63e   :  { %v278_v45 = vsel %vm275_vm5, %v3751_v2, %v277_v36  ;;  %v323_v58 = vsel %vm322_vm6, %v3823_v46, %v321_v15  ;;  %v333_v59 = vadd.f32 %v3755_v4, %v286_v34  ;;  %v385_v26 = vsel %vm85_vm0, %v381_v13, %v382_v44  ;;  %v5631_v44 = vld [vmem:[#allocation16_spill] sm:$0xff] }
 0x63f   :  { %v429_v24 = vrot.slane %v3831_v50, 4  ;;  %v325_v20 = vsel %vm322_vm6, %v3825_v47, %v324_v32  ;;  %v388_v3 = vsel %vm85_vm0, %v383_v40, %v384_v57  ;;  %v431_v41 = vrot.slane %v3833_v51, 4 }
 0x640   :  { %v474_v28 = vrot.slane %v3835_v52, 4  ;;  %v395_v2 = vadd.f32 %v3757_v5, %v331_v1  ;;  %v285_v11 = vadd.f32 %v278_v45, %v238_v22  ;;  %v428_v46 = vrot.slane %v3761_v7, 4  ;;  %v5632_v45 = vld [vmem:[#allocation9_spill] sm:$0xff] }
 0x641   :  { %v476_v4 = vrot.slane %v3837_v53, 4  ;;  %v330_v12 = vadd.f32 %v323_v58, %v283_v27  ;;  %v387_v25 = vsel %vm386_vm7, %v3827_v48, %v385_v26  ;;  %v430_v47 = vrot.slane %v3763_v8, 4 }
 0x642   :  { %v475_v16 = vrot.slane %v3765_v9, 4  ;;  %v332_v29 = vadd.f32 %v325_v20, %v285_v11  ;;  %v389_v31 = vsel %vm386_vm7, %v3829_v49, %v388_v3  ;;  %v432_v5 = vsel %vm85_vm0, %v428_v46, %v429_v24  ;;  %v5633_v20 = vld [vmem:[#allocation17_spill] sm:$0xff]  ;;  %v5635_v11 = vld [vmem:[#allocation19_spill] sm:$0xff] }
 0x643   :  { %v477_v35 = vrot.slane %v3767_v10, 4  ;;  %v434_v37 = vsel %vm85_vm0, %v430_v47, %v431_v41  ;;  %v522_v14 = vrot.slane %v3839_v54, 4  ;;  %v524_v48 = vrot.slane %v3841_v55, 4  ;;  %v5634_v41 = vld [vmem:[#allocation18_spill] sm:$0xff]  ;;  %v5637_v47 = vld [vmem:[#allocation11_spill] sm:$0xff] }
 0x644   :  { %v478_v30 = vsel %vm85_vm0, %v474_v28, %v475_v16  ;;  %v397_v60 = vadd.f32 %v3759_v6, %v333_v59  ;;  %v394_v18 = vadd.f32 %v387_v25, %v330_v12  ;;  %v567_v33 = vrot.slane %v3843_v56, 4 }
 0x645   :  { %v481_v61 = vsel %vm85_vm0, %v476_v4, %v477_v35  ;;  %v396_v39 = vadd.f32 %v389_v31, %v332_v29  ;;  %v488_v42 = vadd.f32 %v3765_v9, %v395_v2  ;;  %v521_v62 = vrot.slane %v5628_v21, 4  ;;  %v5638_v35 = vld [vmem:[#allocation12_spill] sm:$0xff] }
 0x646   :  { %v523_v36 = vrot.slane %v5629_v63, 4  ;;  %v433_v34 = vsel %vm87_vm1, %v3761_v7, %v432_v5  ;;  %v435_v6 = vsel %vm87_vm1, %v3763_v8, %v434_v37  ;;  %v480_v13 = vsel %vm479_vm8, %v3835_v52, %v478_v30 }
 0x647   :  { %v568_v15 = vrot.slane %v5630_v17, 4  ;;  %v482_v40 = vsel %vm479_vm8, %v3837_v53, %v481_v61  ;;  %v525_v9 = vsel %vm85_vm0, %v521_v62, %v522_v14  ;;  %v569_v32 = vrot.slane %v5631_v44, 4 }
 0x648   :  { %v527_v22 = vsel %vm85_vm0, %v523_v36, %v524_v48  ;;  %v441_v7 = vadd.f32 %v3831_v50, %v4123_v38  ;;  %v490_v8 = vadd.f32 %v3767_v10, %v397_v60  ;;  %v443_v52 = vadd.f32 %v3833_v51, %v4135_v19  ;;  %v5639_v48 = vld [vmem:[#allocation20_spill] sm:$0xff] }
 0x649   :  { %v571_v1 = vsel %vm85_vm0, %v567_v33, %v568_v15  ;;  %v487_v57 = vadd.f32 %v480_v13, %v394_v18  ;;  %v570_v58 = vrot.slane %v5632_v45, 4  ;;  %v440_v59 = vadd.f32 %v433_v34, %v4116_v23  ;;  %v5640_v18 = vld [vmem:[#allocation21_spill] sm:$0xff] }
 0x64a   :  { %v442_v26 = vadd.f32 %v435_v6, %v4119_v0  ;;  %v489_v50 = vadd.f32 %v482_v40, %v396_v39  ;;  %v581_v10 = vadd.f32 %v5630_v17, %v488_v42  ;;  %v526_v51 = vsel %vm134_vm2, %v5628_v21, %v525_v9  ;;  %v5641_v39 = vld [vmem:[#allocation22_spill] sm:$0xff]  ;;  %v5642_v21 = vld [vmem:[#allocation25_spill] sm:$0xff] }
 0x64b   :  { %v528_v38 = vsel %vm134_vm2, %v5629_v63, %v527_v22  ;;  %v573_v19 = vsel %vm572_vm9, %v3843_v56, %v571_v1  ;;  %v574_v24 = vsel %vm85_vm0, %v569_v32, %v570_v58  ;;  %v615_v3 = vrot.slane %v5633_v20, 4  ;;  %v5636_v56 = vld [vmem:[#allocation10_spill] sm:$0xff]  ;;  %v5643_v63 = vld [vmem:[#allocation23_spill] sm:$0xff]  ;;  %v5644_v17 = vld [vmem:[#allocation13_spill] sm:$0xff] }
 0x64c   :  { %v4234_v49 = vpop.permute.xlu1 %1121  ;;  %v4236_v43 = vpop.permute.xlu0 %1119  ;;  %v617_v23 = vrot.slane %v5634_v41, 4  ;;  %v4277_v0 = vadd.f32 %v3839_v54, %v441_v7  ;;  %v583_v28 = vadd.f32 %v5632_v45, %v490_v8  ;;  %v536_v2 = vadd.f32 %v3841_v55, %v443_v52  ;;  %v5645_v40 = vld [vmem:[#allocation14_spill] sm:$0xff]  ;;  %v5646_v7 = vld [vmem:[#allocation15_spill] sm:$0xff] }
 0x64d   :  { %v661_v46 = vrot.slane %v5635_v11, 4  ;;  %v614_v25 = vrot.slane %v5636_v56, 4  ;;  %v616_v16 = vrot.slane %v5637_v47, 4  ;;  %v628_v29 = vadd.f32 %v5633_v20, %v581_v10  ;;  %v5648_v10 = vld [vmem:[#allocation24_spill] sm:$0xff] }
 0x64e   :  { %v533_v31 = vadd.f32 %v526_v51, %v440_v59  ;;  %v580_v5 = vadd.f32 %v573_v19, %v487_v57  ;;  %v575_v54 = vsel %vm572_vm9, %v5631_v44, %v574_v24  ;;  %v662_v37 = vrot.slane %v5638_v35, 4  ;;  %v5650_v24 = vld [vmem:[#allocation27_spill] sm:$0xff] }
 0x64f   :  { %v535_v55 = vadd.f32 %v528_v38, %v442_v26  ;;  %v618_v30 = vsel %vm85_vm0, %v614_v25, %v615_v3  ;;  %v621_v14 = vsel %vm85_vm0, %v616_v16, %v617_v23  ;;  %v663_v60 = vrot.slane %v5639_v48, 4  ;;  %v5647_v26 = vld [vmem:[#allocation26_spill] sm:$0xff]  ;;  %v5649_v38 = vld [vmem:[#allocation29_spill] sm:$0xff]  ;;  %v5652_v23 = vld [vmem:[#allocation28_spill] sm:$0xff] }
 0x650   :  { %v4259_v27 = vpop.permute.xlu1 %1125  ;;  %v4261_v53 = vpop.permute.xlu0 %1123  ;;  %v709_v61 = vrot.slane %v5640_v18, 4  ;;  %v665_v33 = vsel %vm85_vm0, %v661_v46, %v662_v37  ;;  %v711_v42 = vrot.slane %v5641_v39, 4  ;;  %v755_v62 = vrot.slane %v5642_v21, 4  ;;  %v5651_v3 = vld [vmem:[#allocation30_spill] sm:$0xff] }
 0x651   :  { %v754_v36 = vrot.slane %v5643_v63, 4  ;;  %v582_v13 = vadd.f32 %v575_v54, %v489_v50  ;;  %v664_v15 = vrot.slane %v5644_v17, 4  ;;  %v708_v9 = vrot.slane %v5645_v40, 4 }
 0x652   :  { %v675_v22 = vadd.f32 %v5638_v35, %v628_v29  ;;  %v630_v44 = vadd.f32 %v5634_v41, %v583_v28  ;;  %v620_v32 = vsel %vm619_vm10, %v5636_v56, %v618_v30  ;;  %v710_v8 = vrot.slane %v5646_v7, 4  ;;  %v5653_v35 = vld [vmem:[#allocation33_spill] sm:$0xff]  ;;  %v5654_v30 = vld [vmem:[#allocation31_spill] sm:$0xff] }
 0x653   :  { %v622_v52 = vsel %vm619_vm10, %v5637_v47, %v621_v14  ;;  %v667_v1 = vsel %vm666_vm11, %v5635_v11, %v665_v33  ;;  %v668_v57 = vsel %vm85_vm0, %v663_v60, %v664_v15  ;;  %v712_v45 = vsel %vm85_vm0, %v708_v9, %v709_v61  ;;  %v5655_v61 = vld [vmem:[#allocation34_spill] sm:$0xff] }
 0x654   :  { %v4282_v4 = vpop.permute.xlu1 %1168  ;;  %v4284_v12 = vpop.permute.xlu0 %1166  ;;  %v714_v58 = vsel %vm85_vm0, %v710_v8, %v711_v42  ;;  %v758_v59 = vsel %vm85_vm0, %v754_v36, %v755_v62  ;;  %v757_v50 = vrot.slane %v5647_v26, 4  ;;  %v756_v51 = vrot.slane %v5648_v10, 4  ;;  %v5656_v42 = vld [vmem:[#allocation32_spill] sm:$0xff] }
 0x655   :  { %v802_v19 = vrot.slane %v5649_v38, 4  ;;  %v801_v20 = vrot.slane %v5650_v24, 4  ;;  %v804_v41 = vrot.slane %v5651_v3, 4  ;;  %v803_v28 = vrot.slane %v5652_v23, 4 }
 0x656   :  { %v627_v56 = vadd.f32 %v620_v32, %v580_v5  ;;  %v629_v25 = vadd.f32 %v622_v52, %v582_v13  ;;  %v669_v47 = vsel %vm666_vm11, %v5639_v48, %v668_v57  ;;  %v677_v16 = vadd.f32 %v5644_v17, %v630_v44 }
 0x657   :  { %v713_v29 = vsel %vm275_vm5, %v5645_v40, %v712_v45  ;;  %v715_v54 = vsel %vm275_vm5, %v5646_v7, %v714_v58  ;;  %v848_v37 = vrot.slane %v5653_v35, 4  ;;  %v847_v14 = vrot.slane %v5654_v30, 4  ;;  %v5660_v45 = vld [vmem:[#allocation36_spill] sm:$0xff] }
 0x658   :  { %v4300_v34 = vpop.permute.xlu1 %1172  ;;  %v4302_v6 = vpop.permute.xlu0 %1170  ;;  %v674_v60 = vadd.f32 %v667_v1, %v627_v56  ;;  %v760_v5 = vsel %vm759_vm12, %v5643_v63, %v758_v59  ;;  %v850_v33 = vrot.slane %v5655_v61, 4  ;;  %v849_v48 = vrot.slane %v5656_v42, 4 }
 0x659   :  { %v676_v62 = vadd.f32 %v669_v47, %v629_v25  ;;  %v761_v36 = vsel %vm85_vm0, %v756_v51, %v757_v50  ;;  %v805_v13 = vsel %vm85_vm0, %v801_v20, %v802_v19  ;;  %v807_v17 = vsel %vm85_vm0, %v803_v28, %v804_v41  ;;  %v5662_v19 = vld [vmem:[#allocation39_spill] sm:$0xff]  ;;  %v5663_v47 = vld [vmem:[#allocation42_spill] sm:$0xff] }
 0x65a   :  { %v721_v15 = vadd.f32 %v5640_v18, %v4277_v0  ;;  %v723_v40 = vadd.f32 %v5641_v39, %v536_v2  ;;  %v720_v9 = vadd.f32 %v713_v29, %v533_v31  ;;  %v722_v44 = vadd.f32 %v715_v54, %v535_v55  ;;  %v5657_v55 = vld [vmem:[#allocation37_spill] sm:$0xff]  ;;  %v5658_v39 = vld [vmem:[#allocation35_spill] sm:$0xff] }
 0x65b   :  { %v768_v63 = vadd.f32 %v5642_v21, %v675_v22  ;;  %v767_v32 = vadd.f32 %v760_v5, %v674_v60  ;;  %v851_v7 = vsel %vm85_vm0, %v847_v14, %v848_v37  ;;  %v762_v1 = vsel %vm759_vm12, %v5648_v10, %v761_v36  ;;  %v5659_v22 = vld [vmem:[#allocation38_spill] sm:$0xff]  ;;  %v5661_v10 = vld [vmem:[#allocation41_spill] sm:$0xff] }
 0x65c   :  { %v4325_v11 = vpop.permute.xlu1 %1214  ;;  %v4327_v46 = vpop.permute.xlu0 %1212  ;;  %v806_v0 = vsel %vm322_vm6, %v5650_v24, %v805_v13  ;;  %v808_v2 = vsel %vm322_vm6, %v5652_v23, %v807_v17  ;;  %v854_v31 = vsel %vm85_vm0, %v849_v48, %v850_v33  ;;  %v895_v18 = vrot.slane %v5657_v55, 4  ;;  %v5668_v17 = vld [vmem:[#allocation44_spill] sm:$0xff] }
 0x65d   :  { %v894_v21 = vrot.slane %v5658_v39, 4  ;;  %v897_v57 = vrot.slane %v5659_v22, 4  ;;  %v896_v58 = vrot.slane %v5660_v45, 4  ;;  %v770_v59 = vadd.f32 %v5647_v26, %v677_v16  ;;  %v5664_v26 = vld [vmem:[#allocation40_spill] sm:$0xff] }
 0x65e   :  { %v853_v50 = vsel %vm852_vm13, %v5654_v30, %v851_v7  ;;  %v941_v51 = vrot.slane %v5661_v10, 4  ;;  %v940_v24 = vrot.slane %v5662_v19, 4  ;;  %v769_v20 = vadd.f32 %v762_v1, %v676_v62  ;;  %v5666_v62 = vld [vmem:[#allocation43_spill] sm:$0xff] }
 0x65f   :  { %v814_v41 = vadd.f32 %v5649_v38, %v721_v15  ;;  %v813_v23 = vadd.f32 %v806_v0, %v720_v9  ;;  %v855_v28 = vsel %vm852_vm13, %v5656_v42, %v854_v31  ;;  %v816_v56 = vadd.f32 %v5651_v3, %v723_v40  ;;  %v5665_v42 = vld [vmem:[#allocation45_spill] sm:$0xff]  ;;  %v5670_v7 = vld [vmem:[#allocation47_spill] sm:$0xff]  ;;  %v5671_v0 = vld [vmem:[#allocation50_spill] sm:$0xff] }
 0x660   :  { %v4350_v8 = vpop.permute.xlu1 %1218  ;;  %v4352_v52 = vpop.permute.xlu0 %1216  ;;  %v815_v25 = vadd.f32 %v808_v2, %v722_v44  ;;  %v943_v29 = vrot.slane %v5663_v47, 4  ;;  %v942_v16 = vrot.slane %v5664_v26, 4  ;;  %v861_v54 = vadd.f32 %v5653_v35, %v768_v63  ;;  %v5667_v35 = vld [vmem:[#allocation46_spill] sm:$0xff]  ;;  %v5669_v63 = vld [vmem:[#allocation49_spill] sm:$0xff]  ;;  %v5672_v31 = vld [vmem:[#allocation48_spill] sm:$0xff] }
 0x661   :  { %v860_v37 = vadd.f32 %v853_v50, %v767_v32  ;;  %v898_v30 = vsel %vm85_vm0, %v894_v21, %v895_v18  ;;  %v900_v14 = vsel %vm85_vm0, %v896_v58, %v897_v57  ;;  %v863_v5 = vadd.f32 %v5655_v61, %v770_v59  ;;  %v5675_v50 = vld [vmem:[#allocation53_spill] sm:$0xff] }
 0x662   :  { %v862_v33 = vadd.f32 %v855_v28, %v769_v20  ;;  %v944_v3 = vsel %vm85_vm0, %v940_v24, %v941_v51  ;;  %v988_v48 = vrot.slane %v5665_v42, 4  ;;  %v987_v36 = vrot.slane %v5666_v62, 4  ;;  %v5676_v24 = vld [vmem:[#allocation54_spill] sm:$0xff] }
 0x663   :  { %v990_v13 = vrot.slane %v5667_v35, 4  ;;  %v989_v15 = vrot.slane %v5668_v17, 4  ;;  %v907_v40 = vadd.f32 %v5657_v55, %v814_v41  ;;  %v899_v9 = vsel %vm386_vm7, %v5658_v39, %v898_v30  ;;  %v5673_v55 = vld [vmem:[#allocation51_spill] sm:$0xff]  ;;  %v5674_v39 = vld [vmem:[#allocation52_spill] sm:$0xff] }
 0x664   :  { %v4379_v60 = vpop.permute.xlu1 %1261  ;;  %v4381_v38 = vpop.permute.xlu0 %1259  ;;  %v901_v61 = vsel %vm386_vm7, %v5660_v45, %v900_v14  ;;  %v947_v44 = vsel %vm85_vm0, %v942_v16, %v943_v29  ;;  %v1035_v32 = vrot.slane %v5669_v63, 4  ;;  %v1034_v1 = vrot.slane %v5670_v7, 4 }
 0x665   :  { %v1037_v2 = vrot.slane %v5671_v0, 4  ;;  %v1036_v18 = vrot.slane %v5672_v31, 4  ;;  %v946_v21 = vsel %vm945_vm14, %v5662_v19, %v944_v3  ;;  %v1082_v57 = vrot.slane %v5673_v55, 4 }
 0x666   :  { %v1081_v58 = vrot.slane %v5674_v39, 4  ;;  %v991_v45 = vsel %vm85_vm0, %v987_v36, %v988_v48  ;;  %v994_v59 = vsel %vm85_vm0, %v989_v15, %v990_v13  ;;  %v1084_v51 = vrot.slane %v5675_v50, 4 }
 0x667   :  { %v1083_v20 = vrot.slane %v5676_v24, 4  ;;  %v906_v29 = vadd.f32 %v899_v9, %v813_v23  ;;  %v909_v19 = vadd.f32 %v5659_v22, %v816_v56  ;;  %v908_v16 = vadd.f32 %v901_v61, %v815_v25 }
 0x668   :  { %v4407_v41 = vpop.permute.xlu1 %1265  ;;  %v4409_v28 = vpop.permute.xlu0 %1263  ;;  %v948_v30 = vsel %vm945_vm14, %v5664_v26, %v947_v44  ;;  %v954_v14 = vadd.f32 %v5661_v10, %v861_v54  ;;  %vm1039_vm1 = vcmask 547840   ;;  %v1038_v3 = vsel %vm85_vm0, %v1034_v1, %v1035_v32 }
 0x669   :  { %v1041_v48 = vsel %vm85_vm0, %v1036_v18, %v1037_v2  ;;  %v953_v36 = vadd.f32 %v946_v21, %v860_v37  ;;  %v993_v13 = vsel %vm992_vm15, %v5666_v62, %v991_v45  ;;  %v995_v23 = vsel %vm992_vm15, %v5668_v17, %v994_v59 }
 0x66a   :  { %v1085_v22 = vsel %vm85_vm0, %v1081_v58, %v1082_v57  ;;  %v956_v56 = vadd.f32 %v5663_v47, %v863_v5  ;;  %v955_v25 = vadd.f32 %v948_v30, %v862_v33  ;;  %v1001_v26 = vadd.f32 %v5665_v42, %v954_v14  ;;  %v5677_v30 = vld [vmem:[#allocation5_spill] sm:$0xff] }
 0x66b   :  { %v1087_v10 = vsel %vm85_vm0, %v1083_v20, %v1084_v51  ;;  %v1040_v54 = vsel %vm1039_vm1, %v5670_v7, %v1038_v3  ;;  %v1042_v15 = vsel %vm1039_vm1, %v5672_v31, %v1041_v48  ;;  %v1175_v37 = vrot.slane %v4282_v4, 4 }
 0x66c   :  { %v1174_v62 = vrot.slane %v4284_v12, 4  ;;  %v1000_v9 = vadd.f32 %v993_v13, %v953_v36  ;;  %v1003_v17 = vadd.f32 %v5667_v35, %v956_v56  ;;  %v1002_v61 = vadd.f32 %v995_v23, %v955_v25  ;;  %v4432_v5 = vpop.permute.xlu1 %1595  ;;  %v4434_v33 = vpop.permute.xlu0 %1305 }
 0x66d   :  { %v1086_v47 = vsel %vm619_vm10, %v5674_v39, %v1085_v22  ;;  %v1048_v42 = vadd.f32 %v5669_v63, %v1001_v26  ;;  %v1088_v44 = vsel %vm619_vm10, %v5676_v24, %v1087_v10  ;;  %v1268_v32 = vrot.slane %v4379_v60, 4 }
 0x66e   :  { %v1267_v7 = vrot.slane %v4381_v38, 4  ;;  %v1047_v1 = vadd.f32 %v1040_v54, %v1000_v9  ;;  %v1050_v35 = vadd.f32 %v5671_v0, %v1003_v17  ;;  %v4442_v2 = vadd.f32 %v1042_v15, %v1002_v61 }
 0x66f   :  { %v1094_v31 = vadd.f32 %v5673_v55, %v907_v40  ;;  %v1093_v18 = vadd.f32 %v1086_v47, %v906_v29  ;;  %v1128_v21 = vrot.slane %v4234_v49, 4  ;;  %v1127_v57 = vrot.slane %v4236_v43, 4 }
 0x670   :  { %v1178_v63 = vsel %vm85_vm0, %v1174_v62, %v1175_v37  ;;  %v1096_v39 = vadd.f32 %v5675_v50, %v909_v19  ;;  %v1095_v58 = vadd.f32 %v1088_v44, %v908_v16  ;;  %v1177_v45 = vrot.slane %v4300_v34, 4  ;;  %v4457_v50 = vpop.permute.xlu1 %1309  ;;  %v4459_v20 = vpop.permute.xlu0 %1307 }
 0x671   :  { %v1176_v59 = vrot.slane %v4302_v6, 4  ;;  %vm1132_vm2 = vcmask 539648   ;;  %v1271_v0 = vsel %vm85_vm0, %v1267_v7, %v1268_v32  ;;  %vm1600_vm4 = vcmask 171008  }
 0x672   :  { %v1179_v40 = vsel %vm666_vm11, %v4284_v12, %v1178_v63  ;;  %v1270_v55 = vrot.slane %v4407_v41, 4  ;;  %v1269_v51 = vrot.slane %v4409_v28, 4  ;;  %v1599_v24 = vrot.slane %v4432_v5, 4 }
 0x673   :  { %v1131_v29 = vsel %vm85_vm0, %v1127_v57, %v1128_v21  ;;  %v1130_v19 = vrot.slane %v4259_v27, 4  ;;  %v1129_v16 = vrot.slane %v4261_v53, 4  ;;  %v4465_v14 = vsub.s32 3, %v5677_v30 }
 0x674   :  { %v1180_v12 = vsel %vm85_vm0, %v1176_v59, %v1177_v45  ;;  %v1221_v3 = vrot.slane %v4325_v11, 4  ;;  %v1220_v48 = vrot.slane %v4327_v46, 4  ;;  %v1272_v36 = vsel %vm759_vm12, %v4381_v38, %v1271_v0  ;;  %v1598_v17 = vpop.permute.xlu1 %1597  ;;  %v4493_v61 = vpop.permute.xlu0 %1311 }
 0x675   :  { %v1186_v13 = vadd.f32 %v1179_v40, %v1093_v18  ;;  %v1223_v23 = vrot.slane %v4350_v8, 4  ;;  %v1222_v22 = vrot.slane %v4352_v52, 4  ;;  %v4475_v56 = vsub.s32 4, %v5677_v30 }
 0x676   :  { %v1133_v25 = vsel %vm1132_vm2, %v4236_v43, %v1131_v29  ;;  %v1273_v26 = vsel %vm85_vm0, %v1269_v51, %v1270_v55  ;;  %v1601_v10 = vsel %vm1600_vm4, %v1599_v24, %v4432_v5  ;;  %v4483_v54 = vsub.s32 5, %v5677_v30 }
 0x677   :  { %v1134_v38 = vsel %vm85_vm0, %v1129_v16, %v1130_v19  ;;  %v1181_v15 = vsel %vm666_vm11, %v4302_v6, %v1180_v12  ;;  %v1279_v37 = vadd.f32 %v1272_v36, %v1186_v13  ;;  %v4489_v62 = vsub.s32 6, %v5677_v30  ;;  %v5678_v19 = vld [vmem:[#allocation55_spill] sm:$0xff]  ;;  %v5679_v12 = vld [vmem:[#allocation56_spill] sm:$0xff] }
 0x678   :  { %v1141_v9 = vadd.f32 %v4234_v49, %v1048_v42  ;;  %v1224_v43 = vsel %vm85_vm0, %v1220_v48, %v1221_v3  ;;  %vm1318_vm5 = vcmask 523264   ;;  %v4496_v47 = vsub.s32 7, %v5677_v30  ;;  %v5680_v48 = vld [vmem:[#allocation58_spill] sm:$0xff] }
 0x679   :  { %v1140_v5 = vadd.f32 %v1133_v25, %v1047_v1  ;;  %v1227_v44 = vsel %vm85_vm0, %v1222_v22, %v1223_v23  ;;  %v1274_v6 = vsel %vm759_vm12, %v4409_v28, %v1273_v26  ;;  %v4501_v32 = vmul.f32 %v1601_v10, %v1279_v37 }
 0x67a   :  { %v1135_v49 = vsel %vm1132_vm2, %v4261_v53, %v1134_v38  ;;  %v1187_v42 = vadd.f32 %v4282_v4, %v1094_v31  ;;  %v1188_v7 = vadd.f32 %v1181_v15, %v1095_v58  ;;  %v1314_v18 = vrot.slane %v4459_v20, 4 }
 0x67b   :  { %v1143_v21 = vadd.f32 %v4259_v27, %v1050_v35  ;;  %v1189_v57 = vadd.f32 %v4300_v34, %v1096_v39  ;;  %v1226_v1 = vsel %vm1225_vm3, %v4327_v46, %v1224_v43  ;;  %v1602_v63 = vsel %vm1600_vm4, %v1599_v24, %v1598_v17 }
 0x67c   :  { %v1228_v28 = vsel %vm1225_vm3, %v4352_v52, %v1227_v44  ;;  %v1280_v45 = vadd.f32 %v4379_v60, %v1187_v42  ;;  %v1281_v53 = vadd.f32 %v1274_v6, %v1188_v7  ;;  %v1313_v4 = vrot.slane %v4434_v33, 4 }
 0x67d   :  { %v1142_v27 = vadd.f32 %v1135_v49, %v4442_v2  ;;  %v1234_v34 = vadd.f32 %v4325_v11, %v1141_v9  ;;  %v1282_v46 = vadd.f32 %v4407_v41, %v1189_v57  ;;  %v1629_v35 = vrot.slane %v4501_v32, %v4475_v56 }
 0x67e   :  { %v1317_v52 = vsel %vm85_vm0, %v1313_v4, %v1314_v18  ;;  %v4526_v39 = vmul.f32 %v1602_v63, %v1280_v45  ;;  %v1696_v60 = vrot.slane %v4501_v32, %v4483_v54  ;;  %v1769_v59 = vrot.slane %v4501_v32, %v4489_v62 }
 0x67f   :  { %v4532_v0 = vadd.f32 %v1226_v1, %v1140_v5  ;;  %v4535_v2 = vadd.f32 %v4350_v8, %v1143_v21  ;;  %v4537_v11 = vadd.f32 %v1228_v28, %v1142_v27  ;;  %v4539_v41 = vmul.f32 %v1602_v63, %v1282_v46 }
 0x680   :  { %v4541_v40 = vmul.f32 %v1601_v10, %v1281_v53  ;;  %v1315_v55 = vrot.slane %v4457_v50, 4  ;;  %v1842_v29 = vrot.slane %v4501_v32, %v4496_v47  ;;  %v1625_v16 = vrot.slane %v4501_v32, %v5678_v19 }
 0x681   :  { %v4553_v8 = vadd.f32 %v4459_v20, %v1234_v34  ;;  %v4557_v30 = vsel %vm1318_vm5, %v4434_v33, %v1317_v52  ;;  %v1692_v3 = vrot.slane %v4501_v32, %v5679_v12  ;;  %v1765_v36 = vrot.slane %v4501_v32, %v5680_v48 }
 0x682   :  { %v1633_v13 = vrot.slane %v4526_v39, %v5678_v19  ;;  %v1659_v23 = vrot.slane %v1629_v35, %v5678_v19  ;;  %v1726_v22 = vrot.slane %v1696_v60, %v5679_v12  ;;  %v1799_v20 = vrot.slane %v1769_v59, %v5680_v48 }
 0x683   :  { %v1645_v25 = vrot.slane %v4539_v41, %v5678_v19  ;;  %v1700_v33 = vrot.slane %v4526_v39, %v5679_v12  ;;  %v1712_v26 = vrot.slane %v4539_v41, %v5679_v12  ;;  %v1773_v10 = vrot.slane %v4526_v39, %v5680_v48 }
 0x684   :  { %v1785_v38 = vrot.slane %v4539_v41, %v5680_v48  ;;  %v1316_v15 = vrot.slane %v4493_v61, 4  ;;  %v1872_v43 = vrot.slane %v1842_v29, %v4465_v14  ;;  %v1655_v17 = vrot.slane %v1625_v16, %v5678_v19 }
 0x685   :  { %v4516_v31 = vpop.permute.xlu1 %1745  ;;  %v4518_v58 = vpop.permute.xlu0 %1678  ;;  %v1722_v5 = vrot.slane %v1692_v3, %v5679_v12  ;;  %v1795_v44 = vrot.slane %v1765_v36, %v5680_v48  ;;  %v1637_v6 = vrot.slane %v4541_v40, %v5678_v19  ;;  %v1704_v49 = vrot.slane %v4541_v40, %v5679_v12 }
 0x686   :  { %v1663_v42 = vrot.slane %v1633_v13, %v5678_v19  ;;  %v1846_v7 = vrot.slane %v4526_v39, %v4465_v14  ;;  %v1838_v21 = vrot.slane %v4501_v32, %v4465_v14  ;;  %v1675_v57 = vrot.slane %v1645_v25, %v5678_v19 }
 0x687   :  { %v1730_v1 = vrot.slane %v1700_v33, %v5679_v12  ;;  %v1742_v63 = vrot.slane %v1712_v26, %v5679_v12  ;;  %v1803_v28 = vrot.slane %v1773_v10, %v5680_v48  ;;  %v1815_v45 = vrot.slane %v1785_v38, %v5680_v48 }
 0x688   :  { %v1777_v27 = vrot.slane %v4541_v40, %v5680_v48  ;;  %v1850_v32 = vrot.slane %v4541_v40, %v4465_v14  ;;  %v1641_v34 = vrot.slane %v4541_v40, %v4475_v56  ;;  %v1667_v46 = vrot.slane %v1637_v6, %v5678_v19 }
 0x689   :  { %v4544_v51 = vpop.permute.xlu1 %1358  ;;  %v4546_v24 = vpop.permute.xlu0 %1356  ;;  %v1734_v35 = vrot.slane %v1704_v49, %v5679_v12  ;;  %v1708_v52 = vrot.slane %v4541_v40, %v4483_v54  ;;  %v1781_v39 = vrot.slane %v4541_v40, %v4489_v62  ;;  %v1682_v60 = vmul.f32 %v4518_v58, %v1659_v23 }
 0x68a   :  { %v1749_v59 = vmul.f32 %v4516_v31, %v1726_v22  ;;  %v1681_v29 = vmul.f32 %v4518_v58, %v1655_v17  ;;  %v1748_v16 = vmul.f32 %v4516_v31, %v1722_v5  ;;  %v1684_v3 = vmul.f32 %v4518_v58, %v1667_v46 }
 0x68b   :  { %v1751_v36 = vmul.f32 %v4516_v31, %v1734_v35  ;;  %v1683_v13 = vmul.f32 %v4518_v58, %v1663_v42  ;;  %v1750_v25 = vmul.f32 %v4516_v31, %v1730_v1  ;;  %v1868_v23 = vrot.slane %v1838_v21, %v4465_v14 }
 0x68c   :  { %v1807_v22 = vrot.slane %v1777_v27, %v5680_v48  ;;  %v1880_v10 = vrot.slane %v1850_v32, %v4465_v14  ;;  %v1876_v38 = vrot.slane %v1846_v7, %v4465_v14  ;;  %vm1369_vm7 = vcmask 392192  }
 0x68d   :  { %v4579_v37 = vpop.permute.xlu1 %1362  ;;  %v4581_v9 = vpop.permute.xlu0 %1360  ;;  %v1671_v6 = vrot.slane %v1641_v34, %v5678_v19  ;;  %v1854_v49 = vrot.slane %v4541_v40, %v4496_v47  ;;  %v1755_v42 = vadd.f32 %v1749_v59, %v1682_v60  ;;  %v1754_v1 = vadd.f32 %v1748_v16, %v1681_v29 }
 0x68e   :  { %v1738_v21 = vrot.slane %v1708_v52, %v5679_v12  ;;  %v1811_v27 = vrot.slane %v1781_v39, %v5680_v48  ;;  %v1757_v46 = vadd.f32 %v1751_v36, %v1684_v3  ;;  %v1756_v32 = vadd.f32 %v1750_v25, %v1683_v13 }
 0x68f   :  { %v1686_v7 = vmul.f32 %v4518_v58, %v1675_v57  ;;  %v1753_v35 = vmul.f32 %v4516_v31, %v1742_v63  ;;  %v1685_v40 = vmul.f32 %v4518_v58, %v1671_v6  ;;  %v1365_v16 = vrot.slane %v4544_v51, 4 }
 0x690   :  { %v1752_v60 = vmul.f32 %v4516_v31, %v1738_v21  ;;  %v1364_v57 = vrot.slane %v4546_v24, 4  ;;  %v1367_v63 = vrot.slane %v4579_v37, 4  ;;  %v1366_v3 = vrot.slane %v4581_v9, 4 }
 0x691   :  { %v4603_v53 = vpop.permute.xlu1 %1405  ;;  %v4605_v4 = vpop.permute.xlu0 %1818  ;;  %v1320_v31 = vsel %vm85_vm0, %v1315_v55, %v1316_v15  ;;  %vm1418_vm8 = vcmask 384000   ;;  %vm1467_vm9 = vcmask 375808   ;;  %vm1516_vm10 = vcmask 367616  }
 0x692   :  { %v1822_v17 = vmul.f32 %v4605_v4, %v1799_v20  ;;  %v1821_v5 = vmul.f32 %v4605_v4, %v1795_v44  ;;  %v1824_v44 = vmul.f32 %v4605_v4, %v1807_v22  ;;  %v1823_v34 = vmul.f32 %v4605_v4, %v1803_v28 }
 0x693   :  { %v5681_v22 = vrot.slane %v4539_v41, %v4465_v14  ;;  %v1759_v41 = vadd.f32 %v1753_v35, %v1686_v7  ;;  %v1758_v6 = vadd.f32 %v1752_v60, %v1685_v40  ;;  %vm1565_vm11 = vcmask 359424  }
 0x694   :  { %v1828_v52 = vadd.f32 %v1822_v17, %v1755_v42  ;;  %v1827_v39 = vadd.f32 %v1821_v5, %v1754_v1  ;;  %v1830_v55 = vadd.f32 %v1824_v44, %v1757_v46  ;;  %v1829_v15 = vadd.f32 %v1823_v34, %v1756_v32 }
 0x695   :  { %v4627_v33 = vpop.permute.xlu1 %1409  ;;  %v4629_v26 = vpop.permute.xlu0 %1407  ;;  %v1888_v17 = vrot.slane %v5681_v22, %v4465_v14  ;;  %v1372_v5 = vsel %vm85_vm0, %v1366_v3, %v1367_v63  ;;  %v1371_v46 = vsel %vm1369_vm7, %v4544_v51, %v1365_v16 }
 0x696   :  { %v1373_v51 = vsel %vm1369_vm7, %v4581_v9, %v1372_v5 }
 0x699   :  { %v1892_v20 = vpop.permute.xlu1 %1891  ;;  %v4644_v18 = vpop.permute.xlu0 %1411 }
 0x69a   :  { %v1895_v59 = vmul.f32 %v1892_v20, %v1872_v43  ;;  %v1894_v29 = vmul.f32 %v1892_v20, %v1868_v23  ;;  %v1897_v28 = vmul.f32 %v1892_v20, %v1880_v10  ;;  %v1896_v58 = vmul.f32 %v1892_v20, %v1876_v38 }
 0x69b   :  { %v1826_v23 = vmul.f32 %v4605_v4, %v1815_v45  ;;  %v1884_v10 = vrot.slane %v1854_v49, %v4465_v14  ;;  %v1825_v38 = vmul.f32 %v4605_v4, %v1811_v27  ;;  %v1368_v45 = vsel %vm85_vm0, %v1364_v57, %v1365_v16 }
 0x69c   :  { %v4654_v36 = vadd.f32 %v1895_v59, %v1828_v52  ;;  %v4656_v13 = vadd.f32 %v1894_v29, %v1827_v39  ;;  %v4680_v42 = vadd.f32 %v1897_v28, %v1830_v55  ;;  %v4682_v49 = vadd.f32 %v1896_v58, %v1829_v15 }
 0x69d   :  { %v4663_v43 = vpop.permute.xlu1 %1456  ;;  %v4665_v25 = vpop.permute.xlu0 %1454  ;;  %v1899_v1 = vmul.f32 %v1892_v20, %v1888_v17  ;;  %v1898_v21 = vmul.f32 %v1892_v20, %v1884_v10  ;;  %v1329_v52 = vadd.f32 %v4493_v61, %v4535_v2  ;;  %v1321_v4 = vsel %vm1318_vm5, %v4457_v50, %v1320_v31 }
 0x69e   :  { %1914 = vrot.lane.b32.xlu1 %v4654_v36, %s3477_s28  ;;  %1912 = vrot.lane.b32.xlu0 %v4656_v13, %s3477_s28  ;;  %v1414_v27 = vrot.slane %v4629_v26, 4  ;;  %v1370_v35 = vsel %vm1369_vm7, %v4546_v24, %v1368_v45  ;;  %v1832_v61 = vadd.f32 %v1826_v23, %v1759_v41  ;;  %v1831_v2 = vadd.f32 %v1825_v38, %v1758_v6 }
 0x69f   :  { %v1374_v50 = vsel %vm1369_vm7, %v4579_v37, %v1367_v63  ;;  %v1413_v20 = vrot.slane %v4603_v53, 4  ;;  %v1416_v44 = vrot.slane %v4644_v18, 4  ;;  %v1463_v24 = vrot.slane %v4663_v43, 4 }
 0x6a0   :  { %v1462_v34 = vrot.slane %v4665_v25, 4  ;;  %v4709_v40 = vadd.f32 %v1899_v1, %v1832_v61  ;;  %v4711_v60 = vadd.f32 %v1898_v21, %v1831_v2  ;;  %v1326_v59 = vadd.f32 %v4557_v30, %v4532_v0 }
 0x6a1   :  { %v4691_v32 = vpop.permute.xlu1 %1460  ;;  %v4693_v7 = vpop.permute.xlu0 %1458  ;;  %v1328_v37 = vadd.f32 %v1321_v4, %v4537_v11  ;;  %v1415_v39 = vrot.slane %v4627_v33, 4  ;;  %v1417_v9 = vsel %vm85_vm0, %v1413_v20, %v1414_v27  ;;  %v1380_v57 = vadd.f32 %v1371_v46, %v4553_v8 }
 0x6a2   :  { %1918 = vrot.lane.b32.xlu1 %v4680_v42, %s3477_s28  ;;  %1916 = vrot.lane.b32.xlu0 %v4682_v49, %s3477_s28  ;;  %v1420_v63 = vsel %vm1418_vm8, %v4629_v26, %v1414_v27  ;;  %v1379_v0 = vadd.f32 %v1370_v35, %v1326_v59  ;;  %v1382_v11 = vadd.f32 %v1374_v50, %v1329_v52  ;;  %v1465_v10 = vrot.slane %v4691_v32, 4 }
 0x6a3   :  { %v1381_v30 = vadd.f32 %v1373_v51, %v1328_v37  ;;  %v1421_v58 = vsel %vm85_vm0, %v1415_v39, %v1416_v44  ;;  %v1419_v31 = vsel %vm1418_vm8, %v4603_v53, %v1417_v9  ;;  %v1466_v8 = vsel %vm85_vm0, %v1462_v34, %v1463_v24 }
 0x6a4   :  { %v1946_v26 = vmul.f32 %v4654_v36, %v4654_v36  ;;  %v1945_v23 = vmul.f32 %v4656_v13, %v4656_v13  ;;  %v1429_v22 = vadd.f32 %v1420_v63, %v1380_v57  ;;  %v1423_v17 = vsel %vm1418_vm8, %v4644_v18, %v1416_v44 }
 0x6a5   :  { %v1506_v29 = vpop.permute.xlu1 %1505  ;;  %v1504_v16 = vpop.permute.xlu0 %1503  ;;  %v1464_v55 = vrot.slane %v4693_v7, 4  ;;  %v1469_v53 = vsel %vm1467_vm9, %v4663_v43, %v1463_v24  ;;  %v1422_v45 = vsel %vm1418_vm8, %v4627_v33, %v1421_v58  ;;  %v1428_v18 = vadd.f32 %v1419_v31, %v1379_v0  ;;  %v5682_v31 = vld [vmem:[#allocation59_spill] sm:$0xff] }
 0x6a6   :  { %v1512_v3 = vrot.slane %v1506_v29, 4  ;;  %v1511_v28 = vrot.slane %v1504_v16, 4  ;;  %1922 = vrot.lane.b32.xlu1 %v4709_v40, %s3477_s28  ;;  %1920 = vrot.lane.b32.xlu0 %v4711_v60, %s3477_s28  ;;  %v1468_v41 = vsel %vm1467_vm9, %v4665_v25, %v1466_v8  ;;  %v1431_v21 = vadd.f32 %v1423_v17, %v1382_v11 }
 0x6a7   :  { %v1948_v43 = vmul.f32 %v4680_v42, %v4680_v42  ;;  %v1947_v33 = vmul.f32 %v4682_v49, %v4682_v49  ;;  %v1478_v46 = vadd.f32 %v1469_v53, %v1429_v22  ;;  %v1430_v4 = vadd.f32 %v1422_v45, %v1381_v30 }
 0x6a8   :  { %v1515_v5 = vsel %vm85_vm0, %v1511_v28, %v1512_v3  ;;  %v1518_v52 = vsel %vm1516_vm10, %v1506_v29, %v1512_v3  ;;  %v1470_v27 = vsel %vm85_vm0, %v1464_v55, %v1465_v10  ;;  %v1477_v25 = vadd.f32 %v1468_v41, %v1428_v18 }
 0x6a9   :  { %v1510_v15 = vpop.permute.xlu1 %1509  ;;  %v1508_v38 = vpop.permute.xlu0 %1507  ;;  %v1517_v35 = vsel %vm1516_vm10, %v1504_v16, %v1515_v5  ;;  %v1472_v50 = vsel %vm1467_vm9, %v4691_v32, %v1465_v10  ;;  %v1527_v44 = vadd.f32 %v1518_v52, %v1478_v46  ;;  %v1950_v34 = vmul.f32 %v4709_v40, %v4709_v40 }
 0x6aa   :  { %1959 = vrot.lane.b32.xlu1 %v1946_v26, %s3477_s28  ;;  %1957 = vrot.lane.b32.xlu0 %v1945_v23, %s3477_s28  ;;  %v1514_v6 = vrot.slane %v1510_v15, 4  ;;  %v1513_v1 = vrot.slane %v1508_v38, 4  ;;  %v1949_v59 = vmul.f32 %v4711_v60, %v4711_v60  ;;  %v1471_v37 = vsel %vm1467_vm9, %v4693_v7, %v1470_v27  ;;  %v5683_v23 = vld [vmem:[#allocation57_spill] sm:$0xff] }
 0x6ab   :  { %v1526_v39 = vadd.f32 %v1517_v35, %v1477_v25  ;;  %v1480_v29 = vadd.f32 %v1472_v50, %v1431_v21  ;;  %v1479_v7 = vadd.f32 %v1471_v37, %v1430_v4 }
 0x6ac   :  { %v1519_v24 = vsel %vm85_vm0, %v1513_v1, %v1514_v6  ;;  %v1521_v16 = vsel %vm1516_vm10, %v1510_v15, %v1514_v6 }
 0x6ad   :  { %v1555_v61 = vpop.permute.xlu1 %1554  ;;  %v1553_v2 = vpop.permute.xlu0 %1552  ;;  %v1520_v0 = vsel %vm1516_vm10, %v1508_v38, %v1519_v24  ;;  %v1529_v26 = vadd.f32 %v1521_v16, %v1480_v29 }
 0x6ae   :  { %v1561_v51 = vrot.slane %v1555_v61, 4  ;;  %v1560_v20 = vrot.slane %v1553_v2, 4  ;;  %1963 = vrot.lane.b32.xlu1 %v1948_v43, %s3477_s28  ;;  %1961 = vrot.lane.b32.xlu0 %v1947_v33, %s3477_s28  ;;  %v1528_v55 = vadd.f32 %v1520_v0, %v1479_v7 }
 0x6b0   :  { %v1567_v32 = vsel %vm1565_vm11, %v1555_v61, %v1561_v51  ;;  %v1564_v9 = vsel %vm85_vm0, %v1560_v20, %v1561_v51 }
 0x6b1   :  { %v1576_v57 = vadd.f32 %v1567_v32, %v1527_v44  ;;  %v1566_v63 = vsel %vm1565_vm11, %v1553_v2, %v1564_v9  ;;  %v1559_v3 = vpop.permute.xlu1 %1558  ;;  %v1557_v28 = vpop.permute.xlu0 %1556 }
 0x6b2   :  { %v1575_v11 = vadd.f32 %v1566_v63, %v1526_v39  ;;  %v1563_v30 = vrot.slane %v1559_v3, 4  ;;  %v1562_v58 = vrot.slane %v1557_v28, 4  ;;  %1967 = vrot.lane.b32.xlu1 %v1950_v34, %s3477_s28  ;;  %1965 = vrot.lane.b32.xlu0 %v1949_v59, %s3477_s28 }
 0x6b3   :  { %v4772_v8 = vmul.f32 %v5682_v31, %v1576_v57 }
 0x6b4   :  { %v4775_v22 = vmul.f32 %v5683_v23, %v1575_v11  ;;  %v1570_v17 = vsel %vm1565_vm11, %v1559_v3, %v1563_v30  ;;  %v1568_v10 = vsel %vm85_vm0, %v1562_v58, %v1563_v30 }
 0x6b5   :  { %v2384_v15 = vrot.slane %v4772_v8, %v5678_v19  ;;  %v2451_v38 = vrot.slane %v4772_v8, %v5679_v12  ;;  %v2524_v53 = vrot.slane %v4772_v8, %v5680_v48  ;;  %v1578_v45 = vadd.f32 %v1570_v17, %v1529_v26  ;;  %v2497_v46 = vpop.permute.xlu1 %2496  ;;  %v2430_v39 = vpop.permute.xlu0 %2429 }
 0x6b6   :  { %v1569_v5 = vsel %vm1565_vm11, %v1557_v28, %v1568_v10  ;;  %v2443_v18 = vrot.slane %v4775_v22, %v5679_v12  ;;  %v2447_v41 = vrot.slane %v4775_v22, %v4483_v54  ;;  %v2597_v6 = vrot.slane %v4772_v8, %v4465_v14 }
 0x6b7   :  { %v1577_v1 = vadd.f32 %v1569_v5, %v1528_v55  ;;  %v2481_v21 = vrot.slane %v2451_v38, %v5679_v12  ;;  %v2376_v52 = vrot.slane %v4775_v22, %v5678_v19  ;;  %v2414_v43 = vrot.slane %v2384_v15, %v5678_v19 }
 0x6b8   :  { %v4797_v33 = vmul.f32 %v5682_v31, %v1578_v45  ;;  %v2473_v4 = vrot.slane %v2443_v18, %v5679_v12  ;;  %v2477_v27 = vrot.slane %v2447_v41, %v5679_v12  ;;  %v2380_v2 = vrot.slane %v4775_v22, %v4475_v56 }
 0x6b9   :  { %v1612_v35 = vmul.f32 %v5683_v23, %v1577_v1  ;;  %v2501_v61 = vmul.f32 %v2497_v46, %v2481_v21  ;;  %v2406_v25 = vrot.slane %v2376_v52, %v5678_v19  ;;  %v2589_v44 = vrot.slane %v4775_v22, %v4465_v14  ;;  %v2643_v55 = vpop.permute.xlu1 %2642  ;;  %v2570_v1 = vpop.permute.xlu0 %2569 }
 0x6ba   :  { %v2396_v50 = vrot.slane %v4797_v33, %v5678_v19  ;;  %v2463_v51 = vrot.slane %v4797_v33, %v5679_v12  ;;  %v2536_v20 = vrot.slane %v4797_v33, %v5680_v48  ;;  %v2609_v24 = vrot.slane %v4797_v33, %v4465_v14 }
 0x6bb   :  { %v2455_v34 = vrot.slane %v1612_v35, %v5679_v12  ;;  %v2459_v59 = vrot.slane %v1612_v35, %v4483_v54  ;;  %v2499_v37 = vmul.f32 %v2497_v46, %v2473_v4  ;;  %v2500_v9 = vmul.f32 %v2497_v46, %v2477_v27 }
 0x6bc   :  { %v2493_v32 = vrot.slane %v2463_v51, %v5679_v12  ;;  %v2388_v29 = vrot.slane %v1612_v35, %v5678_v19  ;;  %v2392_v16 = vrot.slane %v1612_v35, %v4475_v56  ;;  %v2426_v57 = vrot.slane %v2396_v50, %v5678_v19 }
 0x6bd   :  { %v2485_v63 = vrot.slane %v2455_v34, %v5679_v12  ;;  %v2489_v3 = vrot.slane %v2459_v59, %v5679_v12  ;;  %v2410_v28 = vrot.slane %v2380_v2, %v5678_v19  ;;  %v2432_v30 = vmul.f32 %v2430_v39, %v2406_v25 }
 0x6be   :  { %v2418_v0 = vrot.slane %v2388_v29, %v5678_v19  ;;  %v2422_v11 = vrot.slane %v2392_v16, %v5678_v19  ;;  %v2593_v58 = vrot.slane %v4775_v22, %v4496_v47  ;;  %v2504_v26 = vmul.f32 %v2497_v46, %v2493_v32 }
 0x6bf   :  { %v2502_v7 = vmul.f32 %v2497_v46, %v2485_v63  ;;  %v2503_v31 = vmul.f32 %v2497_v46, %v2489_v3  ;;  %v2601_v23 = vrot.slane %v1612_v35, %v4465_v14  ;;  %v2433_v17 = vmul.f32 %v2430_v39, %v2410_v28 }
 0x6c0   :  { %v2435_v10 = vmul.f32 %v2430_v39, %v2418_v0  ;;  %v2605_v15 = vrot.slane %v1612_v35, %v4496_v47  ;;  %v2619_v38 = vrot.slane %v2589_v44, %v4465_v14  ;;  %v2623_v45 = vrot.slane %v2593_v58, %v4465_v14 }
 0x6c1   :  { %v2631_v5 = vrot.slane %v2601_v23, %v4465_v14  ;;  %v2528_v18 = vrot.slane %v1612_v35, %v5680_v48  ;;  %v2532_v41 = vrot.slane %v1612_v35, %v4489_v62  ;;  %v2436_v21 = vmul.f32 %v2430_v39, %v2422_v11 }
 0x6c2   :  { %v2635_v52 = vrot.slane %v2605_v15, %v4465_v14  ;;  %v2554_v33 = vrot.slane %v2524_v53, %v5680_v48  ;;  %v2566_v46 = vrot.slane %v2536_v20, %v5680_v48  ;;  %v2645_v4 = vmul.f32 %v2643_v55, %v2619_v38 }
 0x6c3   :  { %v2646_v27 = vmul.f32 %v2643_v55, %v2623_v45  ;;  %v2558_v2 = vrot.slane %v2528_v18, %v5680_v48  ;;  %v2562_v25 = vrot.slane %v2532_v41, %v5680_v48  ;;  %v2648_v50 = vmul.f32 %v2643_v55, %v2631_v5 }
 0x6c4   :  { %v2516_v51 = vrot.slane %v4775_v22, %v5680_v48  ;;  %v2520_v35 = vrot.slane %v4775_v22, %v4489_v62  ;;  %v2574_v44 = vmul.f32 %v2570_v1, %v2554_v33  ;;  %v2577_v32 = vmul.f32 %v2570_v1, %v2566_v46 }
 0x6c5   :  { %v2575_v34 = vmul.f32 %v2570_v1, %v2558_v2  ;;  %v2576_v59 = vmul.f32 %v2570_v1, %v2562_v25  ;;  %v2434_v53 = vmul.f32 %v2430_v39, %v2414_v43  ;;  %v2505_v16 = vadd.f32 %v2499_v37, %v2432_v30 }
 0x6c6   :  { %v2546_v20 = vrot.slane %v2516_v51, %v5680_v48  ;;  %v2550_v29 = vrot.slane %v2520_v35, %v5680_v48  ;;  %v2506_v63 = vadd.f32 %v2500_v9, %v2433_v17  ;;  %v2627_v28 = vrot.slane %v2597_v6, %v4465_v14 }
 0x6c7   :  { %v2507_v3 = vadd.f32 %v2501_v61, %v2434_v53  ;;  %v2437_v0 = vmul.f32 %v2430_v39, %v2426_v57  ;;  %v2508_v11 = vadd.f32 %v2502_v7, %v2435_v10  ;;  %v2509_v23 = vadd.f32 %v2503_v31, %v2436_v21 }
 0x6c8   :  { %v2572_v22 = vmul.f32 %v2570_v1, %v2546_v20  ;;  %v2573_v58 = vmul.f32 %v2570_v1, %v2550_v29  ;;  %v2639_v15 = vrot.slane %v2609_v24, %v4465_v14  ;;  %v2647_v38 = vmul.f32 %v2643_v55, %v2627_v28 }
 0x6c9   :  { %v2580_v43 = vadd.f32 %v2574_v44, %v2507_v3  ;;  %v2510_v45 = vadd.f32 %v2504_v26, %v2437_v0  ;;  %v2581_v5 = vadd.f32 %v2575_v34, %v2508_v11  ;;  %v2649_v18 = vmul.f32 %v2643_v55, %v2635_v52 }
 0x6ca   :  { %v2578_v37 = vadd.f32 %v2572_v22, %v2505_v16  ;;  %v2579_v9 = vadd.f32 %v2573_v58, %v2506_v63  ;;  %v2582_v61 = vadd.f32 %v2576_v59, %v2509_v23  ;;  %v2650_v24 = vmul.f32 %v2643_v55, %v2639_v15 }
 0x6cb   :  { %v4851_v30 = vadd.f32 %v2647_v38, %v2580_v43  ;;  %v2583_v17 = vadd.f32 %v2577_v32, %v2510_v45  ;;  %v4853_v8 = vadd.f32 %v2648_v50, %v2581_v5 }
 0x6cc   :  { %v4855_v6 = vadd.f32 %v2645_v4, %v2578_v37  ;;  %v4857_v39 = vadd.f32 %v2646_v27, %v2579_v9  ;;  %v4859_v57 = vadd.f32 %v2649_v18, %v2582_v61 }
 0x6cd   :  { %v2658_v10 = vsel %vm1318_vm5, %v4851_v30, 0.0  ;;  %v2670_v41 = vmul.f32 %v4851_v30, %v4851_v30  ;;  %v4871_v1 = vadd.f32 %v2650_v24, %v2583_v17  ;;  %v2671_v55 = vmul.f32 %v4853_v8, %v4853_v8 }
 0x6ce   :  { %v2657_v7 = vadd.f32 %v4857_v39, %v4855_v6  ;;  %v2668_v31 = vmul.f32 %v4855_v6, %v4855_v6  ;;  %v2669_v26 = vmul.f32 %v4857_v39, %v4857_v39  ;;  %v2662_v33 = vadd.f32 %v4859_v57, %v4853_v8 }
 0x6cf   :  { %v2672_v46 = vmul.f32 %v4859_v57, %v4859_v57  ;;  %v2675_v4 = vsel %vm1318_vm5, %v2670_v41, 0.0  ;;  %v2663_v27 = vsel %vm1318_vm5, %v4871_v1, 0.0  ;;  %v2673_v2 = vmul.f32 %v4871_v1, %v4871_v1 }
 0x6d0   :  { %v2659_v21 = vadd.f32 %v2658_v10, %v2657_v7  ;;  %v2674_v52 = vadd.f32 %v2669_v26, %v2668_v31  ;;  %v2664_v50 = vadd.f32 %v2663_v27, %v2662_v33  ;;  %v3391_v33 = vld [vmem:[%s5508_s5 + $0x18] sm:$0xff]  ;;  %v3392_v27 = vld [vmem:[%s5508_s5 + $0x20] sm:$0xff] }
 0x6d1   :  { %v2679_v51 = vadd.f32 %v2672_v46, %v2671_v55  ;;  %v2680_v35 = vsel %vm1318_vm5, %v2673_v2, 0.0  ;;  %v3390_v46 = vld [vmem:[%s5508_s5 + $0x10] sm:$0xff]  ;;  %v3401_v2 = vld [vmem:[%s5508_s5 + $0x40] sm:$0xff] }
 0x6d2   :  { %2660 = vadd.xlane.f32.xlu0 %v2659_v21  ;;  %v2676_v25 = vadd.f32 %v2675_v4, %v2674_v52  ;;  %v2027_v21 = vld [vmem:[%s5508_s5] sm:$0xff]  ;;  %v3389_v52 = vld [vmem:[%s5508_s5 + $0x8] sm:$0xff] }
 0x6d3   :  { %v2681_v44 = vadd.f32 %v2680_v35, %v2679_v51  ;;  %v3393_v4 = vld [vmem:[%s5508_s5 + $0x28] sm:$0xff]  ;;  %v3405_v35 = vld [vmem:[%s5508_s5 + $0x60] sm:$0xff] }
 0x6d4   :  { %v3402_v51 = vld [vmem:[%s5508_s5 + $0x48] sm:$0xff] }
 0x6d6   :  { %2677 = vadd.xlane.f32.xlu0 %v2676_v25  ;;  %2665 = vadd.xlane.f32.xlu1 %v2664_v50  ;;  %v3394_v25 = vld [vmem:[%s5508_s5 + $0x30] sm:$0xff] }
 0x6d7   :  { %v3403_v50 = vld [vmem:[%s5508_s5 + $0x50] sm:$0xff] }
 0x6da   :  { %2682 = vadd.xlane.f32.xlu0 %v2681_v44  ;;  %v3404_v44 = vld [vmem:[%s5508_s5 + $0x58] sm:$0xff] }
 0x710   :  { %v1915_v34 = vpop.permute.xlu1 %1914  ;;  %v1913_v59 = vpop.permute.xlu0 %1912 }
 0x711   :  { %v1924_v20 = vsel %vm322_vm6, %v1913_v59, %v1915_v34  ;;  %v3406_v59 = vld [vmem:[%s5508_s5 + $0x68] sm:$0xff] }
 0x714   :  { %v1919_v32 = vpop.permute.xlu1 %1918  ;;  %v1917_v53 = vpop.permute.xlu0 %1916 }
 0x715   :  { %v1925_v29 = vsel %vm322_vm6, %v1915_v34, %v1917_v53  ;;  %v1935_v63 = vsel %vm1318_vm5, %v1917_v53, 0.0  ;;  %v3407_v34 = vld [vmem:[%s5508_s5 + $0x70] sm:$0xff]  ;;  %v3408_v53 = vld [vmem:[%s5508_s5 + $0x78] sm:$0xff] }
 0x716   :  { %v1934_v16 = vadd.f32 %v1925_v29, %v1924_v20  ;;  %v3409_v20 = vld [vmem:[%s5509_s6 + $0x20] sm:$0xff] }
 0x718   :  { %v1936_v3 = vadd.f32 %v1935_v63, %v1934_v16  ;;  %v1923_v28 = vpop.permute.xlu1 %1922  ;;  %v1921_v0 = vpop.permute.xlu0 %1920 }
 0x719   :  { %v1926_v11 = vsel %vm322_vm6, %v1919_v32, %v1921_v0  ;;  %v1927_v22 = vsel %vm322_vm6, %v1921_v0, %v1923_v28  ;;  %v1940_v23 = vsel %vm1318_vm5, %v1923_v28, 0.0  ;;  %v3395_v32 = vld [vmem:[%s5508_s5 + $0x38] sm:$0xff] }
 0x71a   :  { %v1939_v58 = vadd.f32 %v1927_v22, %v1926_v11  ;;  %1937 = vadd.xlane.f32.xlu1 %v1936_v3 }
 0x71c   :  { %v1960_v15 = vpop.permute.xlu1 %1959  ;;  %v1958_v43 = vpop.permute.xlu0 %1957  ;;  %v1941_v38 = vadd.f32 %v1940_v23, %v1939_v58 }
 0x71d   :  { %v1969_v18 = vsel %vm322_vm6, %v1958_v43, %v1960_v15  ;;  %v3396_v43 = vld [vmem:[%s5509_s6 + $0x10] sm:$0xff] }
 0x71e   :  { %1942 = vadd.xlane.f32.xlu0 %v1941_v38 }
 0x720   :  { %v1964_v45 = vpop.permute.xlu1 %1963  ;;  %v1962_v5 = vpop.permute.xlu0 %1961 }
 0x721   :  { %v1970_v37 = vsel %vm322_vm6, %v1960_v15, %v1962_v5  ;;  %v1980_v61 = vsel %vm1318_vm5, %v1962_v5, 0.0  ;;  %v3397_v5 = vld [vmem:[%s5509_s6 + $0x18] sm:$0xff] }
 0x722   :  { %v1979_v9 = vadd.f32 %v1970_v37, %v1969_v18 }
 0x724   :  { %v1981_v17 = vadd.f32 %v1980_v61, %v1979_v9  ;;  %v1968_v24 = vpop.permute.xlu1 %1967  ;;  %v1966_v7 = vpop.permute.xlu0 %1965 }
 0x725   :  { %v1971_v31 = vsel %vm322_vm6, %v1964_v45, %v1966_v7  ;;  %v1972_v26 = vsel %vm322_vm6, %v1966_v7, %v1968_v24  ;;  %v1985_v41 = vsel %vm1318_vm5, %v1968_v24, 0.0 }
 0x726   :  { %v1984_v10 = vadd.f32 %v1972_v26, %v1971_v31  ;;  %1982 = vadd.xlane.f32.xlu1 %v1981_v17 }
 0x728   :  { %v1986_v55 = vadd.f32 %v1985_v41, %v1984_v10 }
 0x72a   :  { %1987 = vadd.xlane.f32.xlu0 %v1986_v55 }
 0x737   :  { %2054 = vperm.xlu1 %3441, %v2027_v21  }
 0x73b   :  { %2091 = vperm.xlu1 %3441, %v3389_v52  }
 0x73f   :  { %2177 = vperm.xlu1 %3441, %v3391_v33   ;;  %v1614_v33 = vld [vmem:[%s5509_s6] sm:$0xff] }
 0x740   :  { %2134 = vperm.xlu0 %3440, %v3390_v46  }
 0x743   :  { %2263 = vperm.xlu1 %3441, %v3393_v4  }
 0x744   :  { %2220 = vperm.xlu0 %3440, %v3392_v27   ;;  %v3385_v27 = vld [vmem:[%s5509_s6 + $0x8] sm:$0xff]  ;;  %s3497_s6 = smov [#allocation2]  }
 0x747   :  { %2750 = vperm.xlu1 %3441, %v3401_v2  }
 0x748   :  { %2306 = vperm.xlu0 %3440, %v3394_v25  }
 0x74b   :  { %2892 = vperm.xlu1 %3441, %v3403_v50  }
 0x74c   :  { %2821 = vperm.xlu0 %3440, %v3402_v51  }
 0x74f   :  { %3034 = vperm.xlu1 %3441, %v3405_v35  }
 0x750   :  { %2963 = vperm.xlu0 %3440, %v3404_v44  }
 0x753   :  { %3176 = vperm.xlu1 %3441, %v3407_v34  }
 0x754   :  { %3105 = vperm.xlu0 %3440, %v3406_v59  }
 0x757   :  { %2349 = vperm.xlu1 %3441, %v3395_v32  }
 0x758   :  { %3247 = vperm.xlu0 %3440, %v3408_v53  }
 0x75c   :  { %3294 = vperm.xlu0 %3440, %v3409_v20  }
 0x75f   :  { %v2661_v29 = vpop.xlane.xlu0 %2660 }
 0x763   :  { %v2678_v16 = vpop.xlane.xlu0 %2677  ;;  %v2666_v63 = vpop.xlane.xlu1 %2665 }
 0x764   :  { %v2667_v3 = vadd.f32 %v2666_v63, %v2661_v29 }
 0x766   :  { %v2685_v28 = vmul.f32 0.001953125, %v2667_v3 }
 0x767   :  { %v2683_v0 = vpop.xlane.xlu0 %2682 }
 0x768   :  { %v2687_v11 = vmul.f32 %v2685_v28, %v2685_v28  ;;  %v2684_v22 = vadd.f32 %v2683_v0, %v2678_v16 }
 0x76a   :  { %v2686_v58 = vmul.f32 0.001953125, %v2684_v22 }
 0x76c   :  { %v2688_v23 = vsub.f32 %v2686_v58, %v2687_v11 }
 0x76e   :  { %v2689_v15 = vadd.f32 1e-05, %v2688_v23 }
 0x770   :  { %3442 = vrsqrt.f32 %v2689_v15 }
 0x77a   :  { %v3443_v38 = vpop.eup %3442 }
 0x77b   :  { %v2691_v45 = vmul.f32 %v3443_v38, %v3396_v43 }
 0x77d   :  { %2696 = vperm.xlu1 %3441, %v2691_v45   ;;  %v2692_v18 = vmul.f32 %v2691_v45, %v2685_v28 }
 0x77f   :  { %v2693_v37 = vsub.f32 %v3397_v5, %v2692_v18 }
 0x781   :  { %2707 = vperm.xlu0 %3440, %v2693_v37  }
 0x7a7   :  { %v1938_v61 = vpop.xlane.xlu1 %1937 }
 0x7ab   :  { %v1943_v9 = vpop.xlane.xlu0 %1942 }
 0x7ac   :  { %v1944_v17 = vadd.f32 %v1943_v9, %v1938_v61 }
 0x7ae   :  { %v1990_v24 = vmul.f32 0.001953125, %v1944_v17 }
 0x7b0   :  { %v1992_v10 = vmul.f32 %v1990_v24, %v1990_v24 }
 0x7b3   :  { %v1983_v7 = vpop.xlane.xlu1 %1982 }
 0x7b7   :  { %v1988_v31 = vpop.xlane.xlu0 %1987  ;;  %v4954_v52 = vpop.permute.xlu1 %2054 }
 0x7b8   :  { %v1989_v26 = vadd.f32 %v1988_v31, %v1983_v7 }
 0x7ba   :  { %v1991_v41 = vmul.f32 0.001953125, %v1989_v26 }
 0x7bb   :  { %v4962_v25 = vpop.permute.xlu1 %2091 }
 0x7bc   :  { %v1993_v55 = vsub.f32 %v1991_v41, %v1992_v10 }
 0x7be   :  { %v1994_v21 = vadd.f32 1e-05, %v1993_v55 }
 0x7bf   :  { %v4964_v51 = vpop.permute.xlu0 %2134  ;;  %v4966_v35 = vpop.permute.xlu1 %2177 }
 0x7c0   :  { %3444 = vrsqrt.f32 %v1994_v21 }
 0x7c3   :  { %v4968_v44 = vpop.permute.xlu0 %2220  ;;  %v4970_v34 = vpop.permute.xlu1 %2263 }
 0x7c7   :  { %v4972_v59 = vpop.permute.xlu0 %2306  ;;  %v2751_v32 = vpop.permute.xlu1 %2750 }
 0x7ca   :  { %v3445_v46 = vpop.eup %3444 }
 0x7cb   :  { %v1996_v4 = vmul.f32 %v3445_v46, %v1614_v33  ;;  %v2822_v53 = vpop.permute.xlu0 %2821  ;;  %v4974_v20 = vpop.permute.xlu1 %2892 }
 0x7cd   :  { %2001 = vperm.xlu1 %3441, %v1996_v4   ;;  %v1997_v2 = vmul.f32 %v1996_v4, %v1990_v24 }
 0x7cf   :  { %v1998_v50 = vsub.f32 %v3385_v27, %v1997_v2  ;;  %v4976_v29 = vpop.permute.xlu0 %2963  ;;  %v4978_v16 = vpop.permute.xlu1 %3034 }
 0x7d1   :  { %2012 = vperm.xlu0 %3440, %v1998_v50  }
 0x7d3   :  { %v4980_v63 = vpop.permute.xlu0 %3105  ;;  %v4982_v3 = vpop.permute.xlu1 %3176 }
 0x7d7   :  { %v4984_v28 = vpop.permute.xlu0 %3247  ;;  %v4986_v0 = vpop.permute.xlu1 %2349 }
 0x7db   :  { %v4988_v11 = vpop.permute.xlu0 %3294 }
 0x7fc   :  { %v2697_v22 = vpop.permute.xlu1 %2696 }
 0x7fd   :  { %v2699_v58 = vmul.f32 %v2697_v22, %v4855_v6  ;;  %v2700_v23 = vmul.f32 %v2697_v22, %v4857_v39  ;;  %v2701_v15 = vmul.f32 %v2697_v22, %v4851_v30  ;;  %v2702_v43 = vmul.f32 %v2697_v22, %v4853_v8 }
 0x7fe   :  { %v2703_v38 = vmul.f32 %v2697_v22, %v4859_v57  ;;  %v2704_v45 = vmul.f32 %v2697_v22, %v4871_v1 }
 0x800   :  { %v2708_v5 = vpop.permute.xlu0 %2707 }
 0x801   :  { %v2710_v18 = vadd.f32 %v2708_v5, %v2699_v58  ;;  %v2711_v37 = vadd.f32 %v2708_v5, %v2700_v23  ;;  %v2712_v9 = vadd.f32 %v2708_v5, %v2701_v15  ;;  %v2713_v61 = vadd.f32 %v2708_v5, %v2702_v43 }
 0x802   :  { %v2714_v17 = vadd.f32 %v2708_v5, %v2703_v38  ;;  %v2715_v24 = vadd.f32 %v2708_v5, %v2704_v45 }
 0x803   :  { %v4996_v7 = vmax.f32 %v2710_v18, 0.0  ;;  %v4998_v6 = vmax.f32 %v2711_v37, 0.0  ;;  %v5000_v39 = vmax.f32 %v2712_v9, 0.0  ;;  %v5002_v30 = vmax.f32 %v2713_v61, 0.0 }
 0x804   :  { %v5008_v1 = vmax.f32 %v2714_v17, 0.0  ;;  %v5010_v31 = vmax.f32 %v2715_v24, 0.0 }
 0x805   :  { %v2731_v8 = vrot.slane %v4998_v6, %v5678_v19  ;;  %v2727_v57 = vrot.slane %v4996_v7, %v5678_v19  ;;  %v2739_v41 = vrot.slane %v5002_v30, %v5678_v19  ;;  %v2735_v55 = vrot.slane %v5000_v39, %v5678_v19 }
 0x806   :  { %v2747_v46 = vrot.slane %v5010_v31, %v5678_v19  ;;  %v2743_v4 = vrot.slane %v5008_v1, %v5678_v19  ;;  %v2802_v50 = vrot.slane %v4998_v6, %v5679_v12  ;;  %v2798_v22 = vrot.slane %v4996_v7, %v5679_v12 }
 0x807   :  { %v2754_v26 = vmul.f32 %v2751_v32, %v2731_v8  ;;  %v2753_v10 = vmul.f32 %v2751_v32, %v2727_v57  ;;  %v2756_v21 = vmul.f32 %v2751_v32, %v2739_v41  ;;  %v2755_v33 = vmul.f32 %v2751_v32, %v2735_v55 }
 0x808   :  { %v2758_v27 = vmul.f32 %v2751_v32, %v2747_v46  ;;  %v2757_v2 = vmul.f32 %v2751_v32, %v2743_v4  ;;  %v2825_v58 = vmul.f32 %v2822_v53, %v2802_v50  ;;  %v2824_v23 = vmul.f32 %v2822_v53, %v2798_v22 }
 0x809   :  { %2767 = vrot.lane.b32.xlu1 %v2754_v26, %s3490_s7  ;;  %2765 = vrot.lane.b32.xlu0 %v2753_v10, %s3490_s7  ;;  %v2810_v15 = vrot.slane %v5002_v30, %v5679_v12  ;;  %v2806_v43 = vrot.slane %v5000_v39, %v5679_v12  ;;  %v2818_v45 = vrot.slane %v5010_v31, %v5679_v12 }
 0x80a   :  { %v2814_v5 = vrot.slane %v5008_v1, %v5679_v12  ;;  %v2873_v9 = vrot.slane %v4998_v6, %v5680_v48  ;;  %v2869_v61 = vrot.slane %v4996_v7, %v5680_v48  ;;  %v2881_v8 = vrot.slane %v5002_v30, %v5680_v48 }
 0x80b   :  { %v2827_v32 = vmul.f32 %v2822_v53, %v2810_v15  ;;  %v2826_v38 = vmul.f32 %v2822_v53, %v2806_v43  ;;  %v2829_v18 = vmul.f32 %v2822_v53, %v2818_v45  ;;  %v2889_v10 = vrot.slane %v5010_v31, %v5680_v48 }
 0x80c   :  { %v2828_v37 = vmul.f32 %v2822_v53, %v2814_v5  ;;  %v2896_v17 = vmul.f32 %v4974_v20, %v2873_v9  ;;  %v2895_v24 = vmul.f32 %v4974_v20, %v2869_v61  ;;  %v2877_v53 = vrot.slane %v5000_v39, %v5680_v48 }
 0x80d   :  { %2771 = vrot.lane.b32.xlu1 %v2756_v21, %s3490_s7  ;;  %2769 = vrot.lane.b32.xlu0 %v2755_v33, %s3490_s7  ;;  %v2898_v57 = vmul.f32 %v4974_v20, %v2881_v8  ;;  %v2885_v41 = vrot.slane %v5008_v1, %v5680_v48  ;;  %v2900_v55 = vmul.f32 %v4974_v20, %v2889_v10 }
 0x80e   :  { %v2897_v26 = vmul.f32 %v4974_v20, %v2877_v53  ;;  %v2944_v33 = vrot.slane %v4998_v6, %v4465_v14  ;;  %v2940_v46 = vrot.slane %v4996_v7, %v4465_v14  ;;  %v3031_v61 = vrot.slane %v5010_v31, %v4475_v56 }
 0x80f   :  { %v2899_v21 = vmul.f32 %v4974_v20, %v2885_v41  ;;  %v2948_v20 = vrot.slane %v5000_v39, %v4465_v14  ;;  %v3086_v53 = vrot.slane %v4998_v6, %v4483_v54  ;;  %v3094_v41 = vrot.slane %v5002_v30, %v4483_v54 }
 0x810   :  { %v2967_v4 = vmul.f32 %v4976_v29, %v2944_v33  ;;  %v3102_v33 = vrot.slane %v5010_v31, %v4483_v54 }
 0x811   :  { %2775 = vrot.lane.b32.xlu1 %v2758_v27, %s3490_s7  ;;  %2773 = vrot.lane.b32.xlu0 %v2757_v2, %s3490_s7  ;;  %v2966_v27 = vmul.f32 %v4976_v29, %v2940_v46  ;;  %v2952_v2 = vrot.slane %v5002_v30, %v4465_v14  ;;  %v2968_v22 = vmul.f32 %v4976_v29, %v2948_v20 }
 0x812   :  { %v3098_v46 = vrot.slane %v5008_v1, %v4483_v54  ;;  %v3157_v20 = vrot.slane %v4998_v6, %v4489_v62 }
 0x813   :  { %v2969_v50 = vmul.f32 %v4976_v29, %v2952_v2 }
 0x814   :  { %v3112_v2 = vmul.f32 %v4980_v63, %v3098_v46 }
 0x815   :  { %2838 = vrot.lane.b32.xlu1 %v2825_v58, %s3490_s7  ;;  %2836 = vrot.lane.b32.xlu0 %v2824_v23, %s3490_s7  ;;  %v2960_v58 = vrot.slane %v5010_v31, %v4465_v14  ;;  %v2956_v23 = vrot.slane %v5008_v1, %v4465_v14 }
 0x817   :  { %v2971_v15 = vmul.f32 %v4976_v29, %v2960_v58  ;;  %v2970_v43 = vmul.f32 %v4976_v29, %v2956_v23  ;;  %v3019_v29 = vrot.slane %v5000_v39, %v4475_v56  ;;  %v3180_v58 = vmul.f32 %v4982_v3, %v3157_v20 }
 0x818   :  { %v3165_v23 = vrot.slane %v5002_v30, %v4489_v62 }
 0x819   :  { %2842 = vrot.lane.b32.xlu1 %v2827_v32, %s3490_s7  ;;  %2840 = vrot.lane.b32.xlu0 %v2826_v38, %s3490_s7  ;;  %v3015_v32 = vrot.slane %v4998_v6, %v4475_v56  ;;  %v3011_v38 = vrot.slane %v4996_v7, %v4475_v56  ;;  %v3039_v9 = vmul.f32 %v4978_v16, %v3019_v29 }
 0x81b   :  { %v3038_v45 = vmul.f32 %v4978_v16, %v3015_v32  ;;  %v3037_v5 = vmul.f32 %v4978_v16, %v3011_v38  ;;  %v3173_v32 = vrot.slane %v5010_v31, %v4489_v62 }
 0x81d   :  { %2846 = vrot.lane.b32.xlu1 %v2829_v18, %s3490_s7  ;;  %2844 = vrot.lane.b32.xlu0 %v2828_v37, %s3490_s7  ;;  %v3023_v18 = vrot.slane %v5002_v30, %v4475_v56  ;;  %v3184_v29 = vmul.f32 %v4982_v3, %v3173_v32 }
 0x81f   :  { %v3040_v37 = vmul.f32 %v4978_v16, %v3023_v18 }
 0x821   :  { %2909 = vrot.lane.b32.xlu1 %v2896_v17, %s3490_s7  ;;  %2907 = vrot.lane.b32.xlu0 %v2895_v24, %s3490_s7  ;;  %v3027_v17 = vrot.slane %v5008_v1, %v4475_v56  ;;  %v3042_v24 = vmul.f32 %v4978_v16, %v3031_v61 }
 0x823   :  { %v3041_v8 = vmul.f32 %v4978_v16, %v3027_v17  ;;  %v3090_v16 = vrot.slane %v5000_v39, %v4483_v54 }
 0x825   :  { %2913 = vrot.lane.b32.xlu1 %v2898_v57, %s3490_s7  ;;  %2911 = vrot.lane.b32.xlu0 %v2897_v26, %s3490_s7  ;;  %v3082_v57 = vrot.slane %v4996_v7, %v4483_v54  ;;  %v3109_v26 = vmul.f32 %v4980_v63, %v3086_v53  ;;  %v3240_v53 = vrot.slane %v5008_v1, %v4496_v47 }
 0x827   :  { %v3108_v10 = vmul.f32 %v4980_v63, %v3082_v57 }
 0x829   :  { %2917 = vrot.lane.b32.xlu1 %v2900_v55, %s3490_s7  ;;  %2915 = vrot.lane.b32.xlu0 %v2899_v21, %s3490_s7  ;;  %v3111_v55 = vmul.f32 %v4980_v63, %v3094_v41  ;;  %v3110_v21 = vmul.f32 %v4980_v63, %v3090_v16 }
 0x82d   :  { %2980 = vrot.lane.b32.xlu1 %v2967_v4, %s3490_s7  ;;  %2978 = vrot.lane.b32.xlu0 %v2966_v27, %s3490_s7  ;;  %v3113_v4 = vmul.f32 %v4980_v63, %v3102_v33  ;;  %v3153_v27 = vrot.slane %v4996_v7, %v4489_v62 }
 0x831   :  { %2984 = vrot.lane.b32.xlu1 %v2969_v50, %s3490_s7  ;;  %2982 = vrot.lane.b32.xlu0 %v2968_v22, %s3490_s7  ;;  %v3179_v50 = vmul.f32 %v4982_v3, %v3153_v27  ;;  %v3161_v22 = vrot.slane %v5000_v39, %v4489_v62 }
 0x833   :  { %v3181_v63 = vmul.f32 %v4982_v3, %v3161_v22 }
 0x835   :  { %2988 = vrot.lane.b32.xlu1 %v2971_v15, %s3490_s7  ;;  %2986 = vrot.lane.b32.xlu0 %v2970_v43, %s3490_s7  ;;  %v3169_v15 = vrot.slane %v5008_v1, %v4489_v62  ;;  %v3182_v43 = vmul.f32 %v4982_v3, %v3165_v23  ;;  %v3254_v1 = vmul.f32 %v4984_v28, %v3240_v53 }
 0x839   :  { %3051 = vrot.lane.b32.xlu1 %v3038_v45, %s3490_s7  ;;  %3049 = vrot.lane.b32.xlu0 %v3037_v5, %s3490_s7  ;;  %v3183_v45 = vmul.f32 %v4982_v3, %v3169_v15  ;;  %v3224_v5 = vrot.slane %v4996_v7, %v4496_v47  ;;  %v3232_v7 = vrot.slane %v5000_v39, %v4496_v47 }
 0x83a   :  { %v3236_v3 = vrot.slane %v5002_v30, %v4496_v47 }
 0x83b   :  { %v3250_v17 = vmul.f32 %v4984_v28, %v3224_v5 }
 0x83c   :  { %v3253_v30 = vmul.f32 %v4984_v28, %v3236_v3 }
 0x83d   :  { %3055 = vrot.lane.b32.xlu1 %v3040_v37, %s3490_s7  ;;  %3053 = vrot.lane.b32.xlu0 %v3039_v9, %s3490_s7  ;;  %v3228_v37 = vrot.slane %v4998_v6, %v4496_v47 }
 0x841   :  { %3059 = vrot.lane.b32.xlu1 %v3042_v24, %s3490_s7  ;;  %3057 = vrot.lane.b32.xlu0 %v3041_v8, %s3490_s7  ;;  %v3251_v24 = vmul.f32 %v4984_v28, %v3228_v37  ;;  %v3252_v8 = vmul.f32 %v4984_v28, %v3232_v7 }
 0x845   :  { %3122 = vrot.lane.b32.xlu1 %v3109_v26, %s3490_s7  ;;  %3120 = vrot.lane.b32.xlu0 %v3108_v10, %s3490_s7  ;;  %v3244_v26 = vrot.slane %v5010_v31, %v4496_v47 }
 0x847   :  { %v3255_v31 = vmul.f32 %v4984_v28, %v3244_v26 }
 0x849   :  { %3126 = vrot.lane.b32.xlu1 %v3111_v55, %s3490_s7  ;;  %3124 = vrot.lane.b32.xlu0 %v3110_v21, %s3490_s7 }
 0x84c   :  { %v5159_v38 = vpop.permute.xlu1 %2001 }
 0x84d   :  { %3130 = vrot.lane.b32.xlu1 %v3113_v4, %s3490_s7  ;;  %3128 = vrot.lane.b32.xlu0 %v3112_v2, %s3490_s7  ;;  %v2005_v9 = vmul.f32 %v5159_v38, %v4654_v36  ;;  %v2006_v36 = vmul.f32 %v5159_v38, %v4682_v49  ;;  %v2009_v39 = vmul.f32 %v5159_v38, %v4709_v40 }
 0x84e   :  { %v2008_v10 = vmul.f32 %v5159_v38, %v4711_v60 }
 0x850   :  { %v5165_v18 = vpop.permute.xlu0 %2012 }
 0x851   :  { %3191 = vrot.lane.b32.xlu1 %v3179_v50, %s3490_s7  ;;  %3193 = vrot.lane.b32.xlu0 %v3180_v58, %s3490_s7  ;;  %v2016_v61 = vadd.f32 %v5165_v18, %v2005_v9  ;;  %v2017_v57 = vadd.f32 %v5165_v18, %v2006_v36  ;;  %v2020_v49 = vadd.f32 %v5165_v18, %v2009_v39 }
 0x852   :  { %v2019_v55 = vadd.f32 %v5165_v18, %v2008_v10 }
 0x853   :  { %v5185_v6 = vmax.f32 %v2016_v61, 0.0  ;;  %v5206_v16 = vmax.f32 %v2017_v57, 0.0  ;;  %v5211_v21 = vmax.f32 %v2020_v49, 0.0 }
 0x854   :  { %v5220_v27 = vmax.f32 %v2019_v55, 0.0 }
 0x855   :  { %3195 = vrot.lane.b32.xlu1 %v3181_v63, %s3490_s7  ;;  %3197 = vrot.lane.b32.xlu0 %v3182_v43, %s3490_s7  ;;  %v2035_v40 = vrot.slane %v5185_v6, %v5678_v19  ;;  %v2072_v41 = vrot.slane %v5185_v6, %v5679_v12  ;;  %v2039_v46 = vrot.slane %v5206_v16, %v5678_v19 }
 0x856   :  { %v2076_v4 = vrot.slane %v5206_v16, %v5679_v12  ;;  %v2115_v28 = vrot.slane %v5185_v6, %v5680_v48  ;;  %v2051_v2 = vrot.slane %v5211_v21, %v5678_v19  ;;  %v2088_v20 = vrot.slane %v5211_v21, %v5679_v12 }
 0x857   :  { %v2058_v60 = vmul.f32 %v4954_v52, %v2035_v40  ;;  %v2095_v33 = vmul.f32 %v4962_v25, %v2072_v41  ;;  %v2131_v22 = vrot.slane %v5211_v21, %v5680_v48  ;;  %v2059_v58 = vmul.f32 %v4954_v52, %v2039_v46 }
 0x858   :  { %v2096_v23 = vmul.f32 %v4962_v25, %v2076_v4  ;;  %v2062_v63 = vmul.f32 %v4954_v52, %v2051_v2  ;;  %v2099_v15 = vmul.f32 %v4962_v25, %v2088_v20  ;;  %v2158_v43 = vrot.slane %v5185_v6, %v4465_v14 }
 0x859   :  { %3199 = vrot.lane.b32.xlu1 %v3183_v45, %s3490_s7  ;;  %3201 = vrot.lane.b32.xlu0 %v3184_v29, %s3490_s7  ;;  %v2101_v50 = vadd.f32 %v2095_v33, %v2058_v60  ;;  %v2047_v32 = vrot.slane %v5220_v27, %v5678_v19  ;;  %v2084_v45 = vrot.slane %v5220_v27, %v5679_v12 }
 0x85a   :  { %v2138_v5 = vmul.f32 %v4964_v51, %v2115_v28  ;;  %v2105_v29 = vadd.f32 %v2099_v15, %v2062_v63  ;;  %v2142_v37 = vmul.f32 %v4964_v51, %v2131_v22  ;;  %v2174_v9 = vrot.slane %v5211_v21, %v4465_v14 }
 0x85b   :  { %v2119_v61 = vrot.slane %v5206_v16, %v5680_v48  ;;  %v2102_v7 = vadd.f32 %v2096_v23, %v2059_v58  ;;  %v2061_v3 = vmul.f32 %v4954_v52, %v2047_v32  ;;  %v2098_v36 = vmul.f32 %v4962_v25, %v2084_v45 }
 0x85c   :  { %v2217_v53 = vrot.slane %v5211_v21, %v4475_v56  ;;  %v2181_v39 = vmul.f32 %v4966_v35, %v2158_v43  ;;  %v2201_v57 = vrot.slane %v5185_v6, %v4475_v56  ;;  %v2162_v26 = vrot.slane %v5206_v16, %v4465_v14 }
 0x85d   :  { %3262 = vrot.lane.b32.xlu1 %v3250_v17, %s3490_s7  ;;  %3264 = vrot.lane.b32.xlu0 %v3251_v24, %s3490_s7  ;;  %v2144_v17 = vadd.f32 %v2138_v5, %v2101_v50  ;;  %v2148_v24 = vadd.f32 %v2142_v37, %v2105_v29  ;;  %v2127_v49 = vrot.slane %v5220_v27, %v5680_v48 }
 0x85e   :  { %v2104_v41 = vadd.f32 %v2098_v36, %v2061_v3  ;;  %v2260_v55 = vrot.slane %v5211_v21, %v4483_v54  ;;  %v2224_v60 = vmul.f32 %v4968_v44, %v2201_v57  ;;  %v2244_v33 = vrot.slane %v5185_v6, %v4483_v54 }
 0x85f   :  { %v2205_v46 = vrot.slane %v5206_v16, %v4475_v56  ;;  %v2182_v4 = vmul.f32 %v4966_v35, %v2162_v26  ;;  %v2141_v28 = vmul.f32 %v4964_v51, %v2127_v49  ;;  %v2170_v2 = vrot.slane %v5220_v27, %v4465_v14 }
 0x860   :  { %v2271_v23 = vmul.f32 %v4970_v34, %v2260_v55  ;;  %v2303_v63 = vrot.slane %v5211_v21, %v4489_v62  ;;  %v2267_v15 = vmul.f32 %v4970_v34, %v2244_v33  ;;  %v2287_v43 = vrot.slane %v5185_v6, %v4489_v62 }
 0x861   :  { %3266 = vrot.lane.b32.xlu1 %v3252_v8, %s3490_s7  ;;  %3268 = vrot.lane.b32.xlu0 %v3253_v30, %s3490_s7  ;;  %v2185_v8 = vmul.f32 %v4966_v35, %v2174_v9  ;;  %v2139_v30 = vmul.f32 %v4964_v51, %v2119_v61  ;;  %v2147_v58 = vadd.f32 %v2141_v28, %v2104_v41 }
 0x862   :  { %v2248_v32 = vrot.slane %v5206_v16, %v4483_v54  ;;  %v2225_v29 = vmul.f32 %v4968_v44, %v2205_v46  ;;  %v2184_v37 = vmul.f32 %v4966_v35, %v2170_v2  ;;  %v2213_v9 = vrot.slane %v5220_v27, %v4475_v56 }
 0x863   :  { %v2191_v10 = vadd.f32 %v2185_v8, %v2148_v24  ;;  %v2145_v40 = vadd.f32 %v2139_v30, %v2102_v7  ;;  %v2314_v36 = vmul.f32 %v4972_v59, %v2303_v63  ;;  %v2346_v8 = vrot.slane %v5211_v21, %v4496_v47 }
 0x864   :  { %v2190_v3 = vadd.f32 %v2184_v37, %v2147_v58  ;;  %v2291_v57 = vrot.slane %v5206_v16, %v4489_v62  ;;  %v2268_v26 = vmul.f32 %v4970_v34, %v2248_v32  ;;  %v2334_v33 = vrot.slane %v5206_v16, %v4496_v47 }
 0x865   :  { %3270 = vrot.lane.b32.xlu1 %v3254_v1, %s3490_s7  ;;  %3272 = vrot.lane.b32.xlu0 %v3255_v31, %s3490_s7  ;;  %v2187_v1 = vadd.f32 %v2181_v39, %v2144_v17  ;;  %v2228_v31 = vmul.f32 %v4968_v44, %v2217_v53  ;;  %v2188_v22 = vadd.f32 %v2182_v4, %v2145_v40  ;;  %s3342_s7 = sshll.u32 %s3497_s6, 4  ;;  %s3343_s7 = int_to_ptr.vmem [resolvable:$true] %s3342_s7 }
 0x866   :  { %v2310_v53 = vmul.f32 %v4972_v59, %v2287_v43  ;;  %v2330_v39 = vrot.slane %v5185_v6, %v4496_v47  ;;  %v2357_v6 = vmul.f32 %v4986_v0, %v2346_v8  ;;  %v2311_v46 = vmul.f32 %v4972_v59, %v2291_v57  ;;  %p3451_p1 = scmp.lt.s32.totalorder %s3343_s7, %s3343_s7 }
 0x867   :  { %v2234_v20 = vadd.f32 %v2228_v31, %v2191_v10  ;;  %v2230_v50 = vadd.f32 %v2224_v60, %v2187_v1  ;;  %v2231_v24 = vadd.f32 %v2225_v29, %v2188_v22  ;;  %v2227_v10 = vmul.f32 %v4968_v44, %v2213_v9 }
 0x868   :  { %v2256_v1 = vrot.slane %v5220_v27, %v4483_v54  ;;  %v2353_v60 = vmul.f32 %v4986_v0, %v2330_v39  ;;  %v2299_v2 = vrot.slane %v5220_v27, %v4489_v62  ;;  %v2354_v32 = vmul.f32 %v4986_v0, %v2334_v33 }
 0x869   :  { %v2277_v61 = vadd.f32 %v2271_v23, %v2234_v20  ;;  %v2273_v17 = vadd.f32 %v2267_v15, %v2230_v50  ;;  %v2274_v31 = vadd.f32 %v2268_v26, %v2231_v24  ;;  %v2233_v55 = vadd.f32 %v2227_v10, %v2190_v3 }
 0x86a   :  { %v2270_v28 = vmul.f32 %v4970_v34, %v2256_v1  ;;  %v2342_v29 = vrot.slane %v5220_v27, %v4496_v47 }
 0x86b   :  { %v2320_v40 = vadd.f32 %v2314_v36, %v2277_v61  ;;  %v2316_v41 = vadd.f32 %v2310_v53, %v2273_v17  ;;  %v2317_v63 = vadd.f32 %v2311_v46, %v2274_v31 }
 0x86c   :  { %v2276_v15 = vadd.f32 %v2270_v28, %v2233_v55 }
 0x86d   :  { %v2363_v20 = vadd.f32 %v2357_v6, %v2320_v40  ;;  %v2359_v23 = vadd.f32 %v2353_v60, %v2316_v41  ;;  %v2360_v17 = vadd.f32 %v2354_v32, %v2317_v63  ;;  %v2004_v6 = vmul.f32 %v5159_v38, %v4656_v13 }
 0x86f   :  { %v2015_v46 = vadd.f32 %v5165_v18, %v2004_v6 }
 0x87b   :  { %v2768_v45 = vpop.permute.xlu1 %2767  ;;  %v5279_v5 = vpop.permute.xlu0 %2765 }
 0x87c   :  { %v2777_v7 = vsel %vm1600_vm4, %v5279_v5, %v2768_v45 }
 0x87d   :  { %v2788_v16 = vadd.f32 %v2777_v7, %v2359_v23  ;;  %v2356_v7 = vmul.f32 %v4986_v0, %v2342_v29 }
 0x87f   :  { %v5295_v30 = vpop.permute.xlu1 %2771  ;;  %v2770_v49 = vpop.permute.xlu0 %2769 }
 0x880   :  { %v2778_v21 = vsel %vm1600_vm4, %v2768_v45, %v2770_v49  ;;  %v2313_v45 = vmul.f32 %v4972_v59, %v2299_v2 }
 0x881   :  { %v2789_v36 = vadd.f32 %v2778_v21, %v2360_v17 }
 0x882   :  { %v2319_v24 = vadd.f32 %v2313_v45, %v2276_v15 }
 0x883   :  { %v2776_v4 = vpop.permute.xlu1 %2775  ;;  %v2774_v50 = vpop.permute.xlu0 %2773 }
 0x884   :  { %v2779_v22 = vsel %vm1600_vm4, %v5295_v30, %v2774_v50  ;;  %v2780_v58 = vsel %vm1600_vm4, %v2774_v50, %v2776_v4  ;;  %v2362_v57 = vadd.f32 %v2356_v7, %v2319_v24  ;;  %v2007_v4 = vmul.f32 %v5159_v38, %v4680_v42 }
 0x885   :  { %v2792_v43 = vadd.f32 %v2780_v58, %v2363_v20  ;;  %v2021_v20 = vmax.f32 %v2015_v46, 0.0 }
 0x886   :  { %v2791_v26 = vadd.f32 %v2779_v22, %v2362_v57  ;;  %v2018_v50 = vadd.f32 %v5165_v18, %v2007_v4 }
 0x887   :  { %v2839_v37 = vpop.permute.xlu1 %2838  ;;  %v5317_v9 = vpop.permute.xlu0 %2836  ;;  %v2031_v13 = vrot.slane %v2021_v20, %v5678_v19  ;;  %v2068_v23 = vrot.slane %v2021_v20, %v5679_v12  ;;  %v2111_v32 = vrot.slane %v2021_v20, %v5680_v48  ;;  %v2240_v6 = vrot.slane %v2021_v20, %v4483_v54 }
 0x888   :  { %v2848_v61 = vsel %vm1600_vm4, %v5317_v9, %v2839_v37  ;;  %v2024_v63 = vmax.f32 %v2018_v50, 0.0 }
 0x889   :  { %v5321_v3 = vadd.f32 %v2848_v61, %v2788_v16  ;;  %v2057_v42 = vmul.f32 %v4954_v52, %v2031_v13  ;;  %v2094_v38 = vmul.f32 %v4962_v25, %v2068_v23  ;;  %v2137_v24 = vmul.f32 %v4964_v51, %v2111_v32 }
 0x88a   :  { %v2043_v16 = vrot.slane %v2024_v63, %v5678_v19  ;;  %v2080_v18 = vrot.slane %v2024_v63, %v5679_v12  ;;  %v2123_v7 = vrot.slane %v2024_v63, %v5680_v48  ;;  %v2209_v4 = vrot.slane %v2024_v63, %v4475_v56 }
 0x88b   :  { %v5324_v8 = vpop.permute.xlu1 %2842  ;;  %v2841_v53 = vpop.permute.xlu0 %2840 }
 0x88c   :  { %v2849_v39 = vsel %vm1600_vm4, %v2839_v37, %v2841_v53  ;;  %v2100_v37 = vadd.f32 %v2094_v38, %v2057_v42  ;;  %v2060_v61 = vmul.f32 %v4954_v52, %v2043_v16  ;;  %v2097_v17 = vmul.f32 %v4962_v25, %v2080_v18 }
 0x88d   :  { %v5327_v27 = vadd.f32 %v2849_v39, %v2789_v36  ;;  %v2154_v36 = vrot.slane %v2021_v20, %v4465_v14  ;;  %v2140_v52 = vmul.f32 %v4964_v51, %v2123_v7  ;;  %v2166_v25 = vrot.slane %v2024_v63, %v4465_v14 }
 0x88e   :  { %v2143_v53 = vadd.f32 %v2137_v24, %v2100_v37  ;;  %v2103_v39 = vadd.f32 %v2097_v17, %v2060_v61  ;;  %v2266_v14 = vmul.f32 %v4970_v34, %v2240_v6  ;;  %v2283_v42 = vrot.slane %v2021_v20, %v4489_v62 }
 0x88f   :  { %v2847_v49 = vpop.permute.xlu1 %2846  ;;  %v2845_v10 = vpop.permute.xlu0 %2844  ;;  %v2180_v57 = vmul.f32 %v4966_v35, %v2154_v36  ;;  %v2183_v46 = vmul.f32 %v4966_v35, %v2166_v25  ;;  %v2226_v38 = vmul.f32 %v4968_v44, %v2209_v4  ;;  %v2252_v16 = vrot.slane %v2024_v63, %v4483_v54 }
 0x890   :  { %v2850_v1 = vsel %vm1600_vm4, %v5324_v8, %v2845_v10  ;;  %v2851_v40 = vsel %vm1600_vm4, %v2845_v10, %v2847_v49  ;;  %v2326_v61 = vrot.slane %v2021_v20, %v4496_v47  ;;  %v2295_v24 = vrot.slane %v2024_v63, %v4489_v62 }
 0x891   :  { %v5332_v41 = vadd.f32 %v2850_v1, %v2791_v26  ;;  %v5334_v21 = vadd.f32 %v2851_v40, %v2792_v43  ;;  %v2197_v26 = vrot.slane %v2021_v20, %v4475_v56  ;;  %v2186_v1 = vadd.f32 %v2180_v57, %v2143_v53 }
 0x892   :  { %v2146_v40 = vadd.f32 %v2140_v52, %v2103_v39  ;;  %v2309_v56 = vmul.f32 %v4972_v59, %v2283_v42  ;;  %v2269_v17 = vmul.f32 %v4970_v34, %v2252_v16  ;;  %v2312_v54 = vmul.f32 %v4972_v59, %v2295_v24 }
 0x893   :  { %v5336_v31 = vpop.permute.xlu1 %2909  ;;  %v5338_v55 = vpop.permute.xlu0 %2907  ;;  %v2223_v48 = vmul.f32 %v4968_v44, %v2197_v26  ;;  %v2352_v44 = vmul.f32 %v4986_v0, %v2326_v61  ;;  %v2338_v57 = vrot.slane %v2024_v63, %v4496_v47 }
 0x894   :  { %v2189_v23 = vadd.f32 %v2183_v46, %v2146_v40  ;;  %v2919_v47 = vsel %vm1600_vm4, %v5338_v55, %v5336_v31 }
 0x895   :  { %v2229_v51 = vadd.f32 %v2223_v48, %v2186_v1  ;;  %v2355_v34 = vmul.f32 %v4986_v0, %v2338_v57 }
 0x896   :  { %v2232_v35 = vadd.f32 %v2226_v38, %v2189_v23 }
 0x897   :  { %v5342_v60 = vpop.permute.xlu1 %2913  ;;  %v5344_v33 = vpop.permute.xlu0 %2911  ;;  %v2272_v37 = vadd.f32 %v2266_v14, %v2229_v51 }
 0x898   :  { %v2275_v39 = vadd.f32 %v2269_v17, %v2232_v35 }
 0x899   :  { %v2315_v53 = vadd.f32 %v2309_v56, %v2272_v37 }
 0x89a   :  { %v2318_v1 = vadd.f32 %v2312_v54, %v2275_v39 }
 0x89b   :  { %v5349_v28 = vpop.permute.xlu1 %2917  ;;  %v5351_v2 = vpop.permute.xlu0 %2915  ;;  %v2358_v52 = vadd.f32 %v2352_v44, %v2315_v53 }
 0x89c   :  { %v2361_v6 = vadd.f32 %v2355_v34, %v2318_v1  ;;  %v2921_v51 = vsel %vm1600_vm4, %v5342_v60, %v5351_v2 }
 0x89d   :  { %v2787_v20 = vadd.f32 %v5279_v5, %v2358_v52  ;;  %v2920_v5 = vsel %vm1600_vm4, %v5336_v31, %v5344_v33  ;;  %v2930_v31 = vadd.f32 %v2919_v47, %v5321_v3  ;;  %v2933_v38 = vadd.f32 %v2921_v51, %v5332_v41 }
 0x89e   :  { %v2790_v4 = vadd.f32 %v5295_v30, %v2361_v6  ;;  %v2922_v30 = vsel %vm1600_vm4, %v5351_v2, %v5349_v28 }
 0x89f   :  { %v5354_v22 = vpop.permute.xlu1 %2980  ;;  %v5356_v58 = vpop.permute.xlu0 %2978  ;;  %v2858_v40 = vadd.f32 %v5317_v9, %v2787_v20 }
 0x8a0   :  { %v2861_v9 = vadd.f32 %v5324_v8, %v2790_v4  ;;  %v2931_v8 = vadd.f32 %v2920_v5, %v5327_v27  ;;  %v2990_v14 = vsel %vm1600_vm4, %v5356_v58, %v5354_v22 }
 0x8a1   :  { %v2929_v46 = vadd.f32 %v5338_v55, %v2858_v40 }
 0x8a2   :  { %v2932_v33 = vadd.f32 %v5342_v60, %v2861_v9  ;;  %v2934_v60 = vadd.f32 %v2922_v30, %v5334_v21 }
 0x8a3   :  { %v5360_v15 = vpop.permute.xlu1 %2984  ;;  %v5362_v43 = vpop.permute.xlu0 %2982  ;;  %v3000_v0 = vadd.f32 %v5356_v58, %v2929_v46  ;;  %v3001_v58 = vadd.f32 %v2990_v14, %v2930_v31 }
 0x8a4   :  { %v2991_v55 = vsel %vm1600_vm4, %v5354_v22, %v5362_v43  ;;  %v3003_v27 = vadd.f32 %v5360_v15, %v2932_v33 }
 0x8a5   :  { %v3002_v16 = vadd.f32 %v2991_v55, %v2931_v8 }
 0x8a7   :  { %v5369_v45 = vpop.permute.xlu1 %2988  ;;  %v5371_v29 = vpop.permute.xlu0 %2986 }
 0x8a8   :  { %v2992_v28 = vsel %vm1600_vm4, %v5360_v15, %v5371_v29  ;;  %v2993_v22 = vsel %vm1600_vm4, %v5371_v29, %v5369_v45 }
 0x8a9   :  { %v3005_v17 = vadd.f32 %v2993_v22, %v2934_v60 }
 0x8ab   :  { %v5378_v19 = vpop.permute.xlu1 %3051  ;;  %v5380_v12 = vpop.permute.xlu0 %3049 }
 0x8ac   :  { %v3071_v23 = vadd.f32 %v5380_v12, %v3000_v0  ;;  %v3061_v41 = vsel %vm1600_vm4, %v5380_v12, %v5378_v19 }
 0x8af   :  { %v5386_v49 = vpop.permute.xlu1 %3055  ;;  %v3054_v10 = vpop.permute.xlu0 %3053 }
 0x8b0   :  { %v3062_v2 = vsel %vm1600_vm4, %v5378_v19, %v3054_v10  ;;  %v3004_v10 = vadd.f32 %v2992_v28, %v2933_v38  ;;  %v3074_v56 = vadd.f32 %v5386_v49, %v3003_v27  ;;  %v3072_v19 = vadd.f32 %v3061_v41, %v3001_v58 }
 0x8b1   :  { %v3073_v61 = vadd.f32 %v3062_v2, %v3002_v16 }
 0x8b3   :  { %v5392_v50 = vpop.permute.xlu1 %3059  ;;  %v5394_v13 = vpop.permute.xlu0 %3057 }
 0x8b4   :  { %v3063_v21 = vsel %vm1600_vm4, %v5386_v49, %v5394_v13  ;;  %v3064_v12 = vsel %vm1600_vm4, %v5394_v13, %v5392_v50 }
 0x8b5   :  { %v3075_v44 = vadd.f32 %v3063_v21, %v3004_v10  ;;  %v3076_v34 = vadd.f32 %v3064_v12, %v3005_v17 }
 0x8b7   :  { %v3123_v18 = vpop.permute.xlu1 %3122  ;;  %v3121_v32 = vpop.permute.xlu0 %3120 }
 0x8b8   :  { %v3142_v43 = vadd.f32 %v3121_v32, %v3071_v23  ;;  %v3132_v45 = vsel %vm1600_vm4, %v3121_v32, %v3123_v18 }
 0x8b9   :  { %v3143_v32 = vadd.f32 %v3132_v45, %v3072_v19 }
 0x8bb   :  { %v5404_v36 = vpop.permute.xlu1 %3126  ;;  %v3125_v7 = vpop.permute.xlu0 %3124 }
 0x8bc   :  { %v3133_v37 = vsel %vm1600_vm4, %v3123_v18, %v3125_v7  ;;  %v3145_v7 = vadd.f32 %v5404_v36, %v3074_v56 }
 0x8bd   :  { %v3144_v39 = vadd.f32 %v3133_v37, %v3073_v61 }
 0x8bf   :  { %v3131_v26 = vpop.permute.xlu1 %3130  ;;  %v3129_v25 = vpop.permute.xlu0 %3128 }
 0x8c0   :  { %v3134_v49 = vsel %vm1600_vm4, %v5404_v36, %v3129_v25  ;;  %v3135_v57 = vsel %vm1600_vm4, %v3129_v25, %v3131_v26 }
 0x8c1   :  { %v3146_v36 = vadd.f32 %v3134_v49, %v3075_v44  ;;  %v3147_v4 = vadd.f32 %v3135_v57, %v3076_v34 }
 0x8c3   :  { %v3192_v62 = vpop.permute.xlu1 %3191  ;;  %v3194_v48 = vpop.permute.xlu0 %3193 }
 0x8c4   :  { %v3213_v35 = vadd.f32 %v3192_v62, %v3142_v43  ;;  %v3203_v54 = vsel %vm1600_vm4, %v3192_v62, %v3194_v48 }
 0x8c5   :  { %v3214_v62 = vadd.f32 %v3203_v54, %v3143_v32 }
 0x8c7   :  { %v3196_v59 = vpop.permute.xlu1 %3195  ;;  %v3198_v63 = vpop.permute.xlu0 %3197 }
 0x8c8   :  { %v3204_v29 = vsel %vm1600_vm4, %v3194_v48, %v3196_v59  ;;  %v3216_v1 = vadd.f32 %v3198_v63, %v3145_v7 }
 0x8c9   :  { %v3215_v52 = vadd.f32 %v3204_v29, %v3144_v39 }
 0x8cb   :  { %v3200_v42 = vpop.permute.xlu1 %3199  ;;  %v3202_v3 = vpop.permute.xlu0 %3201 }
 0x8cc   :  { %v3205_v50 = vsel %vm1600_vm4, %v3198_v63, %v3200_v42  ;;  %v3206_v26 = vsel %vm1600_vm4, %v3200_v42, %v3202_v3 }
 0x8cd   :  { %v3217_v25 = vadd.f32 %v3205_v50, %v3146_v36  ;;  %v3218_v51 = vadd.f32 %v3206_v26, %v3147_v4 }
 0x8cf   :  { %v3263_v15 = vpop.permute.xlu1 %3262  ;;  %v3265_v53 = vpop.permute.xlu0 %3264 }
 0x8d0   :  { %v3284_v24 = vadd.f32 %v3263_v15, %v3213_v35  ;;  %v3274_v13 = vsel %vm1600_vm4, %v3263_v15, %v3265_v53 }
 0x8d1   :  { %v3285_v59 = vadd.f32 %v3274_v13, %v3214_v62 }
 0x8d2   :  { %v3297_v18 = vadd.f32 %v4988_v11, %v3284_v24 }
 0x8d3   :  { %v3267_v20 = vpop.permute.xlu1 %3266  ;;  %v3269_v6 = vpop.permute.xlu0 %3268  ;;  %v3298_v23 = vadd.f32 %v4988_v11, %v3285_v59 }
 0x8d4   :  { %v3275_v40 = vsel %vm1600_vm4, %v3265_v53, %v3267_v20  ;;  %3309 = vrot.lane.b32.xlu1 %v3297_v18, %s3477_s28  ;;  %v3287_v46 = vadd.f32 %v3269_v6, %v3216_v1 }
 0x8d5   :  { %v3286_v48 = vadd.f32 %v3275_v40, %v3215_v52 }
 0x8d6   :  { %v3300_v5 = vadd.f32 %v4988_v11, %v3287_v46 }
 0x8d7   :  { %v3299_v47 = vadd.f32 %v4988_v11, %v3286_v48  ;;  %v3271_v0 = vpop.permute.xlu1 %3270  ;;  %v3273_v9 = vpop.permute.xlu0 %3272 }
 0x8d8   :  { %v3276_v63 = vsel %vm1600_vm4, %v3269_v6, %v3271_v0  ;;  %v3277_v55 = vsel %vm1600_vm4, %v3271_v0, %v3273_v9  ;;  %3315 = vrot.lane.b32.xlu0 %v3300_v5, %s3477_s28 }
 0x8d9   :  { %v3288_v30 = vadd.f32 %v3276_v63, %v3217_v25  ;;  %3313 = vrot.lane.b32.xlu1 %v3299_v47, %s3477_s28  ;;  %v3289_v33 = vadd.f32 %v3277_v55, %v3218_v51 }
 0x8db   :  { %v3301_v31 = vadd.f32 %v4988_v11, %v3288_v30  ;;  %v3302_v8 = vadd.f32 %v4988_v11, %v3289_v33 }
 0x8dc   :  { %3311 = vrot.lane.b32.xlu0 %v3298_v23, %s3477_s28 }
 0x8dd   :  { %3317 = vrot.lane.b32.xlu1 %v3301_v31, %s3477_s28 }
 0x8e0   :  { %3319 = vrot.lane.b32.xlu0 %v3302_v8, %s3477_s28  ;;  %s3446_s28 = scalar_lea.vmem %s3343_s7, 768 }
 0x8e1   :  { %p3447_p0 = scmp.ne.s32.totalorder %s3343_s7, %s3446_s28  ;;  %p3452_p2 = scmp.lt.s32.totalorder %s3446_s28, %s3446_s28 }
 0x8e3   :  { %p3453_p3 = por %p3452_p2, %p3451_p1 }
 0x8e5   :  { %p3454_p4 = pnand %p3453_p3, %p3447_p0 }
 0x946   :  { %v3310_v14 = vpop.permute.xlu1 %3309 }
 0x94a   :  { %v3316_v42 = vpop.permute.xlu0 %3315 }
 0x94b   :  { %v3314_v38 = vpop.permute.xlu1 %3313 }
 0x94c   :  { %3333 = vst.msk [vmem:[#allocation2 + $0x10] sm:$0xff] %vm1318_vm5, %v3314_v38 }
 0x94e   :  { %v3312_v28 = vpop.permute.xlu0 %3311 }
 0x94f   :  { %v3318_v2 = vpop.permute.xlu1 %3317  ;;  %v3321_v43 = vsel %vm322_vm6, %v3310_v14, %v3312_v28  ;;  %v3322_v3 = vsel %vm322_vm6, %v3312_v28, %v3314_v38 }
 0x950   :  { %v3323_v60 = vsel %vm322_vm6, %v3316_v42, %v3318_v2  ;;  %3331 = vst [vmem:[#allocation2] sm:$0xff] %v3321_v43  ;;  %3332 = vst [vmem:[#allocation2 + $0x8] sm:$0xff] %v3322_v3 }
 0x951   :  { %3334 = vst [vmem:[#allocation2 + $0x18] sm:$0xff] %v3323_v60 }
 0x952   :  { %v3320_v11 = vpop.permute.xlu0 %3319 }
 0x953   :  { %v3324_v27 = vsel %vm322_vm6, %v3318_v2, %v3320_v11  ;;  %3336 = vst.msk [vmem:[#allocation2 + $0x28] sm:$0xff] %vm1318_vm5, %v3320_v11 }
 0x954   :  { %3335 = vst [vmem:[#allocation2 + $0x20] sm:$0xff] %v3324_v27 }
 0x955   :  { %3457 = shalt.err (!%p3454_p4)
}
 0x956   :  { %s3458_s2 = scalar_lea.hbm %s5511_s8, 768 }
 0x957   :  { %p3459_p5 = scmp.ne.s32.totalorder %s5511_s8, %s3458_s2  ;;  %p3462_p6 = scmp.lt.u32.totalorder %s3458_s2, %s5511_s8 }
 0x959   :  { %p3464_p7 = pnand %p3462_p6, %p3459_p5 }
 0x95b   :  { %3467 = shalt.err (!%p3464_p7)
}
 0x95c   :  { %s3498_s14 = smov 384   ;;  %s3499_s18 = smov 24  }
 0x95d   :  { %3348 = dma.vmem_to_hbm [thread:$0]  %s3343_s7, 768, %s5511_s8, [#allocation3], %s3498_s14, %s3498_s14, %s3499_s18  }
 0x95e   :  { %3468 = dma.done.wait [#allocation3], 768  }
 0x95f   :  { %3469 = vsyncadd [#allocation3], 4294966528 }
 0x960   :  { %3352 = vsyncpa [#allocation3], 1 }

</bundles_post_ra>
